<compile_context>
chip_gen: v6e
topology: v6e:2x2x1
jax: 0.10.0
libtpu: 0.0.40
codegen_flags: <defaults>
</compile_context>

<pallas_src>
import jax
import jax.numpy as jnp
from jax.experimental import pallas as pl
from jax.experimental.pallas import tpu as pltpu

_SELU_ALPHA = 1.6732632423543772
_SELU_SCALE = 1.0507009873554805


def _selu(x):
    # exp evaluated on min(x, 0) -> no inf intermediate for large positive x
    return _SELU_SCALE * jnp.where(
        x > 0.0, x, _SELU_ALPHA * (jnp.exp(jnp.minimum(x, 0.0)) - 1.0))


def init_params(key, note_embedding_dim, num_notes, z_dim, rnn_hidden_size):
    E, N, Z, H = note_embedding_dim, num_notes, z_dim, rnn_hidden_size
    keys = iter(jax.random.split(key, 32))

    def xavier(shape):  # weights stored as (in, out); same std as torch (out, in)
        std = (2.0 / (shape[0] + shape[1])) ** 0.5
        return std * jax.random.normal(next(keys), shape, jnp.float32)

    def bias(shape, fan_in):
        bound = 1.0 / (fan_in ** 0.5)
        return jax.random.uniform(next(keys), shape, jnp.float32, -bound, bound)

    return dict(
        x0=jnp.zeros((1, E), jnp.float32),                       # nn.Parameter(zeros)
        w1=xavier((Z, H)),   b1=bias((1, H), Z),                 # Linear(z_dim, H)
        w2=xavier((H, E)),   b2=bias((1, E), H),                 # Linear(H, E)
        wih0=xavier((2 * E, 3 * H)), whh0=xavier((H, 3 * H)),    # GRU layer 0
        bih0=bias((1, 3 * H), H),    bhh0=bias((1, 3 * H), H),
        wih1=xavier((H, 3 * H)),     whh1=xavier((H, 3 * H)),    # GRU layer 1
        bih1=bias((1, 3 * H), H),    bhh1=bias((1, 3 * H), H),
        w3=xavier((H, N)),   b3=bias((1, N), H),                 # Linear(H, num_notes)
        emb=xavier((N, E)),                                      # note embedding table
    )


def srdecoder_forward(z, score_tensor, params, train=False):
    """Returns (weights (B, S, num_notes), samples (B, 1, S)) like SRDecoder.forward."""
    # TODO(synk): teacher-forcing and multinomial-sampling branches (host-side
    # random.random() decision) are not implemented; this is the train=False path.
    del train
    B, Z = z.shape
    S = int(score_tensor.shape[1])
    E = int(params['x0'].shape[1])
    H = int(params['whh0'].shape[0])
    N = int(params['emb'].shape[0])
    Bp = ((B + 7) // 8) * 8                    # full f32 sublanes (no masked rows)
    f32 = jnp.float32

    # ---------------- host-side packing: 17 tiny params -> 2 DMA slabs ----------
    W_COLS = max(H, E, 3 * H, 6 * H, N)

    def pad2(a, rows, cols):
        a = a.astype(f32)
        return jnp.pad(a, ((0, rows - a.shape[0]), (0, cols - a.shape[1])))

    def rup8(r):
        return ((r + 7) // 8) * 8

    # block-diagonal W_hh so both layers' recurrent gates come from one matmul
    whh_bd = jnp.concatenate([
        jnp.concatenate([params['whh0'], jnp.zeros((H, 3 * H), f32)], axis=1),
        jnp.concatenate([jnp.zeros((H, 3 * H), f32), params['whh1']], axis=1)],
        axis=0)                                                     # (2H, 6H)

    blocks = [('w1', params['w1']), ('w2', params['w2']), ('wih0', params['wih0']),
              ('whh_bd', whh_bd), ('wih1', params['wih1']), ('w3', params['w3']),
              ('emb', params['emb'])]
    offs, parts, o = {}, [], 0
    for name, a in blocks:
        offs[name] = o
        rp = rup8(a.shape[0])
        parts.append(pad2(a, rp, W_COLS))
        o += rp
    w_slab = jnp.concatenate(parts, axis=0)                         # (rows, W_COLS)

    bhh_cat = jnp.concatenate([params['bhh0'], params['bhh1']], axis=1)     # (1, 6H)
    p_rows = [params['b1'], params['b2'], params['bih0'], bhh_cat,
              params['bih1'], params['b3'], params['x0']]
    p_slab = jnp.concatenate([pad2(r, 1, W_COLS) for r in p_rows], axis=0)  # (7, W_COLS)

    z_p = jnp.pad(z.astype(f32), ((0, Bp - B), (0, 0)))             # (Bp, Z)

    # ----------------------------- the kernel -----------------------------------
    def kernel(z_ref, w_ref, p_ref, wout_ref, sout_ref):
        dot = lambda a, b: jnp.dot(a, b, preferred_element_type=jnp.float32)

        # hoisted loads (once per call)
        w1 = w_ref[offs['w1']:offs['w1'] + Z, :H]
        w2 = w_ref[offs['w2']:offs['w2'] + H, :E]
        wih0 = w_ref[offs['wih0']:offs['wih0'] + 2 * E, :3 * H]
        whh = w_ref[offs['whh_bd']:offs['whh_bd'] + 2 * H, :6 * H]
        wih1 = w_ref[offs['wih1']:offs['wih1'] + H, :3 * H]
        w3 = w_ref[offs['w3']:offs['w3'] + H, :N]
        emb = w_ref[offs['emb']:offs['emb'] + N, :E]
        b1 = p_ref[0:1, :H]
        b2 = p_ref[1:2, :E]
        bih0 = p_ref[2:3, :3 * H]
        bhh = p_ref[3:4, :6 * H]
        bih1 = p_ref[4:5, :3 * H]
        b3 = p_ref[5:6, :N]
        x0 = p_ref[6:7, :E]

        # z -> rnn_input_emb : Linear(z_dim,H) -> SELU -> Linear(H,E), once
        z_emb = dot(_selu(dot(z_ref[...], w1) + b1), w2) + b2            # (Bp, E)

        # layer-0 gate preactivation pieces hoisted out of the loop:
        #   constant z_emb part (+ b_ih), and the embedding table folded through
        #   W_ih0[:E]  so feedback is  onehot @ M  (one matmul on the chain).
        wih0_x = wih0[:E, :]
        gx0_const = dot(z_emb, wih0[E:, :]) + bih0                       # (Bp, 3H)
        M = dot(emb, wih0_x)                                             # (N, 3H)
        gx0 = dot(x0, wih0_x) + gx0_const                                # step-0 gates

        iota_n = jax.lax.broadcasted_iota(jnp.int32, (Bp, N), 1)
        h_cat = jnp.zeros((Bp, 2 * H), jnp.float32)                      # [h0 | h1]
        probs_steps, idx_steps = [], []

        # fully unrolled decode loop (S static & small): scheduler sees across steps
        for step in range(S):
            # both layers' recurrent gate projections — one block-diag matmul,
            # issued first, depends only on the previous step's carry
            gh = dot(h_cat, whh) + bhh                                   # (Bp, 6H)
            gh0, gh1 = gh[:, :3 * H], gh[:, 3 * H:]
            h0, h1 = h_cat[:, :H], h_cat[:, H:]

            # GRU layer 0 (input = [cur_x, z_emb], already folded into gx0)
            ru0 = jax.nn.sigmoid(gx0[:, :2 * H] + gh0[:, :2 * H])        # r|u fused
            n0 = jnp.tanh(gx0[:, 2 * H:] + ru0[:, :H] * gh0[:, 2 * H:])
            h0n = (1.0 - ru0[:, H:]) * n0 + ru0[:, H:] * h0

            # GRU layer 1 (input = layer-0 output; eval => no inter-layer dropout)
            gx1 = dot(h0n, wih1) + bih1
            ru1 = jax.nn.sigmoid(gx1[:, :2 * H] + gh1[:, :2 * H])
            n1 = jnp.tanh(gx1[:, 2 * H:] + ru1[:, :H] * gh1[:, 2 * H:])
            h1n = (1.0 - ru1[:, H:]) * n1 + ru1[:, H:] * h1

            # rnn_out_to_note_emb : Linear(H, num_notes) -> ReLU
            probs = jnp.maximum(dot(h1n, w3) + b3, 0.0)                  # (Bp, N)

            # argmax with first-max tie-break (exactly torch topk(k=1))
            maxv = jnp.max(probs, axis=1, keepdims=True)
            idx = jnp.min(jnp.where(probs == maxv, iota_n, N),
                          axis=1, keepdims=True)                         # (Bp, 1)

            probs_steps.append(probs)
            idx_steps.append(idx)

            if step + 1 < S:
                onehot = (iota_n == idx).astype(jnp.float32)
                gx0 = dot(onehot, M) + gx0_const     # embedding feedback, folded
                h_cat = jnp.concatenate([h0n, h1n], axis=1)

        # single lane-dense stores at the end (no per-step masked partial stores)
        wout_ref[...] = jnp.concatenate(probs_steps, axis=1)             # (Bp, S*N)
        sout_ref[...] = jnp.concatenate(idx_steps, axis=1)               # (Bp, S)

    # ----------------------------- launch ---------------------------------------
    vmem = pl.BlockSpec(memory_space=pltpu.MemorySpace.VMEM)
    flops = int(2 * Bp * (Z * H + H * E + E * 3 * H) + 2 * N * E * 3 * H
                + S * 2 * Bp * (2 * H * 6 * H + H * 3 * H + H * N + N * 3 * H))
    trans = int(Bp * H + S * Bp * (2 * 2 * H + 2 * H))
    bytes_acc = int(4 * (z_p.size + w_slab.size + p_slab.size + Bp * S * N + Bp * S))

    weights_flat, samples_bs = pl.pallas_call(
        kernel,
        out_shape=(jax.ShapeDtypeStruct((Bp, S * N), jnp.float32),
                   jax.ShapeDtypeStruct((Bp, S), jnp.int32)),
        in_specs=[vmem, vmem, vmem],
        out_specs=(vmem, vmem),
        cost_estimate=pl.CostEstimate(flops=flops, transcendentals=trans,
                                      bytes_accessed=bytes_acc),
    )(z_p, w_slab, p_slab)

    weights = weights_flat[:B].reshape(B, S, N)       # (B, S, num_notes)
    samples = samples_bs[:B][:, None, :]              # (B, 1, S)
    return weights, samples


if __name__ == "__main__":
    note_embedding_dim = 8
    num_notes = 16
    z_dim = 16
    rnn_hidden_size = 32
    batch = 4
    measure_seq_len = 8

    key = jax.random.PRNGKey(0)
    kp, kz, ks = jax.random.split(key, 3)
    params = init_params(kp, note_embedding_dim, num_notes, z_dim, rnn_hidden_size)
    z = jax.random.normal(kz, (batch, z_dim), jnp.float32)
    score = jax.random.randint(ks, (batch, measure_seq_len), 0, num_notes, jnp.int32)

    weights, samples = srdecoder_forward(z, score, params, train=False)
    jax.block_until_ready((weights, samples))

    assert weights.shape == (batch, measure_seq_len, num_notes)
    assert weights.dtype == jnp.float32
    assert samples.shape == (batch, 1, measure_seq_len)
    assert int(samples.min()) >= 0 and int(samples.max()) < num_notes
    print("KERNEL_OK")
</pallas_src>

<mosaic_0001>
module attributes {stable_mosaic.version = 11 : i64} {
  func.func @kernel(%arg0: memref<8x16xf32, #tpu.memory_space<vmem>>, %arg1: memref<208x192xf32, #tpu.memory_space<vmem>>, %arg2: memref<7x192xf32, #tpu.memory_space<vmem>>, %arg3: memref<8x128xf32, #tpu.memory_space<vmem>>, %arg4: memref<8x8xi32, #tpu.memory_space<vmem>>) attributes {dimension_semantics = [], scalar_prefetch = 0 : i64, scratch_operands = 0 : i64, tpu.core_type = #tpu.core_type<tc>} {
    %c0 = arith.constant 0 : index
    %c0_0 = arith.constant 0 : index
    %0 = vector.load %arg1[%c0, %c0_0] : memref<208x192xf32, #tpu.memory_space<vmem>>, vector<16x32xf32>
    %c16 = arith.constant 16 : index
    %c0_1 = arith.constant 0 : index
    %1 = vector.load %arg1[%c16, %c0_1] : memref<208x192xf32, #tpu.memory_space<vmem>>, vector<32x8xf32>
    %c48 = arith.constant 48 : index
    %c0_2 = arith.constant 0 : index
    %2 = vector.load %arg1[%c48, %c0_2] : memref<208x192xf32, #tpu.memory_space<vmem>>, vector<16x96xf32>
    %c64 = arith.constant 64 : index
    %c0_3 = arith.constant 0 : index
    %3 = vector.load %arg1[%c64, %c0_3] : memref<208x192xf32, #tpu.memory_space<vmem>>, vector<64x192xf32>
    %c128 = arith.constant 128 : index
    %c0_4 = arith.constant 0 : index
    %4 = vector.load %arg1[%c128, %c0_4] : memref<208x192xf32, #tpu.memory_space<vmem>>, vector<32x96xf32>
    %c160 = arith.constant 160 : index
    %c0_5 = arith.constant 0 : index
    %5 = vector.load %arg1[%c160, %c0_5] : memref<208x192xf32, #tpu.memory_space<vmem>>, vector<32x16xf32>
    %c192 = arith.constant 192 : index
    %c0_6 = arith.constant 0 : index
    %6 = vector.load %arg1[%c192, %c0_6] : memref<208x192xf32, #tpu.memory_space<vmem>>, vector<16x8xf32>
    %c0_7 = arith.constant 0 : index
    %c0_8 = arith.constant 0 : index
    %7 = vector.load %arg2[%c0_7, %c0_8] : memref<7x192xf32, #tpu.memory_space<vmem>>, vector<1x32xf32>
    %c1 = arith.constant 1 : index
    %c0_9 = arith.constant 0 : index
    %8 = vector.load %arg2[%c1, %c0_9] : memref<7x192xf32, #tpu.memory_space<vmem>>, vector<1x8xf32>
    %c2 = arith.constant 2 : index
    %c0_10 = arith.constant 0 : index
    %9 = vector.load %arg2[%c2, %c0_10] : memref<7x192xf32, #tpu.memory_space<vmem>>, vector<1x96xf32>
    %c3 = arith.constant 3 : index
    %c0_11 = arith.constant 0 : index
    %10 = vector.load %arg2[%c3, %c0_11] : memref<7x192xf32, #tpu.memory_space<vmem>>, vector<1x192xf32>
    %c4 = arith.constant 4 : index
    %c0_12 = arith.constant 0 : index
    %11 = vector.load %arg2[%c4, %c0_12] : memref<7x192xf32, #tpu.memory_space<vmem>>, vector<1x96xf32>
    %c5 = arith.constant 5 : index
    %c0_13 = arith.constant 0 : index
    %12 = vector.load %arg2[%c5, %c0_13] : memref<7x192xf32, #tpu.memory_space<vmem>>, vector<1x16xf32>
    %c6 = arith.constant 6 : index
    %c0_14 = arith.constant 0 : index
    %13 = vector.load %arg2[%c6, %c0_14] : memref<7x192xf32, #tpu.memory_space<vmem>>, vector<1x8xf32>
    %c0_15 = arith.constant 0 : index
    %c0_16 = arith.constant 0 : index
    %14 = vector.load %arg0[%c0_15, %c0_16] : memref<8x16xf32, #tpu.memory_space<vmem>>, vector<8x16xf32>
    %cst = arith.constant dense<0.000000e+00> : vector<8x32xf32>
    %15 = tpu.matmul %14, %0, %cst {dimension_numbers = #tpu.dot_dimension_numbers<[1], [0], [0], [1], [0, 0, 1, 1], [], []>} : vector<8x16xf32>, vector<16x32xf32>, vector<8x32xf32> -> vector<8x32xf32>
    %16 = vector.broadcast %7 : vector<1x32xf32> to vector<8x32xf32>
    %17 = arith.addf %15, %16 : vector<8x32xf32>
    %cst_17 = arith.constant 0.000000e+00 : f32
    %18 = vector.broadcast %cst_17 : f32 to vector<8x32xf32>
    %19 = arith.cmpf ogt, %17, %18 : vector<8x32xf32>
    %cst_18 = arith.constant 0.000000e+00 : f32
    %20 = vector.broadcast %cst_18 : f32 to vector<8x32xf32>
    %21 = arith.minimumf %17, %20 : vector<8x32xf32>
    %22 = math.exp %21 : vector<8x32xf32>
    %cst_19 = arith.constant 1.000000e+00 : f32
    %23 = vector.broadcast %cst_19 : f32 to vector<8x32xf32>
    %24 = arith.subf %22, %23 : vector<8x32xf32>
    %cst_20 = arith.constant 1.67326319 : f32
    %25 = vector.broadcast %cst_20 : f32 to vector<8x32xf32>
    %26 = arith.mulf %25, %24 : vector<8x32xf32>
    %27 = arith.select %19, %17, %26 : vector<8x32xi1>, vector<8x32xf32>
    %cst_21 = arith.constant 1.05070102 : f32
    %28 = vector.broadcast %cst_21 : f32 to vector<8x32xf32>
    %29 = arith.mulf %28, %27 : vector<8x32xf32>
    %cst_22 = arith.constant dense<0.000000e+00> : vector<8x8xf32>
    %30 = tpu.matmul %29, %1, %cst_22 {dimension_numbers = #tpu.dot_dimension_numbers<[1], [0], [0], [1], [0, 0, 1, 1], [], []>} : vector<8x32xf32>, vector<32x8xf32>, vector<8x8xf32> -> vector<8x8xf32>
    %31 = vector.broadcast %8 : vector<1x8xf32> to vector<8x8xf32>
    %32 = arith.addf %30, %31 : vector<8x8xf32>
    %33 = vector.extract_strided_slice %2 {offsets = [0, 0], sizes = [8, 96], strides = [1, 1]} : vector<16x96xf32> to vector<8x96xf32>
    %34 = vector.extract_strided_slice %2 {offsets = [8, 0], sizes = [8, 96], strides = [1, 1]} : vector<16x96xf32> to vector<8x96xf32>
    %cst_23 = arith.constant dense<0.000000e+00> : vector<8x96xf32>
    %35 = tpu.matmul %32, %34, %cst_23 {dimension_numbers = #tpu.dot_dimension_numbers<[1], [0], [0], [1], [0, 0, 1, 1], [], []>} : vector<8x8xf32>, vector<8x96xf32>, vector<8x96xf32> -> vector<8x96xf32>
    %36 = vector.broadcast %9 : vector<1x96xf32> to vector<8x96xf32>
    %37 = arith.addf %35, %36 : vector<8x96xf32>
    %cst_24 = arith.constant dense<0.000000e+00> : vector<16x96xf32>
    %38 = tpu.matmul %6, %33, %cst_24 {dimension_numbers = #tpu.dot_dimension_numbers<[1], [0], [0], [1], [0, 0, 1, 1], [], []>} : vector<16x8xf32>, vector<8x96xf32>, vector<16x96xf32> -> vector<16x96xf32>
    %cst_25 = arith.constant dense<0.000000e+00> : vector<1x96xf32>
    %39 = tpu.matmul %13, %33, %cst_25 {dimension_numbers = #tpu.dot_dimension_numbers<[1], [0], [0], [1], [0, 0, 1, 1], [], []>} : vector<1x8xf32>, vector<8x96xf32>, vector<1x96xf32> -> vector<1x96xf32>
    %40 = vector.broadcast %39 : vector<1x96xf32> to vector<8x96xf32>
    %41 = arith.addf %40, %37 : vector<8x96xf32>
    %42 = tpu.iota {dimensions = array<i32: 1>} : vector<8x16xi32>
    %cst_26 = arith.constant 0.000000e+00 : f32
    %43 = vector.broadcast %cst_26 : f32 to vector<8x64xf32>
    %cst_27 = arith.constant dense<0.000000e+00> : vector<8x192xf32>
    %44 = tpu.matmul %43, %3, %cst_27 {dimension_numbers = #tpu.dot_dimension_numbers<[1], [0], [0], [1], [0, 0, 1, 1], [], []>} : vector<8x64xf32>, vector<64x192xf32>, vector<8x192xf32> -> vector<8x192xf32>
    %45 = vector.broadcast %10 : vector<1x192xf32> to vector<8x192xf32>
    %46 = arith.addf %44, %45 : vector<8x192xf32>
    %47 = vector.extract_strided_slice %46 {offsets = [0, 0], sizes = [8, 96], strides = [1, 1]} : vector<8x192xf32> to vector<8x96xf32>
    %48 = vector.extract_strided_slice %46 {offsets = [0, 96], sizes = [8, 96], strides = [1, 1]} : vector<8x192xf32> to vector<8x96xf32>
    %49 = vector.extract_strided_slice %43 {offsets = [0, 0], sizes = [8, 32], strides = [1, 1]} : vector<8x64xf32> to vector<8x32xf32>
    %50 = vector.extract_strided_slice %43 {offsets = [0, 32], sizes = [8, 32], strides = [1, 1]} : vector<8x64xf32> to vector<8x32xf32>
    %51 = vector.extract_strided_slice %41 {offsets = [0, 0], sizes = [8, 64], strides = [1, 1]} : vector<8x96xf32> to vector<8x64xf32>
    %52 = vector.extract_strided_slice %47 {offsets = [0, 0], sizes = [8, 64], strides = [1, 1]} : vector<8x96xf32> to vector<8x64xf32>
    %53 = arith.addf %51, %52 : vector<8x64xf32>
    %54 = arith.negf %53 : vector<8x64xf32>
    %55 = math.exp %54 : vector<8x64xf32>
    %cst_28 = arith.constant 1.000000e+00 : f32
    %56 = vector.broadcast %cst_28 : f32 to vector<8x64xf32>
    %57 = arith.addf %56, %55 : vector<8x64xf32>
    %58 = arith.divf %56, %57 : vector<8x64xf32>
    %59 = vector.extract_strided_slice %41 {offsets = [0, 64], sizes = [8, 32], strides = [1, 1]} : vector<8x96xf32> to vector<8x32xf32>
    %60 = vector.extract_strided_slice %58 {offsets = [0, 0], sizes = [8, 32], strides = [1, 1]} : vector<8x64xf32> to vector<8x32xf32>
    %61 = vector.extract_strided_slice %47 {offsets = [0, 64], sizes = [8, 32], strides = [1, 1]} : vector<8x96xf32> to vector<8x32xf32>
    %62 = arith.mulf %60, %61 : vector<8x32xf32>
    %63 = arith.addf %59, %62 : vector<8x32xf32>
    %64 = math.tanh %63 : vector<8x32xf32>
    %65 = vector.extract_strided_slice %58 {offsets = [0, 32], sizes = [8, 32], strides = [1, 1]} : vector<8x64xf32> to vector<8x32xf32>
    %cst_29 = arith.constant 1.000000e+00 : f32
    %66 = vector.broadcast %cst_29 : f32 to vector<8x32xf32>
    %67 = arith.subf %66, %65 : vector<8x32xf32>
    %68 = arith.mulf %67, %64 : vector<8x32xf32>
    %69 = vector.extract_strided_slice %58 {offsets = [0, 32], sizes = [8, 32], strides = [1, 1]} : vector<8x64xf32> to vector<8x32xf32>
    %70 = arith.mulf %69, %49 : vector<8x32xf32>
    %71 = arith.addf %68, %70 : vector<8x32xf32>
    %cst_30 = arith.constant dense<0.000000e+00> : vector<8x96xf32>
    %72 = tpu.matmul %71, %4, %cst_30 {dimension_numbers = #tpu.dot_dimension_numbers<[1], [0], [0], [1], [0, 0, 1, 1], [], []>} : vector<8x32xf32>, vector<32x96xf32>, vector<8x96xf32> -> vector<8x96xf32>
    %73 = vector.broadcast %11 : vector<1x96xf32> to vector<8x96xf32>
    %74 = arith.addf %72, %73 : vector<8x96xf32>
    %75 = vector.extract_strided_slice %74 {offsets = [0, 0], sizes = [8, 64], strides = [1, 1]} : vector<8x96xf32> to vector<8x64xf32>
    %76 = vector.extract_strided_slice %48 {offsets = [0, 0], sizes = [8, 64], strides = [1, 1]} : vector<8x96xf32> to vector<8x64xf32>
    %77 = arith.addf %75, %76 : vector<8x64xf32>
    %78 = arith.negf %77 : vector<8x64xf32>
    %79 = math.exp %78 : vector<8x64xf32>
    %cst_31 = arith.constant 1.000000e+00 : f32
    %80 = vector.broadcast %cst_31 : f32 to vector<8x64xf32>
    %81 = arith.addf %80, %79 : vector<8x64xf32>
    %82 = arith.divf %80, %81 : vector<8x64xf32>
    %83 = vector.extract_strided_slice %74 {offsets = [0, 64], sizes = [8, 32], strides = [1, 1]} : vector<8x96xf32> to vector<8x32xf32>
    %84 = vector.extract_strided_slice %82 {offsets = [0, 0], sizes = [8, 32], strides = [1, 1]} : vector<8x64xf32> to vector<8x32xf32>
    %85 = vector.extract_strided_slice %48 {offsets = [0, 64], sizes = [8, 32], strides = [1, 1]} : vector<8x96xf32> to vector<8x32xf32>
    %86 = arith.mulf %84, %85 : vector<8x32xf32>
    %87 = arith.addf %83, %86 : vector<8x32xf32>
    %88 = math.tanh %87 : vector<8x32xf32>
    %89 = vector.extract_strided_slice %82 {offsets = [0, 32], sizes = [8, 32], strides = [1, 1]} : vector<8x64xf32> to vector<8x32xf32>
    %cst_32 = arith.constant 1.000000e+00 : f32
    %90 = vector.broadcast %cst_32 : f32 to vector<8x32xf32>
    %91 = arith.subf %90, %89 : vector<8x32xf32>
    %92 = arith.mulf %91, %88 : vector<8x32xf32>
    %93 = vector.extract_strided_slice %82 {offsets = [0, 32], sizes = [8, 32], strides = [1, 1]} : vector<8x64xf32> to vector<8x32xf32>
    %94 = arith.mulf %93, %50 : vector<8x32xf32>
    %95 = arith.addf %92, %94 : vector<8x32xf32>
    %cst_33 = arith.constant dense<0.000000e+00> : vector<8x16xf32>
    %96 = tpu.matmul %95, %5, %cst_33 {dimension_numbers = #tpu.dot_dimension_numbers<[1], [0], [0], [1], [0, 0, 1, 1], [], []>} : vector<8x32xf32>, vector<32x16xf32>, vector<8x16xf32> -> vector<8x16xf32>
    %97 = vector.broadcast %12 : vector<1x16xf32> to vector<8x16xf32>
    %98 = arith.addf %96, %97 : vector<8x16xf32>
    %cst_34 = arith.constant 0.000000e+00 : f32
    %99 = vector.broadcast %cst_34 : f32 to vector<8x16xf32>
    %100 = arith.maximumf %98, %99 : vector<8x16xf32>
    %cst_35 = arith.constant dense<0xFF800000> : vector<8xf32>
    %101 = vector.multi_reduction <maximumf>, %100, %cst_35 [1] : vector<8x16xf32> to vector<8xf32>
    %102 = vector.shape_cast %101 : vector<8xf32> to vector<8x1xf32>
    %103 = vector.broadcast %102 : vector<8x1xf32> to vector<8x16xf32>
    %104 = arith.cmpf oeq, %100, %103 : vector<8x16xf32>
    %c16_i32 = arith.constant 16 : i32
    %105 = vector.broadcast %c16_i32 : i32 to vector<8x16xi32>
    %106 = arith.select %104, %42, %105 : vector<8x16xi1>, vector<8x16xi32>
    %cst_36 = arith.constant dense<2147483647> : vector<8xi32>
    %107 = vector.multi_reduction <minsi>, %106, %cst_36 [1] : vector<8x16xi32> to vector<8xi32>
    %108 = vector.shape_cast %107 : vector<8xi32> to vector<8x1xi32>
    %109 = vector.broadcast %108 : vector<8x1xi32> to vector<8x16xi32>
    %110 = arith.cmpi eq, %42, %109 : vector<8x16xi32>
    %111 = arith.extui %110 : vector<8x16xi1> to vector<8x16xi32>
    %112 = arith.sitofp %111 : vector<8x16xi32> to vector<8x16xf32>
    %cst_37 = arith.constant dense<0.000000e+00> : vector<8x96xf32>
    %113 = tpu.matmul %112, %38, %cst_37 {dimension_numbers = #tpu.dot_dimension_numbers<[1], [0], [0], [1], [0, 0, 1, 1], [], []>} : vector<8x16xf32>, vector<16x96xf32>, vector<8x96xf32> -> vector<8x96xf32>
    %114 = arith.addf %113, %37 : vector<8x96xf32>
    %115 = tpu.concatenate %71, %95 in 1 : vector<8x32xf32>, vector<8x32xf32> -> vector<8x64xf32>
    %cst_38 = arith.constant dense<0.000000e+00> : vector<8x192xf32>
    %116 = tpu.matmul %115, %3, %cst_38 {dimension_numbers = #tpu.dot_dimension_numbers<[1], [0], [0], [1], [0, 0, 1, 1], [], []>} : vector<8x64xf32>, vector<64x192xf32>, vector<8x192xf32> -> vector<8x192xf32>
    %117 = vector.broadcast %10 : vector<1x192xf32> to vector<8x192xf32>
    %118 = arith.addf %116, %117 : vector<8x192xf32>
    %119 = vector.extract_strided_slice %118 {offsets = [0, 0], sizes = [8, 96], strides = [1, 1]} : vector<8x192xf32> to vector<8x96xf32>
    %120 = vector.extract_strided_slice %118 {offsets = [0, 96], sizes = [8, 96], strides = [1, 1]} : vector<8x192xf32> to vector<8x96xf32>
    %121 = vector.extract_strided_slice %115 {offsets = [0, 0], sizes = [8, 32], strides = [1, 1]} : vector<8x64xf32> to vector<8x32xf32>
    %122 = vector.extract_strided_slice %115 {offsets = [0, 32], sizes = [8, 32], strides = [1, 1]} : vector<8x64xf32> to vector<8x32xf32>
    %123 = vector.extract_strided_slice %114 {offsets = [0, 0], sizes = [8, 64], strides = [1, 1]} : vector<8x96xf32> to vector<8x64xf32>
    %124 = vector.extract_strided_slice %119 {offsets = [0, 0], sizes = [8, 64], strides = [1, 1]} : vector<8x96xf32> to vector<8x64xf32>
    %125 = arith.addf %123, %124 : vector<8x64xf32>
    %126 = arith.negf %125 : vector<8x64xf32>
    %127 = math.exp %126 : vector<8x64xf32>
    %cst_39 = arith.constant 1.000000e+00 : f32
    %128 = vector.broadcast %cst_39 : f32 to vector<8x64xf32>
    %129 = arith.addf %128, %127 : vector<8x64xf32>
    %130 = arith.divf %128, %129 : vector<8x64xf32>
    %131 = vector.extract_strided_slice %114 {offsets = [0, 64], sizes = [8, 32], strides = [1, 1]} : vector<8x96xf32> to vector<8x32xf32>
    %132 = vector.extract_strided_slice %130 {offsets = [0, 0], sizes = [8, 32], strides = [1, 1]} : vector<8x64xf32> to vector<8x32xf32>
    %133 = vector.extract_strided_slice %119 {offsets = [0, 64], sizes = [8, 32], strides = [1, 1]} : vector<8x96xf32> to vector<8x32xf32>
    %134 = arith.mulf %132, %133 : vector<8x32xf32>
    %135 = arith.addf %131, %134 : vector<8x32xf32>
    %136 = math.tanh %135 : vector<8x32xf32>
    %137 = vector.extract_strided_slice %130 {offsets = [0, 32], sizes = [8, 32], strides = [1, 1]} : vector<8x64xf32> to vector<8x32xf32>
    %cst_40 = arith.constant 1.000000e+00 : f32
    %138 = vector.broadcast %cst_40 : f32 to vector<8x32xf32>
    %139 = arith.subf %138, %137 : vector<8x32xf32>
    %140 = arith.mulf %139, %136 : vector<8x32xf32>
    %141 = vector.extract_strided_slice %130 {offsets = [0, 32], sizes = [8, 32], strides = [1, 1]} : vector<8x64xf32> to vector<8x32xf32>
    %142 = arith.mulf %141, %121 : vector<8x32xf32>
    %143 = arith.addf %140, %142 : vector<8x32xf32>
    %cst_41 = arith.constant dense<0.000000e+00> : vector<8x96xf32>
    %144 = tpu.matmul %143, %4, %cst_41 {dimension_numbers = #tpu.dot_dimension_numbers<[1], [0], [0], [1], [0, 0, 1, 1], [], []>} : vector<8x32xf32>, vector<32x96xf32>, vector<8x96xf32> -> vector<8x96xf32>
    %145 = vector.broadcast %11 : vector<1x96xf32> to vector<8x96xf32>
    %146 = arith.addf %144, %145 : vector<8x96xf32>
    %147 = vector.extract_strided_slice %146 {offsets = [0, 0], sizes = [8, 64], strides = [1, 1]} : vector<8x96xf32> to vector<8x64xf32>
    %148 = vector.extract_strided_slice %120 {offsets = [0, 0], sizes = [8, 64], strides = [1, 1]} : vector<8x96xf32> to vector<8x64xf32>
    %149 = arith.addf %147, %148 : vector<8x64xf32>
    %150 = arith.negf %149 : vector<8x64xf32>
    %151 = math.exp %150 : vector<8x64xf32>
    %cst_42 = arith.constant 1.000000e+00 : f32
    %152 = vector.broadcast %cst_42 : f32 to vector<8x64xf32>
    %153 = arith.addf %152, %151 : vector<8x64xf32>
    %154 = arith.divf %152, %153 : vector<8x64xf32>
    %155 = vector.extract_strided_slice %146 {offsets = [0, 64], sizes = [8, 32], strides = [1, 1]} : vector<8x96xf32> to vector<8x32xf32>
    %156 = vector.extract_strided_slice %154 {offsets = [0, 0], sizes = [8, 32], strides = [1, 1]} : vector<8x64xf32> to vector<8x32xf32>
    %157 = vector.extract_strided_slice %120 {offsets = [0, 64], sizes = [8, 32], strides = [1, 1]} : vector<8x96xf32> to vector<8x32xf32>
    %158 = arith.mulf %156, %157 : vector<8x32xf32>
    %159 = arith.addf %155, %158 : vector<8x32xf32>
    %160 = math.tanh %159 : vector<8x32xf32>
    %161 = vector.extract_strided_slice %154 {offsets = [0, 32], sizes = [8, 32], strides = [1, 1]} : vector<8x64xf32> to vector<8x32xf32>
    %cst_43 = arith.constant 1.000000e+00 : f32
    %162 = vector.broadcast %cst_43 : f32 to vector<8x32xf32>
    %163 = arith.subf %162, %161 : vector<8x32xf32>
    %164 = arith.mulf %163, %160 : vector<8x32xf32>
    %165 = vector.extract_strided_slice %154 {offsets = [0, 32], sizes = [8, 32], strides = [1, 1]} : vector<8x64xf32> to vector<8x32xf32>
    %166 = arith.mulf %165, %122 : vector<8x32xf32>
    %167 = arith.addf %164, %166 : vector<8x32xf32>
    %cst_44 = arith.constant dense<0.000000e+00> : vector<8x16xf32>
    %168 = tpu.matmul %167, %5, %cst_44 {dimension_numbers = #tpu.dot_dimension_numbers<[1], [0], [0], [1], [0, 0, 1, 1], [], []>} : vector<8x32xf32>, vector<32x16xf32>, vector<8x16xf32> -> vector<8x16xf32>
    %169 = vector.broadcast %12 : vector<1x16xf32> to vector<8x16xf32>
    %170 = arith.addf %168, %169 : vector<8x16xf32>
    %cst_45 = arith.constant 0.000000e+00 : f32
    %171 = vector.broadcast %cst_45 : f32 to vector<8x16xf32>
    %172 = arith.maximumf %170, %171 : vector<8x16xf32>
    %cst_46 = arith.constant dense<0xFF800000> : vector<8xf32>
    %173 = vector.multi_reduction <maximumf>, %172, %cst_46 [1] : vector<8x16xf32> to vector<8xf32>
    %174 = vector.shape_cast %173 : vector<8xf32> to vector<8x1xf32>
    %175 = vector.broadcast %174 : vector<8x1xf32> to vector<8x16xf32>
    %176 = arith.cmpf oeq, %172, %175 : vector<8x16xf32>
    %c16_i32_47 = arith.constant 16 : i32
    %177 = vector.broadcast %c16_i32_47 : i32 to vector<8x16xi32>
    %178 = arith.select %176, %42, %177 : vector<8x16xi1>, vector<8x16xi32>
    %cst_48 = arith.constant dense<2147483647> : vector<8xi32>
    %179 = vector.multi_reduction <minsi>, %178, %cst_48 [1] : vector<8x16xi32> to vector<8xi32>
    %180 = vector.shape_cast %179 : vector<8xi32> to vector<8x1xi32>
    %181 = vector.broadcast %180 : vector<8x1xi32> to vector<8x16xi32>
    %182 = arith.cmpi eq, %42, %181 : vector<8x16xi32>
    %183 = arith.extui %182 : vector<8x16xi1> to vector<8x16xi32>
    %184 = arith.sitofp %183 : vector<8x16xi32> to vector<8x16xf32>
    %cst_49 = arith.constant dense<0.000000e+00> : vector<8x96xf32>
    %185 = tpu.matmul %184, %38, %cst_49 {dimension_numbers = #tpu.dot_dimension_numbers<[1], [0], [0], [1], [0, 0, 1, 1], [], []>} : vector<8x16xf32>, vector<16x96xf32>, vector<8x96xf32> -> vector<8x96xf32>
    %186 = arith.addf %185, %37 : vector<8x96xf32>
    %187 = tpu.concatenate %143, %167 in 1 : vector<8x32xf32>, vector<8x32xf32> -> vector<8x64xf32>
    %cst_50 = arith.constant dense<0.000000e+00> : vector<8x192xf32>
    %188 = tpu.matmul %187, %3, %cst_50 {dimension_numbers = #tpu.dot_dimension_numbers<[1], [0], [0], [1], [0, 0, 1, 1], [], []>} : vector<8x64xf32>, vector<64x192xf32>, vector<8x192xf32> -> vector<8x192xf32>
    %189 = vector.broadcast %10 : vector<1x192xf32> to vector<8x192xf32>
    %190 = arith.addf %188, %189 : vector<8x192xf32>
    %191 = vector.extract_strided_slice %190 {offsets = [0, 0], sizes = [8, 96], strides = [1, 1]} : vector<8x192xf32> to vector<8x96xf32>
    %192 = vector.extract_strided_slice %190 {offsets = [0, 96], sizes = [8, 96], strides = [1, 1]} : vector<8x192xf32> to vector<8x96xf32>
    %193 = vector.extract_strided_slice %187 {offsets = [0, 0], sizes = [8, 32], strides = [1, 1]} : vector<8x64xf32> to vector<8x32xf32>
    %194 = vector.extract_strided_slice %187 {offsets = [0, 32], sizes = [8, 32], strides = [1, 1]} : vector<8x64xf32> to vector<8x32xf32>
    %195 = vector.extract_strided_slice %186 {offsets = [0, 0], sizes = [8, 64], strides = [1, 1]} : vector<8x96xf32> to vector<8x64xf32>
    %196 = vector.extract_strided_slice %191 {offsets = [0, 0], sizes = [8, 64], strides = [1, 1]} : vector<8x96xf32> to vector<8x64xf32>
    %197 = arith.addf %195, %196 : vector<8x64xf32>
    %198 = arith.negf %197 : vector<8x64xf32>
    %199 = math.exp %198 : vector<8x64xf32>
    %cst_51 = arith.constant 1.000000e+00 : f32
    %200 = vector.broadcast %cst_51 : f32 to vector<8x64xf32>
    %201 = arith.addf %200, %199 : vector<8x64xf32>
    %202 = arith.divf %200, %201 : vector<8x64xf32>
    %203 = vector.extract_strided_slice %186 {offsets = [0, 64], sizes = [8, 32], strides = [1, 1]} : vector<8x96xf32> to vector<8x32xf32>
    %204 = vector.extract_strided_slice %202 {offsets = [0, 0], sizes = [8, 32], strides = [1, 1]} : vector<8x64xf32> to vector<8x32xf32>
    %205 = vector.extract_strided_slice %191 {offsets = [0, 64], sizes = [8, 32], strides = [1, 1]} : vector<8x96xf32> to vector<8x32xf32>
    %206 = arith.mulf %204, %205 : vector<8x32xf32>
    %207 = arith.addf %203, %206 : vector<8x32xf32>
    %208 = math.tanh %207 : vector<8x32xf32>
    %209 = vector.extract_strided_slice %202 {offsets = [0, 32], sizes = [8, 32], strides = [1, 1]} : vector<8x64xf32> to vector<8x32xf32>
    %cst_52 = arith.constant 1.000000e+00 : f32
    %210 = vector.broadcast %cst_52 : f32 to vector<8x32xf32>
    %211 = arith.subf %210, %209 : vector<8x32xf32>
    %212 = arith.mulf %211, %208 : vector<8x32xf32>
    %213 = vector.extract_strided_slice %202 {offsets = [0, 32], sizes = [8, 32], strides = [1, 1]} : vector<8x64xf32> to vector<8x32xf32>
    %214 = arith.mulf %213, %193 : vector<8x32xf32>
    %215 = arith.addf %212, %214 : vector<8x32xf32>
    %cst_53 = arith.constant dense<0.000000e+00> : vector<8x96xf32>
    %216 = tpu.matmul %215, %4, %cst_53 {dimension_numbers = #tpu.dot_dimension_numbers<[1], [0], [0], [1], [0, 0, 1, 1], [], []>} : vector<8x32xf32>, vector<32x96xf32>, vector<8x96xf32> -> vector<8x96xf32>
    %217 = vector.broadcast %11 : vector<1x96xf32> to vector<8x96xf32>
    %218 = arith.addf %216, %217 : vector<8x96xf32>
    %219 = vector.extract_strided_slice %218 {offsets = [0, 0], sizes = [8, 64], strides = [1, 1]} : vector<8x96xf32> to vector<8x64xf32>
    %220 = vector.extract_strided_slice %192 {offsets = [0, 0], sizes = [8, 64], strides = [1, 1]} : vector<8x96xf32> to vector<8x64xf32>
    %221 = arith.addf %219, %220 : vector<8x64xf32>
    %222 = arith.negf %221 : vector<8x64xf32>
    %223 = math.exp %222 : vector<8x64xf32>
    %cst_54 = arith.constant 1.000000e+00 : f32
    %224 = vector.broadcast %cst_54 : f32 to vector<8x64xf32>
    %225 = arith.addf %224, %223 : vector<8x64xf32>
    %226 = arith.divf %224, %225 : vector<8x64xf32>
    %227 = vector.extract_strided_slice %218 {offsets = [0, 64], sizes = [8, 32], strides = [1, 1]} : vector<8x96xf32> to vector<8x32xf32>
    %228 = vector.extract_strided_slice %226 {offsets = [0, 0], sizes = [8, 32], strides = [1, 1]} : vector<8x64xf32> to vector<8x32xf32>
    %229 = vector.extract_strided_slice %192 {offsets = [0, 64], sizes = [8, 32], strides = [1, 1]} : vector<8x96xf32> to vector<8x32xf32>
    %230 = arith.mulf %228, %229 : vector<8x32xf32>
    %231 = arith.addf %227, %230 : vector<8x32xf32>
    %232 = math.tanh %231 : vector<8x32xf32>
    %233 = vector.extract_strided_slice %226 {offsets = [0, 32], sizes = [8, 32], strides = [1, 1]} : vector<8x64xf32> to vector<8x32xf32>
    %cst_55 = arith.constant 1.000000e+00 : f32
    %234 = vector.broadcast %cst_55 : f32 to vector<8x32xf32>
    %235 = arith.subf %234, %233 : vector<8x32xf32>
    %236 = arith.mulf %235, %232 : vector<8x32xf32>
    %237 = vector.extract_strided_slice %226 {offsets = [0, 32], sizes = [8, 32], strides = [1, 1]} : vector<8x64xf32> to vector<8x32xf32>
    %238 = arith.mulf %237, %194 : vector<8x32xf32>
    %239 = arith.addf %236, %238 : vector<8x32xf32>
    %cst_56 = arith.constant dense<0.000000e+00> : vector<8x16xf32>
    %240 = tpu.matmul %239, %5, %cst_56 {dimension_numbers = #tpu.dot_dimension_numbers<[1], [0], [0], [1], [0, 0, 1, 1], [], []>} : vector<8x32xf32>, vector<32x16xf32>, vector<8x16xf32> -> vector<8x16xf32>
    %241 = vector.broadcast %12 : vector<1x16xf32> to vector<8x16xf32>
    %242 = arith.addf %240, %241 : vector<8x16xf32>
    %cst_57 = arith.constant 0.000000e+00 : f32
    %243 = vector.broadcast %cst_57 : f32 to vector<8x16xf32>
    %244 = arith.maximumf %242, %243 : vector<8x16xf32>
    %cst_58 = arith.constant dense<0xFF800000> : vector<8xf32>
    %245 = vector.multi_reduction <maximumf>, %244, %cst_58 [1] : vector<8x16xf32> to vector<8xf32>
    %246 = vector.shape_cast %245 : vector<8xf32> to vector<8x1xf32>
    %247 = vector.broadcast %246 : vector<8x1xf32> to vector<8x16xf32>
    %248 = arith.cmpf oeq, %244, %247 : vector<8x16xf32>
    %c16_i32_59 = arith.constant 16 : i32
    %249 = vector.broadcast %c16_i32_59 : i32 to vector<8x16xi32>
    %250 = arith.select %248, %42, %249 : vector<8x16xi1>, vector<8x16xi32>
    %cst_60 = arith.constant dense<2147483647> : vector<8xi32>
    %251 = vector.multi_reduction <minsi>, %250, %cst_60 [1] : vector<8x16xi32> to vector<8xi32>
    %252 = vector.shape_cast %251 : vector<8xi32> to vector<8x1xi32>
    %253 = vector.broadcast %252 : vector<8x1xi32> to vector<8x16xi32>
    %254 = arith.cmpi eq, %42, %253 : vector<8x16xi32>
    %255 = arith.extui %254 : vector<8x16xi1> to vector<8x16xi32>
    %256 = arith.sitofp %255 : vector<8x16xi32> to vector<8x16xf32>
    %cst_61 = arith.constant dense<0.000000e+00> : vector<8x96xf32>
    %257 = tpu.matmul %256, %38, %cst_61 {dimension_numbers = #tpu.dot_dimension_numbers<[1], [0], [0], [1], [0, 0, 1, 1], [], []>} : vector<8x16xf32>, vector<16x96xf32>, vector<8x96xf32> -> vector<8x96xf32>
    %258 = arith.addf %257, %37 : vector<8x96xf32>
    %259 = tpu.concatenate %215, %239 in 1 : vector<8x32xf32>, vector<8x32xf32> -> vector<8x64xf32>
    %cst_62 = arith.constant dense<0.000000e+00> : vector<8x192xf32>
    %260 = tpu.matmul %259, %3, %cst_62 {dimension_numbers = #tpu.dot_dimension_numbers<[1], [0], [0], [1], [0, 0, 1, 1], [], []>} : vector<8x64xf32>, vector<64x192xf32>, vector<8x192xf32> -> vector<8x192xf32>
    %261 = vector.broadcast %10 : vector<1x192xf32> to vector<8x192xf32>
    %262 = arith.addf %260, %261 : vector<8x192xf32>
    %263 = vector.extract_strided_slice %262 {offsets = [0, 0], sizes = [8, 96], strides = [1, 1]} : vector<8x192xf32> to vector<8x96xf32>
    %264 = vector.extract_strided_slice %262 {offsets = [0, 96], sizes = [8, 96], strides = [1, 1]} : vector<8x192xf32> to vector<8x96xf32>
    %265 = vector.extract_strided_slice %259 {offsets = [0, 0], sizes = [8, 32], strides = [1, 1]} : vector<8x64xf32> to vector<8x32xf32>
    %266 = vector.extract_strided_slice %259 {offsets = [0, 32], sizes = [8, 32], strides = [1, 1]} : vector<8x64xf32> to vector<8x32xf32>
    %267 = vector.extract_strided_slice %258 {offsets = [0, 0], sizes = [8, 64], strides = [1, 1]} : vector<8x96xf32> to vector<8x64xf32>
    %268 = vector.extract_strided_slice %263 {offsets = [0, 0], sizes = [8, 64], strides = [1, 1]} : vector<8x96xf32> to vector<8x64xf32>
    %269 = arith.addf %267, %268 : vector<8x64xf32>
    %270 = arith.negf %269 : vector<8x64xf32>
    %271 = math.exp %270 : vector<8x64xf32>
    %cst_63 = arith.constant 1.000000e+00 : f32
    %272 = vector.broadcast %cst_63 : f32 to vector<8x64xf32>
    %273 = arith.addf %272, %271 : vector<8x64xf32>
    %274 = arith.divf %272, %273 : vector<8x64xf32>
    %275 = vector.extract_strided_slice %258 {offsets = [0, 64], sizes = [8, 32], strides = [1, 1]} : vector<8x96xf32> to vector<8x32xf32>
    %276 = vector.extract_strided_slice %274 {offsets = [0, 0], sizes = [8, 32], strides = [1, 1]} : vector<8x64xf32> to vector<8x32xf32>
    %277 = vector.extract_strided_slice %263 {offsets = [0, 64], sizes = [8, 32], strides = [1, 1]} : vector<8x96xf32> to vector<8x32xf32>
    %278 = arith.mulf %276, %277 : vector<8x32xf32>
    %279 = arith.addf %275, %278 : vector<8x32xf32>
    %280 = math.tanh %279 : vector<8x32xf32>
    %281 = vector.extract_strided_slice %274 {offsets = [0, 32], sizes = [8, 32], strides = [1, 1]} : vector<8x64xf32> to vector<8x32xf32>
    %cst_64 = arith.constant 1.000000e+00 : f32
    %282 = vector.broadcast %cst_64 : f32 to vector<8x32xf32>
    %283 = arith.subf %282, %281 : vector<8x32xf32>
    %284 = arith.mulf %283, %280 : vector<8x32xf32>
    %285 = vector.extract_strided_slice %274 {offsets = [0, 32], sizes = [8, 32], strides = [1, 1]} : vector<8x64xf32> to vector<8x32xf32>
    %286 = arith.mulf %285, %265 : vector<8x32xf32>
    %287 = arith.addf %284, %286 : vector<8x32xf32>
    %cst_65 = arith.constant dense<0.000000e+00> : vector<8x96xf32>
    %288 = tpu.matmul %287, %4, %cst_65 {dimension_numbers = #tpu.dot_dimension_numbers<[1], [0], [0], [1], [0, 0, 1, 1], [], []>} : vector<8x32xf32>, vector<32x96xf32>, vector<8x96xf32> -> vector<8x96xf32>
    %289 = vector.broadcast %11 : vector<1x96xf32> to vector<8x96xf32>
    %290 = arith.addf %288, %289 : vector<8x96xf32>
    %291 = vector.extract_strided_slice %290 {offsets = [0, 0], sizes = [8, 64], strides = [1, 1]} : vector<8x96xf32> to vector<8x64xf32>
    %292 = vector.extract_strided_slice %264 {offsets = [0, 0], sizes = [8, 64], strides = [1, 1]} : vector<8x96xf32> to vector<8x64xf32>
    %293 = arith.addf %291, %292 : vector<8x64xf32>
    %294 = arith.negf %293 : vector<8x64xf32>
    %295 = math.exp %294 : vector<8x64xf32>
    %cst_66 = arith.constant 1.000000e+00 : f32
    %296 = vector.broadcast %cst_66 : f32 to vector<8x64xf32>
    %297 = arith.addf %296, %295 : vector<8x64xf32>
    %298 = arith.divf %296, %297 : vector<8x64xf32>
    %299 = vector.extract_strided_slice %290 {offsets = [0, 64], sizes = [8, 32], strides = [1, 1]} : vector<8x96xf32> to vector<8x32xf32>
    %300 = vector.extract_strided_slice %298 {offsets = [0, 0], sizes = [8, 32], strides = [1, 1]} : vector<8x64xf32> to vector<8x32xf32>
    %301 = vector.extract_strided_slice %264 {offsets = [0, 64], sizes = [8, 32], strides = [1, 1]} : vector<8x96xf32> to vector<8x32xf32>
    %302 = arith.mulf %300, %301 : vector<8x32xf32>
    %303 = arith.addf %299, %302 : vector<8x32xf32>
    %304 = math.tanh %303 : vector<8x32xf32>
    %305 = vector.extract_strided_slice %298 {offsets = [0, 32], sizes = [8, 32], strides = [1, 1]} : vector<8x64xf32> to vector<8x32xf32>
    %cst_67 = arith.constant 1.000000e+00 : f32
    %306 = vector.broadcast %cst_67 : f32 to vector<8x32xf32>
    %307 = arith.subf %306, %305 : vector<8x32xf32>
    %308 = arith.mulf %307, %304 : vector<8x32xf32>
    %309 = vector.extract_strided_slice %298 {offsets = [0, 32], sizes = [8, 32], strides = [1, 1]} : vector<8x64xf32> to vector<8x32xf32>
    %310 = arith.mulf %309, %266 : vector<8x32xf32>
    %311 = arith.addf %308, %310 : vector<8x32xf32>
    %cst_68 = arith.constant dense<0.000000e+00> : vector<8x16xf32>
    %312 = tpu.matmul %311, %5, %cst_68 {dimension_numbers = #tpu.dot_dimension_numbers<[1], [0], [0], [1], [0, 0, 1, 1], [], []>} : vector<8x32xf32>, vector<32x16xf32>, vector<8x16xf32> -> vector<8x16xf32>
    %313 = vector.broadcast %12 : vector<1x16xf32> to vector<8x16xf32>
    %314 = arith.addf %312, %313 : vector<8x16xf32>
    %cst_69 = arith.constant 0.000000e+00 : f32
    %315 = vector.broadcast %cst_69 : f32 to vector<8x16xf32>
    %316 = arith.maximumf %314, %315 : vector<8x16xf32>
    %cst_70 = arith.constant dense<0xFF800000> : vector<8xf32>
    %317 = vector.multi_reduction <maximumf>, %316, %cst_70 [1] : vector<8x16xf32> to vector<8xf32>
    %318 = vector.shape_cast %317 : vector<8xf32> to vector<8x1xf32>
    %319 = vector.broadcast %318 : vector<8x1xf32> to vector<8x16xf32>
    %320 = arith.cmpf oeq, %316, %319 : vector<8x16xf32>
    %c16_i32_71 = arith.constant 16 : i32
    %321 = vector.broadcast %c16_i32_71 : i32 to vector<8x16xi32>
    %322 = arith.select %320, %42, %321 : vector<8x16xi1>, vector<8x16xi32>
    %cst_72 = arith.constant dense<2147483647> : vector<8xi32>
    %323 = vector.multi_reduction <minsi>, %322, %cst_72 [1] : vector<8x16xi32> to vector<8xi32>
    %324 = vector.shape_cast %323 : vector<8xi32> to vector<8x1xi32>
    %325 = vector.broadcast %324 : vector<8x1xi32> to vector<8x16xi32>
    %326 = arith.cmpi eq, %42, %325 : vector<8x16xi32>
    %327 = arith.extui %326 : vector<8x16xi1> to vector<8x16xi32>
    %328 = arith.sitofp %327 : vector<8x16xi32> to vector<8x16xf32>
    %cst_73 = arith.constant dense<0.000000e+00> : vector<8x96xf32>
    %329 = tpu.matmul %328, %38, %cst_73 {dimension_numbers = #tpu.dot_dimension_numbers<[1], [0], [0], [1], [0, 0, 1, 1], [], []>} : vector<8x16xf32>, vector<16x96xf32>, vector<8x96xf32> -> vector<8x96xf32>
    %330 = arith.addf %329, %37 : vector<8x96xf32>
    %331 = tpu.concatenate %287, %311 in 1 : vector<8x32xf32>, vector<8x32xf32> -> vector<8x64xf32>
    %cst_74 = arith.constant dense<0.000000e+00> : vector<8x192xf32>
    %332 = tpu.matmul %331, %3, %cst_74 {dimension_numbers = #tpu.dot_dimension_numbers<[1], [0], [0], [1], [0, 0, 1, 1], [], []>} : vector<8x64xf32>, vector<64x192xf32>, vector<8x192xf32> -> vector<8x192xf32>
    %333 = vector.broadcast %10 : vector<1x192xf32> to vector<8x192xf32>
    %334 = arith.addf %332, %333 : vector<8x192xf32>
    %335 = vector.extract_strided_slice %334 {offsets = [0, 0], sizes = [8, 96], strides = [1, 1]} : vector<8x192xf32> to vector<8x96xf32>
    %336 = vector.extract_strided_slice %334 {offsets = [0, 96], sizes = [8, 96], strides = [1, 1]} : vector<8x192xf32> to vector<8x96xf32>
    %337 = vector.extract_strided_slice %331 {offsets = [0, 0], sizes = [8, 32], strides = [1, 1]} : vector<8x64xf32> to vector<8x32xf32>
    %338 = vector.extract_strided_slice %331 {offsets = [0, 32], sizes = [8, 32], strides = [1, 1]} : vector<8x64xf32> to vector<8x32xf32>
    %339 = vector.extract_strided_slice %330 {offsets = [0, 0], sizes = [8, 64], strides = [1, 1]} : vector<8x96xf32> to vector<8x64xf32>
    %340 = vector.extract_strided_slice %335 {offsets = [0, 0], sizes = [8, 64], strides = [1, 1]} : vector<8x96xf32> to vector<8x64xf32>
    %341 = arith.addf %339, %340 : vector<8x64xf32>
    %342 = arith.negf %341 : vector<8x64xf32>
    %343 = math.exp %342 : vector<8x64xf32>
    %cst_75 = arith.constant 1.000000e+00 : f32
    %344 = vector.broadcast %cst_75 : f32 to vector<8x64xf32>
    %345 = arith.addf %344, %343 : vector<8x64xf32>
    %346 = arith.divf %344, %345 : vector<8x64xf32>
    %347 = vector.extract_strided_slice %330 {offsets = [0, 64], sizes = [8, 32], strides = [1, 1]} : vector<8x96xf32> to vector<8x32xf32>
    %348 = vector.extract_strided_slice %346 {offsets = [0, 0], sizes = [8, 32], strides = [1, 1]} : vector<8x64xf32> to vector<8x32xf32>
    %349 = vector.extract_strided_slice %335 {offsets = [0, 64], sizes = [8, 32], strides = [1, 1]} : vector<8x96xf32> to vector<8x32xf32>
    %350 = arith.mulf %348, %349 : vector<8x32xf32>
    %351 = arith.addf %347, %350 : vector<8x32xf32>
    %352 = math.tanh %351 : vector<8x32xf32>
    %353 = vector.extract_strided_slice %346 {offsets = [0, 32], sizes = [8, 32], strides = [1, 1]} : vector<8x64xf32> to vector<8x32xf32>
    %cst_76 = arith.constant 1.000000e+00 : f32
    %354 = vector.broadcast %cst_76 : f32 to vector<8x32xf32>
    %355 = arith.subf %354, %353 : vector<8x32xf32>
    %356 = arith.mulf %355, %352 : vector<8x32xf32>
    %357 = vector.extract_strided_slice %346 {offsets = [0, 32], sizes = [8, 32], strides = [1, 1]} : vector<8x64xf32> to vector<8x32xf32>
    %358 = arith.mulf %357, %337 : vector<8x32xf32>
    %359 = arith.addf %356, %358 : vector<8x32xf32>
    %cst_77 = arith.constant dense<0.000000e+00> : vector<8x96xf32>
    %360 = tpu.matmul %359, %4, %cst_77 {dimension_numbers = #tpu.dot_dimension_numbers<[1], [0], [0], [1], [0, 0, 1, 1], [], []>} : vector<8x32xf32>, vector<32x96xf32>, vector<8x96xf32> -> vector<8x96xf32>
    %361 = vector.broadcast %11 : vector<1x96xf32> to vector<8x96xf32>
    %362 = arith.addf %360, %361 : vector<8x96xf32>
    %363 = vector.extract_strided_slice %362 {offsets = [0, 0], sizes = [8, 64], strides = [1, 1]} : vector<8x96xf32> to vector<8x64xf32>
    %364 = vector.extract_strided_slice %336 {offsets = [0, 0], sizes = [8, 64], strides = [1, 1]} : vector<8x96xf32> to vector<8x64xf32>
    %365 = arith.addf %363, %364 : vector<8x64xf32>
    %366 = arith.negf %365 : vector<8x64xf32>
    %367 = math.exp %366 : vector<8x64xf32>
    %cst_78 = arith.constant 1.000000e+00 : f32
    %368 = vector.broadcast %cst_78 : f32 to vector<8x64xf32>
    %369 = arith.addf %368, %367 : vector<8x64xf32>
    %370 = arith.divf %368, %369 : vector<8x64xf32>
    %371 = vector.extract_strided_slice %362 {offsets = [0, 64], sizes = [8, 32], strides = [1, 1]} : vector<8x96xf32> to vector<8x32xf32>
    %372 = vector.extract_strided_slice %370 {offsets = [0, 0], sizes = [8, 32], strides = [1, 1]} : vector<8x64xf32> to vector<8x32xf32>
    %373 = vector.extract_strided_slice %336 {offsets = [0, 64], sizes = [8, 32], strides = [1, 1]} : vector<8x96xf32> to vector<8x32xf32>
    %374 = arith.mulf %372, %373 : vector<8x32xf32>
    %375 = arith.addf %371, %374 : vector<8x32xf32>
    %376 = math.tanh %375 : vector<8x32xf32>
    %377 = vector.extract_strided_slice %370 {offsets = [0, 32], sizes = [8, 32], strides = [1, 1]} : vector<8x64xf32> to vector<8x32xf32>
    %cst_79 = arith.constant 1.000000e+00 : f32
    %378 = vector.broadcast %cst_79 : f32 to vector<8x32xf32>
    %379 = arith.subf %378, %377 : vector<8x32xf32>
    %380 = arith.mulf %379, %376 : vector<8x32xf32>
    %381 = vector.extract_strided_slice %370 {offsets = [0, 32], sizes = [8, 32], strides = [1, 1]} : vector<8x64xf32> to vector<8x32xf32>
    %382 = arith.mulf %381, %338 : vector<8x32xf32>
    %383 = arith.addf %380, %382 : vector<8x32xf32>
    %cst_80 = arith.constant dense<0.000000e+00> : vector<8x16xf32>
    %384 = tpu.matmul %383, %5, %cst_80 {dimension_numbers = #tpu.dot_dimension_numbers<[1], [0], [0], [1], [0, 0, 1, 1], [], []>} : vector<8x32xf32>, vector<32x16xf32>, vector<8x16xf32> -> vector<8x16xf32>
    %385 = vector.broadcast %12 : vector<1x16xf32> to vector<8x16xf32>
    %386 = arith.addf %384, %385 : vector<8x16xf32>
    %cst_81 = arith.constant 0.000000e+00 : f32
    %387 = vector.broadcast %cst_81 : f32 to vector<8x16xf32>
    %388 = arith.maximumf %386, %387 : vector<8x16xf32>
    %cst_82 = arith.constant dense<0xFF800000> : vector<8xf32>
    %389 = vector.multi_reduction <maximumf>, %388, %cst_82 [1] : vector<8x16xf32> to vector<8xf32>
    %390 = vector.shape_cast %389 : vector<8xf32> to vector<8x1xf32>
    %391 = vector.broadcast %390 : vector<8x1xf32> to vector<8x16xf32>
    %392 = arith.cmpf oeq, %388, %391 : vector<8x16xf32>
    %c16_i32_83 = arith.constant 16 : i32
    %393 = vector.broadcast %c16_i32_83 : i32 to vector<8x16xi32>
    %394 = arith.select %392, %42, %393 : vector<8x16xi1>, vector<8x16xi32>
    %cst_84 = arith.constant dense<2147483647> : vector<8xi32>
    %395 = vector.multi_reduction <minsi>, %394, %cst_84 [1] : vector<8x16xi32> to vector<8xi32>
    %396 = vector.shape_cast %395 : vector<8xi32> to vector<8x1xi32>
    %397 = vector.broadcast %396 : vector<8x1xi32> to vector<8x16xi32>
    %398 = arith.cmpi eq, %42, %397 : vector<8x16xi32>
    %399 = arith.extui %398 : vector<8x16xi1> to vector<8x16xi32>
    %400 = arith.sitofp %399 : vector<8x16xi32> to vector<8x16xf32>
    %cst_85 = arith.constant dense<0.000000e+00> : vector<8x96xf32>
    %401 = tpu.matmul %400, %38, %cst_85 {dimension_numbers = #tpu.dot_dimension_numbers<[1], [0], [0], [1], [0, 0, 1, 1], [], []>} : vector<8x16xf32>, vector<16x96xf32>, vector<8x96xf32> -> vector<8x96xf32>
    %402 = arith.addf %401, %37 : vector<8x96xf32>
    %403 = tpu.concatenate %359, %383 in 1 : vector<8x32xf32>, vector<8x32xf32> -> vector<8x64xf32>
    %cst_86 = arith.constant dense<0.000000e+00> : vector<8x192xf32>
    %404 = tpu.matmul %403, %3, %cst_86 {dimension_numbers = #tpu.dot_dimension_numbers<[1], [0], [0], [1], [0, 0, 1, 1], [], []>} : vector<8x64xf32>, vector<64x192xf32>, vector<8x192xf32> -> vector<8x192xf32>
    %405 = vector.broadcast %10 : vector<1x192xf32> to vector<8x192xf32>
    %406 = arith.addf %404, %405 : vector<8x192xf32>
    %407 = vector.extract_strided_slice %406 {offsets = [0, 0], sizes = [8, 96], strides = [1, 1]} : vector<8x192xf32> to vector<8x96xf32>
    %408 = vector.extract_strided_slice %406 {offsets = [0, 96], sizes = [8, 96], strides = [1, 1]} : vector<8x192xf32> to vector<8x96xf32>
    %409 = vector.extract_strided_slice %403 {offsets = [0, 0], sizes = [8, 32], strides = [1, 1]} : vector<8x64xf32> to vector<8x32xf32>
    %410 = vector.extract_strided_slice %403 {offsets = [0, 32], sizes = [8, 32], strides = [1, 1]} : vector<8x64xf32> to vector<8x32xf32>
    %411 = vector.extract_strided_slice %402 {offsets = [0, 0], sizes = [8, 64], strides = [1, 1]} : vector<8x96xf32> to vector<8x64xf32>
    %412 = vector.extract_strided_slice %407 {offsets = [0, 0], sizes = [8, 64], strides = [1, 1]} : vector<8x96xf32> to vector<8x64xf32>
    %413 = arith.addf %411, %412 : vector<8x64xf32>
    %414 = arith.negf %413 : vector<8x64xf32>
    %415 = math.exp %414 : vector<8x64xf32>
    %cst_87 = arith.constant 1.000000e+00 : f32
    %416 = vector.broadcast %cst_87 : f32 to vector<8x64xf32>
    %417 = arith.addf %416, %415 : vector<8x64xf32>
    %418 = arith.divf %416, %417 : vector<8x64xf32>
    %419 = vector.extract_strided_slice %402 {offsets = [0, 64], sizes = [8, 32], strides = [1, 1]} : vector<8x96xf32> to vector<8x32xf32>
    %420 = vector.extract_strided_slice %418 {offsets = [0, 0], sizes = [8, 32], strides = [1, 1]} : vector<8x64xf32> to vector<8x32xf32>
    %421 = vector.extract_strided_slice %407 {offsets = [0, 64], sizes = [8, 32], strides = [1, 1]} : vector<8x96xf32> to vector<8x32xf32>
    %422 = arith.mulf %420, %421 : vector<8x32xf32>
    %423 = arith.addf %419, %422 : vector<8x32xf32>
    %424 = math.tanh %423 : vector<8x32xf32>
    %425 = vector.extract_strided_slice %418 {offsets = [0, 32], sizes = [8, 32], strides = [1, 1]} : vector<8x64xf32> to vector<8x32xf32>
    %cst_88 = arith.constant 1.000000e+00 : f32
    %426 = vector.broadcast %cst_88 : f32 to vector<8x32xf32>
    %427 = arith.subf %426, %425 : vector<8x32xf32>
    %428 = arith.mulf %427, %424 : vector<8x32xf32>
    %429 = vector.extract_strided_slice %418 {offsets = [0, 32], sizes = [8, 32], strides = [1, 1]} : vector<8x64xf32> to vector<8x32xf32>
    %430 = arith.mulf %429, %409 : vector<8x32xf32>
    %431 = arith.addf %428, %430 : vector<8x32xf32>
    %cst_89 = arith.constant dense<0.000000e+00> : vector<8x96xf32>
    %432 = tpu.matmul %431, %4, %cst_89 {dimension_numbers = #tpu.dot_dimension_numbers<[1], [0], [0], [1], [0, 0, 1, 1], [], []>} : vector<8x32xf32>, vector<32x96xf32>, vector<8x96xf32> -> vector<8x96xf32>
    %433 = vector.broadcast %11 : vector<1x96xf32> to vector<8x96xf32>
    %434 = arith.addf %432, %433 : vector<8x96xf32>
    %435 = vector.extract_strided_slice %434 {offsets = [0, 0], sizes = [8, 64], strides = [1, 1]} : vector<8x96xf32> to vector<8x64xf32>
    %436 = vector.extract_strided_slice %408 {offsets = [0, 0], sizes = [8, 64], strides = [1, 1]} : vector<8x96xf32> to vector<8x64xf32>
    %437 = arith.addf %435, %436 : vector<8x64xf32>
    %438 = arith.negf %437 : vector<8x64xf32>
    %439 = math.exp %438 : vector<8x64xf32>
    %cst_90 = arith.constant 1.000000e+00 : f32
    %440 = vector.broadcast %cst_90 : f32 to vector<8x64xf32>
    %441 = arith.addf %440, %439 : vector<8x64xf32>
    %442 = arith.divf %440, %441 : vector<8x64xf32>
    %443 = vector.extract_strided_slice %434 {offsets = [0, 64], sizes = [8, 32], strides = [1, 1]} : vector<8x96xf32> to vector<8x32xf32>
    %444 = vector.extract_strided_slice %442 {offsets = [0, 0], sizes = [8, 32], strides = [1, 1]} : vector<8x64xf32> to vector<8x32xf32>
    %445 = vector.extract_strided_slice %408 {offsets = [0, 64], sizes = [8, 32], strides = [1, 1]} : vector<8x96xf32> to vector<8x32xf32>
    %446 = arith.mulf %444, %445 : vector<8x32xf32>
    %447 = arith.addf %443, %446 : vector<8x32xf32>
    %448 = math.tanh %447 : vector<8x32xf32>
    %449 = vector.extract_strided_slice %442 {offsets = [0, 32], sizes = [8, 32], strides = [1, 1]} : vector<8x64xf32> to vector<8x32xf32>
    %cst_91 = arith.constant 1.000000e+00 : f32
    %450 = vector.broadcast %cst_91 : f32 to vector<8x32xf32>
    %451 = arith.subf %450, %449 : vector<8x32xf32>
    %452 = arith.mulf %451, %448 : vector<8x32xf32>
    %453 = vector.extract_strided_slice %442 {offsets = [0, 32], sizes = [8, 32], strides = [1, 1]} : vector<8x64xf32> to vector<8x32xf32>
    %454 = arith.mulf %453, %410 : vector<8x32xf32>
    %455 = arith.addf %452, %454 : vector<8x32xf32>
    %cst_92 = arith.constant dense<0.000000e+00> : vector<8x16xf32>
    %456 = tpu.matmul %455, %5, %cst_92 {dimension_numbers = #tpu.dot_dimension_numbers<[1], [0], [0], [1], [0, 0, 1, 1], [], []>} : vector<8x32xf32>, vector<32x16xf32>, vector<8x16xf32> -> vector<8x16xf32>
    %457 = vector.broadcast %12 : vector<1x16xf32> to vector<8x16xf32>
    %458 = arith.addf %456, %457 : vector<8x16xf32>
    %cst_93 = arith.constant 0.000000e+00 : f32
    %459 = vector.broadcast %cst_93 : f32 to vector<8x16xf32>
    %460 = arith.maximumf %458, %459 : vector<8x16xf32>
    %cst_94 = arith.constant dense<0xFF800000> : vector<8xf32>
    %461 = vector.multi_reduction <maximumf>, %460, %cst_94 [1] : vector<8x16xf32> to vector<8xf32>
    %462 = vector.shape_cast %461 : vector<8xf32> to vector<8x1xf32>
    %463 = vector.broadcast %462 : vector<8x1xf32> to vector<8x16xf32>
    %464 = arith.cmpf oeq, %460, %463 : vector<8x16xf32>
    %c16_i32_95 = arith.constant 16 : i32
    %465 = vector.broadcast %c16_i32_95 : i32 to vector<8x16xi32>
    %466 = arith.select %464, %42, %465 : vector<8x16xi1>, vector<8x16xi32>
    %cst_96 = arith.constant dense<2147483647> : vector<8xi32>
    %467 = vector.multi_reduction <minsi>, %466, %cst_96 [1] : vector<8x16xi32> to vector<8xi32>
    %468 = vector.shape_cast %467 : vector<8xi32> to vector<8x1xi32>
    %469 = vector.broadcast %468 : vector<8x1xi32> to vector<8x16xi32>
    %470 = arith.cmpi eq, %42, %469 : vector<8x16xi32>
    %471 = arith.extui %470 : vector<8x16xi1> to vector<8x16xi32>
    %472 = arith.sitofp %471 : vector<8x16xi32> to vector<8x16xf32>
    %cst_97 = arith.constant dense<0.000000e+00> : vector<8x96xf32>
    %473 = tpu.matmul %472, %38, %cst_97 {dimension_numbers = #tpu.dot_dimension_numbers<[1], [0], [0], [1], [0, 0, 1, 1], [], []>} : vector<8x16xf32>, vector<16x96xf32>, vector<8x96xf32> -> vector<8x96xf32>
    %474 = arith.addf %473, %37 : vector<8x96xf32>
    %475 = tpu.concatenate %431, %455 in 1 : vector<8x32xf32>, vector<8x32xf32> -> vector<8x64xf32>
    %cst_98 = arith.constant dense<0.000000e+00> : vector<8x192xf32>
    %476 = tpu.matmul %475, %3, %cst_98 {dimension_numbers = #tpu.dot_dimension_numbers<[1], [0], [0], [1], [0, 0, 1, 1], [], []>} : vector<8x64xf32>, vector<64x192xf32>, vector<8x192xf32> -> vector<8x192xf32>
    %477 = vector.broadcast %10 : vector<1x192xf32> to vector<8x192xf32>
    %478 = arith.addf %476, %477 : vector<8x192xf32>
    %479 = vector.extract_strided_slice %478 {offsets = [0, 0], sizes = [8, 96], strides = [1, 1]} : vector<8x192xf32> to vector<8x96xf32>
    %480 = vector.extract_strided_slice %478 {offsets = [0, 96], sizes = [8, 96], strides = [1, 1]} : vector<8x192xf32> to vector<8x96xf32>
    %481 = vector.extract_strided_slice %475 {offsets = [0, 0], sizes = [8, 32], strides = [1, 1]} : vector<8x64xf32> to vector<8x32xf32>
    %482 = vector.extract_strided_slice %475 {offsets = [0, 32], sizes = [8, 32], strides = [1, 1]} : vector<8x64xf32> to vector<8x32xf32>
    %483 = vector.extract_strided_slice %474 {offsets = [0, 0], sizes = [8, 64], strides = [1, 1]} : vector<8x96xf32> to vector<8x64xf32>
    %484 = vector.extract_strided_slice %479 {offsets = [0, 0], sizes = [8, 64], strides = [1, 1]} : vector<8x96xf32> to vector<8x64xf32>
    %485 = arith.addf %483, %484 : vector<8x64xf32>
    %486 = arith.negf %485 : vector<8x64xf32>
    %487 = math.exp %486 : vector<8x64xf32>
    %cst_99 = arith.constant 1.000000e+00 : f32
    %488 = vector.broadcast %cst_99 : f32 to vector<8x64xf32>
    %489 = arith.addf %488, %487 : vector<8x64xf32>
    %490 = arith.divf %488, %489 : vector<8x64xf32>
    %491 = vector.extract_strided_slice %474 {offsets = [0, 64], sizes = [8, 32], strides = [1, 1]} : vector<8x96xf32> to vector<8x32xf32>
    %492 = vector.extract_strided_slice %490 {offsets = [0, 0], sizes = [8, 32], strides = [1, 1]} : vector<8x64xf32> to vector<8x32xf32>
    %493 = vector.extract_strided_slice %479 {offsets = [0, 64], sizes = [8, 32], strides = [1, 1]} : vector<8x96xf32> to vector<8x32xf32>
    %494 = arith.mulf %492, %493 : vector<8x32xf32>
    %495 = arith.addf %491, %494 : vector<8x32xf32>
    %496 = math.tanh %495 : vector<8x32xf32>
    %497 = vector.extract_strided_slice %490 {offsets = [0, 32], sizes = [8, 32], strides = [1, 1]} : vector<8x64xf32> to vector<8x32xf32>
    %cst_100 = arith.constant 1.000000e+00 : f32
    %498 = vector.broadcast %cst_100 : f32 to vector<8x32xf32>
    %499 = arith.subf %498, %497 : vector<8x32xf32>
    %500 = arith.mulf %499, %496 : vector<8x32xf32>
    %501 = vector.extract_strided_slice %490 {offsets = [0, 32], sizes = [8, 32], strides = [1, 1]} : vector<8x64xf32> to vector<8x32xf32>
    %502 = arith.mulf %501, %481 : vector<8x32xf32>
    %503 = arith.addf %500, %502 : vector<8x32xf32>
    %cst_101 = arith.constant dense<0.000000e+00> : vector<8x96xf32>
    %504 = tpu.matmul %503, %4, %cst_101 {dimension_numbers = #tpu.dot_dimension_numbers<[1], [0], [0], [1], [0, 0, 1, 1], [], []>} : vector<8x32xf32>, vector<32x96xf32>, vector<8x96xf32> -> vector<8x96xf32>
    %505 = vector.broadcast %11 : vector<1x96xf32> to vector<8x96xf32>
    %506 = arith.addf %504, %505 : vector<8x96xf32>
    %507 = vector.extract_strided_slice %506 {offsets = [0, 0], sizes = [8, 64], strides = [1, 1]} : vector<8x96xf32> to vector<8x64xf32>
    %508 = vector.extract_strided_slice %480 {offsets = [0, 0], sizes = [8, 64], strides = [1, 1]} : vector<8x96xf32> to vector<8x64xf32>
    %509 = arith.addf %507, %508 : vector<8x64xf32>
    %510 = arith.negf %509 : vector<8x64xf32>
    %511 = math.exp %510 : vector<8x64xf32>
    %cst_102 = arith.constant 1.000000e+00 : f32
    %512 = vector.broadcast %cst_102 : f32 to vector<8x64xf32>
    %513 = arith.addf %512, %511 : vector<8x64xf32>
    %514 = arith.divf %512, %513 : vector<8x64xf32>
    %515 = vector.extract_strided_slice %506 {offsets = [0, 64], sizes = [8, 32], strides = [1, 1]} : vector<8x96xf32> to vector<8x32xf32>
    %516 = vector.extract_strided_slice %514 {offsets = [0, 0], sizes = [8, 32], strides = [1, 1]} : vector<8x64xf32> to vector<8x32xf32>
    %517 = vector.extract_strided_slice %480 {offsets = [0, 64], sizes = [8, 32], strides = [1, 1]} : vector<8x96xf32> to vector<8x32xf32>
    %518 = arith.mulf %516, %517 : vector<8x32xf32>
    %519 = arith.addf %515, %518 : vector<8x32xf32>
    %520 = math.tanh %519 : vector<8x32xf32>
    %521 = vector.extract_strided_slice %514 {offsets = [0, 32], sizes = [8, 32], strides = [1, 1]} : vector<8x64xf32> to vector<8x32xf32>
    %cst_103 = arith.constant 1.000000e+00 : f32
    %522 = vector.broadcast %cst_103 : f32 to vector<8x32xf32>
    %523 = arith.subf %522, %521 : vector<8x32xf32>
    %524 = arith.mulf %523, %520 : vector<8x32xf32>
    %525 = vector.extract_strided_slice %514 {offsets = [0, 32], sizes = [8, 32], strides = [1, 1]} : vector<8x64xf32> to vector<8x32xf32>
    %526 = arith.mulf %525, %482 : vector<8x32xf32>
    %527 = arith.addf %524, %526 : vector<8x32xf32>
    %cst_104 = arith.constant dense<0.000000e+00> : vector<8x16xf32>
    %528 = tpu.matmul %527, %5, %cst_104 {dimension_numbers = #tpu.dot_dimension_numbers<[1], [0], [0], [1], [0, 0, 1, 1], [], []>} : vector<8x32xf32>, vector<32x16xf32>, vector<8x16xf32> -> vector<8x16xf32>
    %529 = vector.broadcast %12 : vector<1x16xf32> to vector<8x16xf32>
    %530 = arith.addf %528, %529 : vector<8x16xf32>
    %cst_105 = arith.constant 0.000000e+00 : f32
    %531 = vector.broadcast %cst_105 : f32 to vector<8x16xf32>
    %532 = arith.maximumf %530, %531 : vector<8x16xf32>
    %cst_106 = arith.constant dense<0xFF800000> : vector<8xf32>
    %533 = vector.multi_reduction <maximumf>, %532, %cst_106 [1] : vector<8x16xf32> to vector<8xf32>
    %534 = vector.shape_cast %533 : vector<8xf32> to vector<8x1xf32>
    %535 = vector.broadcast %534 : vector<8x1xf32> to vector<8x16xf32>
    %536 = arith.cmpf oeq, %532, %535 : vector<8x16xf32>
    %c16_i32_107 = arith.constant 16 : i32
    %537 = vector.broadcast %c16_i32_107 : i32 to vector<8x16xi32>
    %538 = arith.select %536, %42, %537 : vector<8x16xi1>, vector<8x16xi32>
    %cst_108 = arith.constant dense<2147483647> : vector<8xi32>
    %539 = vector.multi_reduction <minsi>, %538, %cst_108 [1] : vector<8x16xi32> to vector<8xi32>
    %540 = vector.shape_cast %539 : vector<8xi32> to vector<8x1xi32>
    %541 = vector.broadcast %540 : vector<8x1xi32> to vector<8x16xi32>
    %542 = arith.cmpi eq, %42, %541 : vector<8x16xi32>
    %543 = arith.extui %542 : vector<8x16xi1> to vector<8x16xi32>
    %544 = arith.sitofp %543 : vector<8x16xi32> to vector<8x16xf32>
    %cst_109 = arith.constant dense<0.000000e+00> : vector<8x96xf32>
    %545 = tpu.matmul %544, %38, %cst_109 {dimension_numbers = #tpu.dot_dimension_numbers<[1], [0], [0], [1], [0, 0, 1, 1], [], []>} : vector<8x16xf32>, vector<16x96xf32>, vector<8x96xf32> -> vector<8x96xf32>
    %546 = arith.addf %545, %37 : vector<8x96xf32>
    %547 = tpu.concatenate %503, %527 in 1 : vector<8x32xf32>, vector<8x32xf32> -> vector<8x64xf32>
    %cst_110 = arith.constant dense<0.000000e+00> : vector<8x192xf32>
    %548 = tpu.matmul %547, %3, %cst_110 {dimension_numbers = #tpu.dot_dimension_numbers<[1], [0], [0], [1], [0, 0, 1, 1], [], []>} : vector<8x64xf32>, vector<64x192xf32>, vector<8x192xf32> -> vector<8x192xf32>
    %549 = vector.broadcast %10 : vector<1x192xf32> to vector<8x192xf32>
    %550 = arith.addf %548, %549 : vector<8x192xf32>
    %551 = vector.extract_strided_slice %550 {offsets = [0, 0], sizes = [8, 96], strides = [1, 1]} : vector<8x192xf32> to vector<8x96xf32>
    %552 = vector.extract_strided_slice %550 {offsets = [0, 96], sizes = [8, 96], strides = [1, 1]} : vector<8x192xf32> to vector<8x96xf32>
    %553 = vector.extract_strided_slice %547 {offsets = [0, 0], sizes = [8, 32], strides = [1, 1]} : vector<8x64xf32> to vector<8x32xf32>
    %554 = vector.extract_strided_slice %547 {offsets = [0, 32], sizes = [8, 32], strides = [1, 1]} : vector<8x64xf32> to vector<8x32xf32>
    %555 = vector.extract_strided_slice %546 {offsets = [0, 0], sizes = [8, 64], strides = [1, 1]} : vector<8x96xf32> to vector<8x64xf32>
    %556 = vector.extract_strided_slice %551 {offsets = [0, 0], sizes = [8, 64], strides = [1, 1]} : vector<8x96xf32> to vector<8x64xf32>
    %557 = arith.addf %555, %556 : vector<8x64xf32>
    %558 = arith.negf %557 : vector<8x64xf32>
    %559 = math.exp %558 : vector<8x64xf32>
    %cst_111 = arith.constant 1.000000e+00 : f32
    %560 = vector.broadcast %cst_111 : f32 to vector<8x64xf32>
    %561 = arith.addf %560, %559 : vector<8x64xf32>
    %562 = arith.divf %560, %561 : vector<8x64xf32>
    %563 = vector.extract_strided_slice %546 {offsets = [0, 64], sizes = [8, 32], strides = [1, 1]} : vector<8x96xf32> to vector<8x32xf32>
    %564 = vector.extract_strided_slice %562 {offsets = [0, 0], sizes = [8, 32], strides = [1, 1]} : vector<8x64xf32> to vector<8x32xf32>
    %565 = vector.extract_strided_slice %551 {offsets = [0, 64], sizes = [8, 32], strides = [1, 1]} : vector<8x96xf32> to vector<8x32xf32>
    %566 = arith.mulf %564, %565 : vector<8x32xf32>
    %567 = arith.addf %563, %566 : vector<8x32xf32>
    %568 = math.tanh %567 : vector<8x32xf32>
    %569 = vector.extract_strided_slice %562 {offsets = [0, 32], sizes = [8, 32], strides = [1, 1]} : vector<8x64xf32> to vector<8x32xf32>
    %cst_112 = arith.constant 1.000000e+00 : f32
    %570 = vector.broadcast %cst_112 : f32 to vector<8x32xf32>
    %571 = arith.subf %570, %569 : vector<8x32xf32>
    %572 = arith.mulf %571, %568 : vector<8x32xf32>
    %573 = vector.extract_strided_slice %562 {offsets = [0, 32], sizes = [8, 32], strides = [1, 1]} : vector<8x64xf32> to vector<8x32xf32>
    %574 = arith.mulf %573, %553 : vector<8x32xf32>
    %575 = arith.addf %572, %574 : vector<8x32xf32>
    %cst_113 = arith.constant dense<0.000000e+00> : vector<8x96xf32>
    %576 = tpu.matmul %575, %4, %cst_113 {dimension_numbers = #tpu.dot_dimension_numbers<[1], [0], [0], [1], [0, 0, 1, 1], [], []>} : vector<8x32xf32>, vector<32x96xf32>, vector<8x96xf32> -> vector<8x96xf32>
    %577 = vector.broadcast %11 : vector<1x96xf32> to vector<8x96xf32>
    %578 = arith.addf %576, %577 : vector<8x96xf32>
    %579 = vector.extract_strided_slice %578 {offsets = [0, 0], sizes = [8, 64], strides = [1, 1]} : vector<8x96xf32> to vector<8x64xf32>
    %580 = vector.extract_strided_slice %552 {offsets = [0, 0], sizes = [8, 64], strides = [1, 1]} : vector<8x96xf32> to vector<8x64xf32>
    %581 = arith.addf %579, %580 : vector<8x64xf32>
    %582 = arith.negf %581 : vector<8x64xf32>
    %583 = math.exp %582 : vector<8x64xf32>
    %cst_114 = arith.constant 1.000000e+00 : f32
    %584 = vector.broadcast %cst_114 : f32 to vector<8x64xf32>
    %585 = arith.addf %584, %583 : vector<8x64xf32>
    %586 = arith.divf %584, %585 : vector<8x64xf32>
    %587 = vector.extract_strided_slice %578 {offsets = [0, 64], sizes = [8, 32], strides = [1, 1]} : vector<8x96xf32> to vector<8x32xf32>
    %588 = vector.extract_strided_slice %586 {offsets = [0, 0], sizes = [8, 32], strides = [1, 1]} : vector<8x64xf32> to vector<8x32xf32>
    %589 = vector.extract_strided_slice %552 {offsets = [0, 64], sizes = [8, 32], strides = [1, 1]} : vector<8x96xf32> to vector<8x32xf32>
    %590 = arith.mulf %588, %589 : vector<8x32xf32>
    %591 = arith.addf %587, %590 : vector<8x32xf32>
    %592 = math.tanh %591 : vector<8x32xf32>
    %593 = vector.extract_strided_slice %586 {offsets = [0, 32], sizes = [8, 32], strides = [1, 1]} : vector<8x64xf32> to vector<8x32xf32>
    %cst_115 = arith.constant 1.000000e+00 : f32
    %594 = vector.broadcast %cst_115 : f32 to vector<8x32xf32>
    %595 = arith.subf %594, %593 : vector<8x32xf32>
    %596 = arith.mulf %595, %592 : vector<8x32xf32>
    %597 = vector.extract_strided_slice %586 {offsets = [0, 32], sizes = [8, 32], strides = [1, 1]} : vector<8x64xf32> to vector<8x32xf32>
    %598 = arith.mulf %597, %554 : vector<8x32xf32>
    %599 = arith.addf %596, %598 : vector<8x32xf32>
    %cst_116 = arith.constant dense<0.000000e+00> : vector<8x16xf32>
    %600 = tpu.matmul %599, %5, %cst_116 {dimension_numbers = #tpu.dot_dimension_numbers<[1], [0], [0], [1], [0, 0, 1, 1], [], []>} : vector<8x32xf32>, vector<32x16xf32>, vector<8x16xf32> -> vector<8x16xf32>
    %601 = vector.broadcast %12 : vector<1x16xf32> to vector<8x16xf32>
    %602 = arith.addf %600, %601 : vector<8x16xf32>
    %cst_117 = arith.constant 0.000000e+00 : f32
    %603 = vector.broadcast %cst_117 : f32 to vector<8x16xf32>
    %604 = arith.maximumf %602, %603 : vector<8x16xf32>
    %cst_118 = arith.constant dense<0xFF800000> : vector<8xf32>
    %605 = vector.multi_reduction <maximumf>, %604, %cst_118 [1] : vector<8x16xf32> to vector<8xf32>
    %606 = vector.shape_cast %605 : vector<8xf32> to vector<8x1xf32>
    %607 = vector.broadcast %606 : vector<8x1xf32> to vector<8x16xf32>
    %608 = arith.cmpf oeq, %604, %607 : vector<8x16xf32>
    %c16_i32_119 = arith.constant 16 : i32
    %609 = vector.broadcast %c16_i32_119 : i32 to vector<8x16xi32>
    %610 = arith.select %608, %42, %609 : vector<8x16xi1>, vector<8x16xi32>
    %cst_120 = arith.constant dense<2147483647> : vector<8xi32>
    %611 = vector.multi_reduction <minsi>, %610, %cst_120 [1] : vector<8x16xi32> to vector<8xi32>
    %612 = vector.shape_cast %611 : vector<8xi32> to vector<8x1xi32>
    %613 = tpu.concatenate %100, %172, %244, %316, %388, %460, %532, %604 in 1 : vector<8x16xf32>, vector<8x16xf32>, vector<8x16xf32>, vector<8x16xf32>, vector<8x16xf32>, vector<8x16xf32>, vector<8x16xf32>, vector<8x16xf32> -> vector<8x128xf32>
    %c0_121 = arith.constant 0 : index
    %c0_122 = arith.constant 0 : index
    %614 = vector.load %arg3[%c0_121, %c0_122] : memref<8x128xf32, #tpu.memory_space<vmem>>, vector<8x128xf32>
    tpu.vector_store %arg3[%c0_121, %c0_122], %613 {strides = array<i32>} : memref<8x128xf32, #tpu.memory_space<vmem>>, vector<8x128xf32>,
    %615 = tpu.concatenate %108, %180, %252, %324, %396, %468, %540, %612 in 1 : vector<8x1xi32>, vector<8x1xi32>, vector<8x1xi32>, vector<8x1xi32>, vector<8x1xi32>, vector<8x1xi32>, vector<8x1xi32>, vector<8x1xi32> -> vector<8x8xi32>
    %c0_123 = arith.constant 0 : index
    %c0_124 = arith.constant 0 : index
    %616 = vector.load %arg4[%c0_123, %c0_124] : memref<8x8xi32, #tpu.memory_space<vmem>>, vector<8x8xi32>
    tpu.vector_store %arg4[%c0_123, %c0_124], %615 {strides = array<i32>} : memref<8x8xi32, #tpu.memory_space<vmem>>, vector<8x8xi32>,
    return
  }
}

</mosaic_0001>

<bundles_post_ra>
// kernel: tpu_custom_call.1
= control target key start
LH: loop header
LB: loop body
LE: loop exit
PB: predicated region body
PF: predicated region fallthrough
CT: control target
= control target key end

     0   :  { %10 = vsyncpa [#allocation3], 0  ;;  %v4152_v1 = vmov 0.0   ;;  %vm4153_vm0 = vmmov 0   ;;  %s5195_s0 = inlined_call_operand.vmem [shape: f32[8,16], index: 0, kind: input, shape index: {}]   ;;  %s5196_s1 = inlined_call_operand.vmem [shape: f32[208,192], index: 1, kind: input, shape index: {}]   ;;  %s5197_s2 = inlined_call_operand.vmem [shape: f32[7,192], index: 2, kind: input, shape index: {}]   ;;  %s5198_s3 = inlined_call_operand.hbm [shape: f32[8,128], index: 3, kind: output, shape index: {0}]   ;;  %s5199_s4 = inlined_call_operand.hbm [shape: s32[8,8], index: 4, kind: output, shape index: {1}]  }
   0x1   :  { %v19_v0 = vld [vmem:[%s5196_s1 + $0x10] sm:$0xff]  ;;  %3715 = vmatprep.subr.mxu0 %v4152_v1  ;;  %v18_v2 = vld [vmem:[%s5196_s1] sm:$0xff]  ;;  %3719 = vmatprep.mubr.msk.f32.mxu0 %vm4153_vm0, %v4152_v1 }
   0x2   :  { %11 = vsyncpa [#allocation5], 0  ;;  %3716 = vmatpush3.msra.mxu0 %v19_v0  ;;  %v60_v3 = vld [vmem:[%s5195_s0] sm:$0xff]  ;;  %vm61_vm1 = vcmask 130048   ;;  %3722 = vmatprep.subr.mxu1 %v4152_v1  ;;  %v23_v4 = vld [vmem:[%s5196_s1 + $0x50] sm:$0xff]  ;;  %vm143_vm3 = vcmask 261120   ;;  %v445_v44 = vlaneseq }
   0x3   :  { %3717 = vmatprep.subr.mxu0 %v4152_v1  ;;  %3730 = vmatprep.mubr.msk.f32.mxu1 %vm4153_vm0, %v4152_v1  ;;  %v22_v5 = vld [vmem:[%s5196_s1 + $0x40] sm:$0xff]  ;;  %v21_v6 = vld [vmem:[%s5196_s1 + $0x30] sm:$0xff]  ;;  %vm217_vm4 = vcmask 64512   ;;  %v4252_v27 = vld [vmem:[%s5196_s1 + $0xf8] sm:$0xff]  ;;  %s4154_s0 = smov 64   ;;  %s4155_s25 = smov 32  }
   0x4   :  { %3718 = vmatpush3.msra.mxu0 %v18_v2  ;;  %3723 = vmatpush3.msra.mxu1 %v23_v4  ;;  %v20_v7 = vld [vmem:[%s5196_s1 + $0x20] sm:$0xff]  ;;  %v25_v8 = vld [vmem:[%s5196_s1 + $0x70] sm:$0xff]  ;;  %v4268_v30 = vld [vmem:[%s5196_s1 + $0xe8] sm:$0xff]  ;;  %v446_v45 = vshrl.u32 %v445_v44, 7  ;;  %s4156_s26 = smov 96   ;;  %vm463_vm5 = vcmask 523264  }
   0x5   :  { %3720 = vmatmul.mubr.msk.f32.vlgmr.msra.gmra.mxu0 %vm61_vm1, %v60_v3  ;;  %3733 = vmatprep.subr.mxu0 %v4152_v1  ;;  %v52_v9 = vld [vmem:[%s5197_s2] ss:$0 sm:$0xff]  ;;  %v59_v21 = vld [vmem:[%s5197_s2 + $0x6] ss:$0 sm:$0xff]  ;;  %v53_v22 = vld [vmem:[%s5197_s2 + $0x1] ss:$0 sm:$0xff] }
   0x6   :  { %3735 = vmatprep.mubr.msk.f32.mxu0 %vm4153_vm0, %v4152_v1  ;;  %3724 = vmatprep.subr.mxu1 %v4152_v1  ;;  %v24_v20 = vld [vmem:[%s5196_s1 + $0x60] sm:$0xff]  ;;  %v51_v28 = vld [vmem:[%s5196_s1 + $0x190] sm:$0xff]  ;;  %v4280_v32 = vld [vmem:[%s5196_s1 + $0xd8] sm:$0xff]  ;;  %v447_v46 = vsub.s32 0, %v446_v45  ;;  %v459_v49 = vsub.s32 1, %v446_v45  ;;  %vm3495_vm14 = vcmask 7168  }
   0x7   :  { %3725 = vmatpush3.msra.mxu1 %v22_v5  ;;  %3734 = vmatpush3.msra.mxu0 %v25_v8  ;;  %v50_v25 = vld [vmem:[%s5196_s1 + $0x180] sm:$0xff]  ;;  %v4263_v29 = vld [vmem:[%s5196_s1 + $0xf0] sm:$0xff]  ;;  %v4293_v34 = vld [vmem:[%s5196_s1 + $0xc8] sm:$0xff]  ;;  %vm3497_vm15 = vcmask 15360   ;;  %s4158_s24 = smov 48   ;;  %s4159_s27 = smov 80  }
   0x8   :  { %3726 = vmatprep.subr.mxu1 %v4152_v1  ;;  %3738 = vmatprep.subr.mxu0 %v24_v20  ;;  %v4274_v31 = vld [vmem:[%s5196_s1 + $0xe0] sm:$0xff]  ;;  %v4287_v33 = vld [vmem:[%s5196_s1 + $0xd0] sm:$0xff]  ;;  %v4305_v36 = vld [vmem:[%s5196_s1 + $0xb8] sm:$0xff]  ;;  %s4160_s28 = smov 112  }
   0x9   :  { %3727 = vmatpush3.msra.mxu1 %v21_v6  ;;  %v4299_v35 = vld [vmem:[%s5196_s1 + $0xc0] sm:$0xff]  ;;  %v4311_v37 = vld [vmem:[%s5196_s1 + $0xb0] sm:$0xff]  ;;  %v4317_v38 = vld [vmem:[%s5196_s1 + $0xa8] sm:$0xff] }
   0xa   :  { %3728 = vmatprep.subr.mxu1 %v4152_v1  ;;  %v4323_v39 = vld [vmem:[%s5196_s1 + $0xa0] sm:$0xff]  ;;  %v4329_v40 = vld [vmem:[%s5196_s1 + $0x98] sm:$0xff]  ;;  %v4335_v41 = vld [vmem:[%s5196_s1 + $0x90] sm:$0xff] }
   0xb   :  { %3729 = vmatpush3.msra.mxu1 %v20_v7  ;;  %v4341_v42 = vld [vmem:[%s5196_s1 + $0x88] sm:$0xff]  ;;  %v4347_v43 = vld [vmem:[%s5196_s1 + $0x80] sm:$0xff] }
   0xc   :  { %3743 = vmatprep.subr.mxu1 %v4152_v1  ;;  %v3538_v51 = vld [vmem:[%s5197_s2 + $0x3] ss:$8 sm:$0x3]  ;;  %v54_v60 = vld [vmem:[%s5197_s2 + $0x2] ss:$0 sm:$0xff] }
   0xd   :  { %v4360_v52 = vrot.slane %v3538_v51, %v459_v49  ;;  %v4370_v57 = vrot.slane %v3538_v51, %v447_v46 }
  0xc5   :  { %v131_v10 = vpop.f32.mrf.mxu0 }
  0xc6   :  { %v132_v11 = vadd.f32 %v131_v10, %v52_v9 }
  0xc7   :  { %v3721_v12 = vpop.f32.mrf.mxu0 }
  0xc8   :  { %v136_v13 = vmin.f32 %v132_v11, 0.0  ;;  %vm135_vm2 = vcmp.gt.f32.partialorder %v132_v11, 0.0  ;;  %v4392_v12 = vld [vmem:[%s5196_s1 + $0x120] sm:$0xff] }
  0xca   :  { %v137_v14 = vmul.f32 1.442695, %v136_v13  ;;  %v4399_v13 = vld [vmem:[%s5196_s1 + $0x110] sm:$0xff] }
  0xcc   :  { %3984 = vpow2.f32 %v137_v14 }
  0xd9   :  { %v3985_v15 = vpop.eup %3984 }
  0xda   :  { %v3540_v16 = vadd.f32 -1.0, %v3985_v15  ;;  %v4406_v15 = vld [vmem:[%s5196_s1 + $0x100] sm:$0xff] }
  0xdc   :  { %v140_v17 = vmul.f32 1.6732632, %v3540_v16 }
  0xde   :  { %v141_v18 = vsel %vm135_vm2, %v132_v11, %v140_v17  ;;  %v4387_v11 = vld [vmem:[%s5196_s1 + $0x130] sm:$0xff] }
  0xdf   :  { %v142_v19 = vmul.f32 1.050701, %v141_v18 }
  0xe1   :  { %3731 = vmatmul.mubr.msk.f32.vlgmr.msra.gmra.mxu1 %vm143_vm3, %v142_v19 }
  0xe2   :  { %3745 = vmatprep.mubr.msk.f32.mxu1 %vm4153_vm0, %v4152_v1  ;;  %3744 = vmatpush3.msra.mxu1 %v24_v20 }
  0xe3   :  { %3748 = vmatprep.subr.mxu1 %v4152_v1 }
  0xe5   :  { %3746 = vmatmul.mubr.msk.f32.vlgmr.msra.gmra.mxu1 %vm217_vm4, %v59_v21 }
  0xe6   :  { %3756 = vmatprep.mubr.msk.f32.mxu1 %vm4153_vm0, %v4152_v1  ;;  %3749 = vmatpush3.msra.mxu1 %v4387_v11 }
  0xe7   :  { %3750 = vmatprep.subr.mxu1 %v4152_v1 }
  0xe8   :  { %3751 = vmatpush3.msra.mxu1 %v4392_v12 }
  0xe9   :  { %3752 = vmatprep.subr.mxu1 %v4152_v1 }
  0xea   :  { %3753 = vmatpush3.msra.mxu1 %v4399_v13 }
  0xeb   :  { %3754 = vmatprep.subr.mxu1 %v4152_v1 }
  0xec   :  { %3755 = vmatpush3.msra.mxu1 %v4406_v15 }
  0xed   :  { %3759 = vmatprep.subr.mxu1 %v4152_v1 }
 0x1a1   :  { %v213_v23 = vpop.f32.mrf.mxu1 }
 0x1a2   :  { %v214_v24 = vadd.f32 %v213_v23, %v53_v22  ;;  %v4424_v22 = vld [vmem:[%s5197_s2 + $0x4] ss:$0 sm:$0xff] }
 0x1a3   :  { %v3732_v26 = vpop.f32.mrf.mxu1 }
 0x1a4   :  { %3736 = vmatmul.mubr.msk.f32.vlgmr.msra.gmra.mxu0 %vm217_vm4, %v214_v24 }
 0x1a5   :  { %3739 = vmatpush3.msra.mxu0 %v24_v20  ;;  %3740 = vmatprep.mubr.msk.f32.mxu0 %vm217_vm4, %v50_v25  ;;  %v441_v47 = vpop.f32.mrf.mxu1 }
 0x1a6   :  { %483 = vmatprep.subr.mxu0 %v4252_v27  ;;  %v448_v48 = vrot.slane %v441_v47, %v447_v46 }
 0x1a7   :  { %v3747_v50 = vpop.f32.mrf.mxu1 }
 0x1a8   :  { %3741 = vmatmul.mubr.msk.f32.vlgmr.msra.gmra.mxu0 %vm217_vm4, %v51_v28 }
 0x1a9   :  { %484 = vmatpush1.msra.mxu0 %v4263_v29  ;;  %531 = vmatprep.mubr.f32.mxu0 %v4152_v1 }
 0x1aa   :  { %485 = vmatprep.subr.mxu0 %v4268_v30 }
 0x1ab   :  { %486 = vmatpush1.msra.mxu0 %v4274_v31 }
 0x1ac   :  { %487 = vmatprep.subr.mxu0 %v4280_v32 }
 0x1ad   :  { %488 = vmatpush1.msra.mxu0 %v4287_v33 }
 0x1ae   :  { %489 = vmatprep.subr.mxu0 %v4293_v34 }
 0x1af   :  { %490 = vmatpush1.msra.mxu0 %v4299_v35 }
 0x1b0   :  { %491 = vmatprep.subr.mxu0 %v4305_v36 }
 0x1b1   :  { %492 = vmatpush1.msra.mxu0 %v4311_v37 }
 0x1b2   :  { %493 = vmatprep.subr.mxu0 %v4317_v38 }
 0x1b3   :  { %494 = vmatpush1.msra.mxu0 %v4323_v39 }
 0x1b4   :  { %495 = vmatprep.subr.mxu0 %v4329_v40 }
 0x1b5   :  { %496 = vmatpush1.msra.mxu0 %v4335_v41 }
 0x1b6   :  { %497 = vmatprep.subr.mxu0 %v4341_v42 }
 0x1b7   :  { %498 = vmatpush1.msra.mxu0 %v4347_v43 }
 0x1b8   :  { %532 = vmatmul.mubr.f32.vlgmr.msra.gmra.mxu0 %v4152_v1  ;;  %3770 = vmatprep.subr.mxu0 %v4152_v1 }
 0x1b9   :  { %3774 = vmatprep.mubr.msk.f32.mxu0 %vm4153_vm0, %v4152_v1 }
 0x264   :  { %v287_v53 = vpop.f32.mrf.mxu0 }
 0x265   :  { %v4377_v61 = vadd.f32 %v287_v53, %v54_v60  ;;  %v4437_v60 = vld [vmem:[%s5196_s1 + $0x160] sm:$0xff] }
 0x266   :  { %v3737_v54 = vpop.f32.mrf.mxu0 }
 0x267   :  { %v449_v62 = vadd.f32 %v448_v48, %v4377_v61 }
 0x268   :  { %v4362_v55 = vpop.f32.mrf.mxu0 }
 0x269   :  { %3771 = vmatpush3.msra.mxu0 %v4362_v55 }
 0x26a   :  { %v4365_v56 = vpop.f32.mrf.mxu0  ;;  %3772 = vmatprep.subr.mxu0 %v4152_v1 }
 0x26b   :  { %3773 = vmatpush3.msra.mxu0 %v4365_v56 }
 0x26c   :  { %3777 = vmatprep.subr.mxu0 %v4152_v1 }
 0x278   :  { %v533_v58 = vpop.f32.mrf.mxu0 }
 0x279   :  { %v534_v59 = vadd.f32 %v533_v58, %v4370_v57 }
 0x27a   :  { %v535_v7 = vpop.f32.mrf.mxu0 }
 0x27b   :  { %546 = vrot.lane.b32.xlu0 %v534_v59, %s4154_s0  ;;  %v538_v63 = vadd.f32 %v534_v59, %v449_v62  ;;  %v536_v8 = vadd.f32 %v535_v7, %v4360_v52 }
 0x27d   :  { %v3546_v0 = vmul.f32 -1.442695, %v538_v63  ;;  %v4451_v63 = vld [vmem:[%s5196_s1 + $0x140] sm:$0xff] }
 0x27f   :  { %3986 = vpow2.f32 %v3546_v0 }
 0x28c   :  { %v3987_v2 = vpop.eup %3986 }
 0x28d   :  { %v542_v3 = vadd.f32 1.0, %v3987_v2 }
 0x28f   :  { %3988 = vrcp.f32 %v542_v3 }
 0x29c   :  { %v3989_v4 = vpop.eup %3988 }
 0x29d   :  { %v556_v16 = vsub.f32 1.0, %v3989_v4  ;;  %v562_v18 = vmul.f32 0.0, %v3989_v4 }
 0x2ed   :  { %v547_v5 = vpop.permute.xlu0 %546 }
 0x2ee   :  { %v549_v6 = vmul.f32 %v3989_v4, %v547_v5 }
 0x2f0   :  { %551 = vrot.lane.b32.xlu0 %v549_v6, %s4154_s0 }
 0x2f4   :  { %640 = vrot.lane.b32.xlu0 %v534_v59, %s4155_s25  ;;  %v4432_v59 = vld [vmem:[%s5196_s1 + $0x170] sm:$0xff] }
 0x2f8   :  { %653 = vrot.lane.b32.xlu0 %v536_v8, %s4156_s26 }
 0x362   :  { %v552_v9 = vpop.permute.xlu0 %551 }
 0x363   :  { %v554_v10 = vadd.f32 %v552_v9, %v449_v62  ;;  %v4444_v62 = vld [vmem:[%s5196_s1 + $0x150] sm:$0xff]  ;;  %v4492_v9 = vld [vmem:[%s5197_s2 + $0x5] ss:$0 sm:$0xff] }
 0x365   :  { %3990 = vtanh.f32 %v554_v10 }
 0x366   :  { %v641_v25 = vpop.permute.xlu0 %640 }
 0x36a   :  { %v654_v51 = vpop.permute.xlu0 %653 }
 0x372   :  { %v3991_v14 = vpop.eup %3990 }
 0x373   :  { %558 = vrot.lane.b32.xlu1 %v3991_v14, %s4156_s26 }
 0x3e5   :  { %v559_v17 = vpop.permute.xlu1 %558 }
 0x3e6   :  { %v561_v19 = vmul.f32 %v559_v17, %v556_v16 }
 0x3e8   :  { %v563_v20 = vadd.f32 %v562_v18, %v561_v19  ;;  %v4500_v19 = vand.u32 127, %v445_v44 }
 0x3ea   :  { %565 = vrot.lane.b32.xlu1 %v563_v20, %s4156_s26 }
 0x3ee   :  { %642 = vrot.lane.b32.xlu1 %v536_v8, %s4155_s25 }
 0x45c   :  { %v4415_v21 = vpop.permute.xlu1 %565 }
 0x45d   :  { %3757 = vmatmul.mubr.msk.f32.vlgmr.msra.gmra.mxu1 %vm143_vm3, %v4415_v21 }
 0x45e   :  { %3767 = vmatprep.mubr.msk.f32.mxu1 %vm4153_vm0, %v4152_v1  ;;  %3760 = vmatpush3.msra.mxu1 %v4432_v59 }
 0x45f   :  { %3761 = vmatprep.subr.mxu1 %v4152_v1 }
 0x460   :  { %v643_v23 = vpop.permute.xlu1 %642  ;;  %3762 = vmatpush3.msra.mxu1 %v4437_v60 }
 0x461   :  { %v644_v28 = vsel %vm143_vm3, %v641_v25, %v643_v23  ;;  %3763 = vmatprep.subr.mxu1 %v4152_v1 }
 0x462   :  { %3764 = vmatpush3.msra.mxu1 %v4444_v62 }
 0x463   :  { %3765 = vmatprep.subr.mxu1 %v4152_v1 }
 0x464   :  { %3766 = vmatpush3.msra.mxu1 %v4451_v63 }
 0x465   :  { %864 = vmatprep.subr.mxu1 %v4252_v27 }
 0x51d   :  { %v635_v24 = vpop.f32.mrf.mxu1 }
 0x51e   :  { %v636_v26 = vadd.f32 %v635_v24, %v4424_v22 }
 0x51f   :  { %v3758_v45 = vpop.f32.mrf.mxu1 }
 0x520   :  { %v646_v46 = vadd.f32 %v644_v28, %v636_v26 }
 0x522   :  { %v3548_v47 = vmul.f32 -1.442695, %v646_v46 }
 0x524   :  { %3992 = vpow2.f32 %v3548_v47 }
 0x531   :  { %v3993_v48 = vpop.eup %3992 }
 0x532   :  { %v650_v49 = vadd.f32 1.0, %v3993_v48 }
 0x534   :  { %3994 = vrcp.f32 %v650_v49 }
 0x541   :  { %v3995_v50 = vpop.eup %3994 }
 0x542   :  { %v656_v53 = vmul.f32 %v3995_v50, %v654_v51  ;;  %v663_v2 = vsub.f32 1.0, %v3995_v50  ;;  %v669_v4 = vmul.f32 0.0, %v3995_v50 }
 0x544   :  { %658 = vrot.lane.b32.xlu1 %v656_v53, %s4154_s0 }
 0x5b6   :  { %v659_v54 = vpop.permute.xlu1 %658 }
 0x5b7   :  { %v661_v58 = vadd.f32 %v659_v54, %v636_v26 }
 0x5b9   :  { %3996 = vtanh.f32 %v661_v58 }
 0x5c6   :  { %v3997_v0 = vpop.eup %3996 }
 0x5c7   :  { %665 = vrot.lane.b32.xlu0 %v3997_v0, %s4156_s26 }
 0x639   :  { %v666_v3 = vpop.permute.xlu0 %665 }
 0x63a   :  { %v668_v5 = vmul.f32 %v666_v3, %v663_v2 }
 0x63c   :  { %v670_v6 = vadd.f32 %v669_v4, %v668_v5 }
 0x63e   :  { %672 = vrot.lane.b32.xlu1 %v670_v6, %s4156_s26  ;;  %v4478_v8 = vsel %vm143_vm3, %v4415_v21, %v670_v6 }
 0x6b0   :  { %v673_v7 = vpop.permute.xlu1 %672 }
 0x6b1   :  { %3768 = vmatmul.mubr.msk.f32.vlgmr.msra.gmra.mxu1 %vm143_vm3, %v673_v7 }
 0x6b2   :  { %865 = vmatpush1.msra.mxu1 %v4263_v29  ;;  %912 = vmatprep.mubr.f32.mxu1 %v4152_v1 }
 0x6b3   :  { %866 = vmatprep.subr.mxu1 %v4268_v30 }
 0x6b4   :  { %867 = vmatpush1.msra.mxu1 %v4274_v31 }
 0x6b5   :  { %868 = vmatprep.subr.mxu1 %v4280_v32 }
 0x6b6   :  { %869 = vmatpush1.msra.mxu1 %v4287_v33 }
 0x6b7   :  { %870 = vmatprep.subr.mxu1 %v4293_v34 }
 0x6b8   :  { %871 = vmatpush1.msra.mxu1 %v4299_v35 }
 0x6b9   :  { %872 = vmatprep.subr.mxu1 %v4305_v36 }
 0x6ba   :  { %873 = vmatpush1.msra.mxu1 %v4311_v37 }
 0x6bb   :  { %874 = vmatprep.subr.mxu1 %v4317_v38 }
 0x6bc   :  { %875 = vmatpush1.msra.mxu1 %v4323_v39 }
 0x6bd   :  { %876 = vmatprep.subr.mxu1 %v4329_v40 }
 0x6be   :  { %877 = vmatpush1.msra.mxu1 %v4335_v41 }
 0x6bf   :  { %878 = vmatprep.subr.mxu1 %v4341_v42 }
 0x6c0   :  { %879 = vmatpush1.msra.mxu1 %v4347_v43 }
 0x6c1   :  { %3552 = vmatmul.mubr.msk.f32.vlgmr.msra.gmra.mxu1 %vm463_vm5, %v4478_v8  ;;  %3799 = vmatprep.subr.mxu1 %v4152_v1 }
 0x6c2   :  { %3800 = vmatpush3.msra.mxu1 %v4362_v55  ;;  %3803 = vmatprep.mubr.msk.f32.mxu1 %vm4153_vm0, %v4152_v1 }
 0x6c3   :  { %3801 = vmatprep.subr.mxu1 %v4152_v1 }
 0x6c4   :  { %3802 = vmatpush3.msra.mxu1 %v4365_v56 }
 0x6c5   :  { %3806 = vmatprep.subr.mxu1 %v4152_v1 }
 0x771   :  { %v742_v10 = vpop.f32.mrf.mxu1 }
 0x772   :  { %v743_v14 = vadd.f32 %v742_v10, %v4492_v9 }
 0x773   :  { %v3769_v16 = vpop.f32.mrf.mxu1 }
 0x774   :  { %v4495_v17 = vmax.f32 %v743_v14, 0.0 }
 0x776   :  { %v747_v18 = vsel %vm61_vm1, %v4495_v17, -inf }
 0x777   :  { %748 = vmax.xlane.f32.xlu0 %v747_v18 }
 0x781   :  { %v914_v47 = vpop.f32.mrf.mxu1 }
 0x782   :  { %v915_v44 = vadd.f32 %v914_v47, %v4370_v57 }
 0x783   :  { %v916_v48 = vpop.f32.mrf.mxu1 }
 0x784   :  { %v917_v49 = vadd.f32 %v916_v48, %v4360_v52 }
 0x800   :  { %v749_v20 = vpop.xlane.xlu0 %748 }
 0x801   :  { %vm750_vm6 = vcmp.eq.f32.partialorder %v4495_v17, %v749_v20 }
 0x802   :  { %v751_v21 = vsel %vm750_vm6, %v4500_v19, 16 }
 0x803   :  { %v752_v23 = vsel %vm61_vm1, %v751_v21, 2147483647 }
 0x804   :  { %v754_v24 = vshra.s32 %v752_v23, 16  ;;  %v753_v26 = vand.u32 65535, %v752_v23 }
 0x806   :  { %v756_v25 = vcvt.s32.f32 %v754_v24  ;;  %v755_v45 = vcvt.s32.f32 %v753_v26 }
 0x808   :  { %757 = vmin.xlane.f32.xlu1 %v756_v25 }
 0x891   :  { %v758_v28 = vpop.xlane.xlu1 %757 }
 0x892   :  { %vm759_vm7 = vcmp.eq.f32.partialorder %v756_v25, %v758_v28  ;;  %v764_v50 = vcvt.f32.s32 %v758_v28 }
 0x893   :  { %v760_v46 = vsel %vm759_vm7, %v755_v45, inf }
 0x894   :  { %761 = vmin.xlane.f32.xlu0 %v760_v46  ;;  %v765_v53 = vshll.u32 %v764_v50, 16 }
 0x8aa   :  { %927 = vrot.lane.b32.xlu0 %v915_v44, %s4154_s0 }
 0x8ae   :  { %943 = vrot.lane.b32.xlu0 %v4478_v8, %s4155_s25 }
 0x8b2   :  { %1024 = vrot.lane.b32.xlu0 %v915_v44, %s4155_s25 }
 0x8b6   :  { %1037 = vrot.lane.b32.xlu0 %v917_v49, %s4156_s26 }
 0x91d   :  { %v762_v51 = vpop.xlane.xlu0 %761 }
 0x91e   :  { %v763_v54 = vcvt.f32.s32 %v762_v51 }
 0x920   :  { %v4512_v58 = vadd.s32 %v765_v53, %v763_v54 }
 0x921   :  { %v928_v16 = vpop.permute.xlu0 %927 }
 0x922   :  { %vm767_vm8 = vcmp.eq.s32.totalorder %v4500_v19, %v4512_v58 }
 0x923   :  { %v3550_v0 = vsel %vm767_vm8, 1.0, %v4152_v1  ;;  %vm3499_vm8 = vcmask 23552  }
 0x924   :  { %3775 = vmatmul.mubr.msk.f32.vlgmr.msra.gmra.mxu0 %vm61_vm1, %v3550_v0 }
 0x925   :  { %3778 = vmatpush3.msra.mxu0 %v4387_v11  ;;  %3785 = vmatprep.mubr.msk.f32.mxu0 %vm4153_vm0, %v4152_v1  ;;  %v944_v25 = vpop.permute.xlu0 %943 }
 0x926   :  { %3779 = vmatprep.subr.mxu0 %v4152_v1 }
 0x927   :  { %3780 = vmatpush3.msra.mxu0 %v4392_v12 }
 0x928   :  { %3781 = vmatprep.subr.mxu0 %v4152_v1 }
 0x929   :  { %3782 = vmatpush3.msra.mxu0 %v4399_v13 }
 0x92a   :  { %3783 = vmatprep.subr.mxu0 %v4152_v1 }
 0x92b   :  { %3784 = vmatpush3.msra.mxu0 %v4406_v15 }
 0x92c   :  { %3788 = vmatprep.subr.mxu0 %v4152_v1 }
 0x9e4   :  { %v839_v2 = vpop.f32.mrf.mxu0 }
 0x9e5   :  { %v840_v3 = vadd.f32 %v839_v2, %v4377_v61 }
 0x9e6   :  { %v3776_v4 = vpop.f32.mrf.mxu0 }
 0x9e7   :  { %v919_v5 = vadd.f32 %v915_v44, %v840_v3 }
 0x9e9   :  { %v3553_v6 = vmul.f32 -1.442695, %v919_v5 }
 0x9eb   :  { %3998 = vpow2.f32 %v3553_v6 }
 0x9f8   :  { %v3999_v7 = vpop.eup %3998 }
 0x9f9   :  { %v923_v10 = vadd.f32 1.0, %v3999_v7 }
 0x9fb   :  { %4000 = vrcp.f32 %v923_v10 }
 0xa08   :  { %v4001_v14 = vpop.eup %4000 }
 0xa09   :  { %v930_v18 = vmul.f32 %v4001_v14, %v928_v16  ;;  %v937_v24 = vsub.f32 1.0, %v4001_v14  ;;  %v946_v28 = vmul.f32 %v4001_v14, %v944_v25 }
 0xa0b   :  { %932 = vrot.lane.b32.xlu1 %v930_v18, %s4154_s0 }
 0xa7d   :  { %v933_v20 = vpop.permute.xlu1 %932 }
 0xa7e   :  { %v935_v21 = vadd.f32 %v933_v20, %v840_v3 }
 0xa80   :  { %4002 = vtanh.f32 %v935_v21 }
 0xa8d   :  { %v4003_v23 = vpop.eup %4002 }
 0xa8e   :  { %939 = vrot.lane.b32.xlu1 %v4003_v23, %s4156_s26 }
 0xb00   :  { %v940_v26 = vpop.permute.xlu1 %939 }
 0xb01   :  { %v942_v45 = vmul.f32 %v940_v26, %v937_v24 }
 0xb03   :  { %v947_v46 = vadd.f32 %v946_v28, %v942_v45 }
 0xb05   :  { %949 = vrot.lane.b32.xlu1 %v947_v46, %s4156_s26 }
 0xb09   :  { %1026 = vrot.lane.b32.xlu1 %v917_v49, %s4155_s25  ;;  %v1025_v49 = vpop.permute.xlu0 %1024 }
 0xb0d   :  { %v1038_v5 = vpop.permute.xlu0 %1037 }
 0xb77   :  { %v950_v47 = vpop.permute.xlu1 %949 }
 0xb78   :  { %3786 = vmatmul.mubr.msk.f32.vlgmr.msra.gmra.mxu0 %vm143_vm3, %v950_v47 }
 0xb79   :  { %3789 = vmatpush3.msra.mxu0 %v4432_v59  ;;  %3796 = vmatprep.mubr.msk.f32.mxu0 %vm4153_vm0, %v4152_v1 }
 0xb7a   :  { %3790 = vmatprep.subr.mxu0 %v4152_v1 }
 0xb7b   :  { %3791 = vmatpush3.msra.mxu0 %v4437_v60  ;;  %v1027_v44 = vpop.permute.xlu1 %1026 }
 0xb7c   :  { %3792 = vmatprep.subr.mxu0 %v4152_v1  ;;  %v1028_v51 = vsel %vm143_vm3, %v1025_v49, %v1027_v44 }
 0xb7d   :  { %3793 = vmatpush3.msra.mxu0 %v4444_v62 }
 0xb7e   :  { %3794 = vmatprep.subr.mxu0 %v4152_v1 }
 0xb7f   :  { %3795 = vmatpush3.msra.mxu0 %v4451_v63 }
 0xb80   :  { %1248 = vmatprep.subr.mxu0 %v4252_v27 }
 0xc38   :  { %v1019_v48 = vpop.f32.mrf.mxu0 }
 0xc39   :  { %v1020_v50 = vadd.f32 %v1019_v48, %v4424_v22 }
 0xc3a   :  { %v3787_v53 = vpop.f32.mrf.mxu0 }
 0xc3b   :  { %v1030_v54 = vadd.f32 %v1028_v51, %v1020_v50 }
 0xc3d   :  { %v3555_v0 = vmul.f32 -1.442695, %v1030_v54 }
 0xc3f   :  { %4004 = vpow2.f32 %v3555_v0 }
 0xc4c   :  { %v4005_v2 = vpop.eup %4004 }
 0xc4d   :  { %v1034_v3 = vadd.f32 1.0, %v4005_v2 }
 0xc4f   :  { %4006 = vrcp.f32 %v1034_v3 }
 0xc5c   :  { %v4007_v4 = vpop.eup %4006 }
 0xc5d   :  { %v1040_v6 = vmul.f32 %v4007_v4, %v1038_v5  ;;  %v1047_v16 = vsub.f32 1.0, %v4007_v4  ;;  %v1053_v20 = vmul.f32 %v4007_v4, %v4478_v8 }
 0xc5f   :  { %1042 = vrot.lane.b32.xlu1 %v1040_v6, %s4154_s0 }
 0xcd1   :  { %v1043_v7 = vpop.permute.xlu1 %1042 }
 0xcd2   :  { %v1045_v10 = vadd.f32 %v1043_v7, %v1020_v50 }
 0xcd4   :  { %4008 = vtanh.f32 %v1045_v10 }
 0xce1   :  { %v4009_v14 = vpop.eup %4008 }
 0xce2   :  { %1049 = vrot.lane.b32.xlu0 %v4009_v14, %s4156_s26 }
 0xd54   :  { %v1050_v18 = vpop.permute.xlu0 %1049 }
 0xd55   :  { %v1052_v21 = vmul.f32 %v1050_v18, %v1047_v16 }
 0xd57   :  { %v1054_v23 = vadd.f32 %v1053_v20, %v1052_v21 }
 0xd59   :  { %1056 = vrot.lane.b32.xlu1 %v1054_v23, %s4156_s26  ;;  %v4568_v8 = vsel %vm143_vm3, %v950_v47, %v1054_v23 }
 0xdcb   :  { %v1057_v24 = vpop.permute.xlu1 %1056 }
 0xdcc   :  { %3797 = vmatmul.mubr.msk.f32.vlgmr.msra.gmra.mxu0 %vm143_vm3, %v1057_v24 }
 0xdcd   :  { %1249 = vmatpush1.msra.mxu0 %v4263_v29  ;;  %1296 = vmatprep.mubr.f32.mxu0 %v4152_v1 }
 0xdce   :  { %1250 = vmatprep.subr.mxu0 %v4268_v30 }
 0xdcf   :  { %1251 = vmatpush1.msra.mxu0 %v4274_v31 }
 0xdd0   :  { %1252 = vmatprep.subr.mxu0 %v4280_v32 }
 0xdd1   :  { %1253 = vmatpush1.msra.mxu0 %v4287_v33 }
 0xdd2   :  { %1254 = vmatprep.subr.mxu0 %v4293_v34 }
 0xdd3   :  { %1255 = vmatpush1.msra.mxu0 %v4299_v35 }
 0xdd4   :  { %1256 = vmatprep.subr.mxu0 %v4305_v36 }
 0xdd5   :  { %1257 = vmatpush1.msra.mxu0 %v4311_v37 }
 0xdd6   :  { %1258 = vmatprep.subr.mxu0 %v4317_v38 }
 0xdd7   :  { %1259 = vmatpush1.msra.mxu0 %v4323_v39 }
 0xdd8   :  { %1260 = vmatprep.subr.mxu0 %v4329_v40 }
 0xdd9   :  { %1261 = vmatpush1.msra.mxu0 %v4335_v41 }
 0xdda   :  { %1262 = vmatprep.subr.mxu0 %v4341_v42 }
 0xddb   :  { %1263 = vmatpush1.msra.mxu0 %v4347_v43 }
 0xddc   :  { %3559 = vmatmul.mubr.msk.f32.vlgmr.msra.gmra.mxu0 %vm463_vm5, %v4568_v8  ;;  %3828 = vmatprep.subr.mxu0 %v4152_v1 }
 0xddd   :  { %3829 = vmatpush3.msra.mxu0 %v4362_v55  ;;  %3832 = vmatprep.mubr.msk.f32.mxu0 %vm4153_vm0, %v4152_v1 }
 0xdde   :  { %3830 = vmatprep.subr.mxu0 %v4152_v1 }
 0xddf   :  { %3831 = vmatpush3.msra.mxu0 %v4365_v56 }
 0xde0   :  { %3835 = vmatprep.subr.mxu0 %v4152_v1 }
 0xe8c   :  { %v1126_v25 = vpop.f32.mrf.mxu0 }
 0xe8d   :  { %v1127_v26 = vadd.f32 %v1126_v25, %v4492_v9 }
 0xe8e   :  { %v3798_v28 = vpop.f32.mrf.mxu0 }
 0xe8f   :  { %v4580_v45 = vmax.f32 %v1127_v26, 0.0 }
 0xe91   :  { %v1131_v46 = vsel %vm61_vm1, %v4580_v45, -inf }
 0xe92   :  { %1132 = vmax.xlane.f32.xlu0 %v1131_v46 }
 0xe9c   :  { %v1298_v2 = vpop.f32.mrf.mxu0 }
 0xe9d   :  { %v1299_v3 = vadd.f32 %v1298_v2, %v4370_v57 }
 0xe9e   :  { %v1300_v4 = vpop.f32.mrf.mxu0 }
 0xe9f   :  { %v1301_v5 = vadd.f32 %v1300_v4, %v4360_v52 }
 0xf1b   :  { %v1133_v47 = vpop.xlane.xlu0 %1132 }
 0xf1c   :  { %vm1134_vm9 = vcmp.eq.f32.partialorder %v4580_v45, %v1133_v47 }
 0xf1d   :  { %v1135_v44 = vsel %vm1134_vm9, %v4500_v19, 16 }
 0xf1e   :  { %v1136_v48 = vsel %vm61_vm1, %v1135_v44, 2147483647 }
 0xf1f   :  { %v1138_v49 = vshra.s32 %v1136_v48, 16  ;;  %v1137_v51 = vand.u32 65535, %v1136_v48 }
 0xf21   :  { %v1140_v50 = vcvt.s32.f32 %v1138_v49  ;;  %v1139_v54 = vcvt.s32.f32 %v1137_v51 }
 0xf23   :  { %1141 = vmin.xlane.f32.xlu1 %v1140_v50 }
 0xfac   :  { %v1142_v53 = vpop.xlane.xlu1 %1141 }
 0xfad   :  { %vm1143_vm10 = vcmp.eq.f32.partialorder %v1140_v50, %v1142_v53  ;;  %v1148_v6 = vcvt.f32.s32 %v1142_v53 }
 0xfae   :  { %v1144_v0 = vsel %vm1143_vm10, %v1139_v54, inf }
 0xfaf   :  { %1145 = vmin.xlane.f32.xlu0 %v1144_v0  ;;  %v1149_v10 = vshll.u32 %v1148_v6, 16 }
 0xfc5   :  { %1311 = vrot.lane.b32.xlu0 %v1299_v3, %s4154_s0 }
 0xfc9   :  { %1327 = vrot.lane.b32.xlu0 %v4568_v8, %s4155_s25 }
 0xfcd   :  { %1408 = vrot.lane.b32.xlu0 %v1299_v3, %s4155_s25 }
 0xfd1   :  { %1421 = vrot.lane.b32.xlu0 %v1301_v5, %s4156_s26 }
0x1038   :  { %v1146_v7 = vpop.xlane.xlu0 %1145 }
0x1039   :  { %v1147_v14 = vcvt.f32.s32 %v1146_v7 }
0x103b   :  { %v4594_v16 = vadd.s32 %v1149_v10, %v1147_v14 }
0x103c   :  { %v1312_v47 = vpop.permute.xlu0 %1311 }
0x103d   :  { %vm1151_vm11 = vcmp.eq.s32.totalorder %v4500_v19, %v4594_v16 }
0x103e   :  { %v3557_v18 = vsel %vm1151_vm11, 1.0, %v4152_v1 }
0x103f   :  { %3804 = vmatmul.mubr.msk.f32.vlgmr.msra.gmra.mxu1 %vm61_vm1, %v3557_v18 }
0x1040   :  { %3807 = vmatpush3.msra.mxu1 %v4387_v11  ;;  %3814 = vmatprep.mubr.msk.f32.mxu1 %vm4153_vm0, %v4152_v1  ;;  %v1328_v53 = vpop.permute.xlu0 %1327 }
0x1041   :  { %3808 = vmatprep.subr.mxu1 %v4152_v1 }
0x1042   :  { %3809 = vmatpush3.msra.mxu1 %v4392_v12 }
0x1043   :  { %3810 = vmatprep.subr.mxu1 %v4152_v1 }
0x1044   :  { %3811 = vmatpush3.msra.mxu1 %v4399_v13  ;;  %v1409_v7 = vpop.permute.xlu0 %1408 }
0x1045   :  { %3812 = vmatprep.subr.mxu1 %v4152_v1 }
0x1046   :  { %3813 = vmatpush3.msra.mxu1 %v4406_v15 }
0x1047   :  { %3817 = vmatprep.subr.mxu1 %v4152_v1 }
0x10ff   :  { %v1223_v20 = vpop.f32.mrf.mxu1 }
0x1100   :  { %v1224_v21 = vadd.f32 %v1223_v20, %v4377_v61 }
0x1101   :  { %v3805_v23 = vpop.f32.mrf.mxu1 }
0x1102   :  { %v1303_v24 = vadd.f32 %v1299_v3, %v1224_v21 }
0x1104   :  { %v3560_v25 = vmul.f32 -1.442695, %v1303_v24 }
0x1106   :  { %4010 = vpow2.f32 %v3560_v25 }
0x1113   :  { %v4011_v26 = vpop.eup %4010 }
0x1114   :  { %v1307_v28 = vadd.f32 1.0, %v4011_v26  ;;  %v1422_v26 = vpop.permute.xlu0 %1421 }
0x1116   :  { %4012 = vrcp.f32 %v1307_v28 }
0x1123   :  { %v4013_v46 = vpop.eup %4012 }
0x1124   :  { %v1314_v44 = vmul.f32 %v4013_v46, %v1312_v47  ;;  %v1321_v51 = vsub.f32 1.0, %v4013_v46  ;;  %v1330_v0 = vmul.f32 %v4013_v46, %v1328_v53 }
0x1126   :  { %1316 = vrot.lane.b32.xlu1 %v1314_v44, %s4154_s0 }
0x1198   :  { %v1317_v48 = vpop.permute.xlu1 %1316 }
0x1199   :  { %v1319_v49 = vadd.f32 %v1317_v48, %v1224_v21 }
0x119b   :  { %4014 = vtanh.f32 %v1319_v49 }
0x11a8   :  { %v4015_v50 = vpop.eup %4014 }
0x11a9   :  { %1323 = vrot.lane.b32.xlu1 %v4015_v50, %s4156_s26 }
0x121b   :  { %v1324_v54 = vpop.permute.xlu1 %1323 }
0x121c   :  { %v1326_v2 = vmul.f32 %v1324_v54, %v1321_v51 }
0x121e   :  { %v1331_v3 = vadd.f32 %v1330_v0, %v1326_v2 }
0x1220   :  { %1333 = vrot.lane.b32.xlu1 %v1331_v3, %s4156_s26 }
0x1224   :  { %1410 = vrot.lane.b32.xlu1 %v1301_v5, %s4155_s25 }
0x1292   :  { %v1334_v4 = vpop.permute.xlu1 %1333 }
0x1293   :  { %3815 = vmatmul.mubr.msk.f32.vlgmr.msra.gmra.mxu1 %vm143_vm3, %v1334_v4 }
0x1294   :  { %3818 = vmatpush3.msra.mxu1 %v4432_v59  ;;  %3825 = vmatprep.mubr.msk.f32.mxu1 %vm4153_vm0, %v4152_v1 }
0x1295   :  { %3819 = vmatprep.subr.mxu1 %v4152_v1 }
0x1296   :  { %3820 = vmatpush3.msra.mxu1 %v4437_v60  ;;  %v1411_v5 = vpop.permute.xlu1 %1410 }
0x1297   :  { %3821 = vmatprep.subr.mxu1 %v4152_v1  ;;  %v1412_v14 = vsel %vm143_vm3, %v1409_v7, %v1411_v5 }
0x1298   :  { %3822 = vmatpush3.msra.mxu1 %v4444_v62 }
0x1299   :  { %3823 = vmatprep.subr.mxu1 %v4152_v1 }
0x129a   :  { %3824 = vmatpush3.msra.mxu1 %v4451_v63 }
0x129b   :  { %1632 = vmatprep.subr.mxu1 %v4252_v27 }
0x1353   :  { %v1403_v6 = vpop.f32.mrf.mxu1 }
0x1354   :  { %v1404_v10 = vadd.f32 %v1403_v6, %v4424_v22 }
0x1355   :  { %v3816_v18 = vpop.f32.mrf.mxu1 }
0x1356   :  { %v1414_v20 = vadd.f32 %v1412_v14, %v1404_v10 }
0x1358   :  { %v3562_v21 = vmul.f32 -1.442695, %v1414_v20 }
0x135a   :  { %4016 = vpow2.f32 %v3562_v21 }
0x1367   :  { %v4017_v23 = vpop.eup %4016 }
0x1368   :  { %v1418_v24 = vadd.f32 1.0, %v4017_v23 }
0x136a   :  { %4018 = vrcp.f32 %v1418_v24 }
0x1377   :  { %v4019_v25 = vpop.eup %4018 }
0x1378   :  { %v1424_v28 = vmul.f32 %v4019_v25, %v1422_v26  ;;  %v1431_v44 = vsub.f32 1.0, %v4019_v25  ;;  %v1437_v49 = vmul.f32 %v4019_v25, %v4568_v8 }
0x137a   :  { %1426 = vrot.lane.b32.xlu1 %v1424_v28, %s4154_s0 }
0x13ec   :  { %v1427_v27 = vpop.permute.xlu1 %1426 }
0x13ed   :  { %v1429_v46 = vadd.f32 %v1427_v27, %v1404_v10  ;;  %v3496_v10 = vsel %vm3495_vm14, %v4512_v58, %v4594_v16 }
0x13ef   :  { %4020 = vtanh.f32 %v1429_v46 }
0x13fc   :  { %v4021_v47 = vpop.eup %4020 }
0x13fd   :  { %1433 = vrot.lane.b32.xlu0 %v4021_v47, %s4156_s26 }
0x146f   :  { %v1434_v48 = vpop.permute.xlu0 %1433 }
0x1470   :  { %v1436_v50 = vmul.f32 %v1434_v48, %v1431_v44 }
0x1472   :  { %v1438_v51 = vadd.f32 %v1437_v49, %v1436_v50 }
0x1474   :  { %1440 = vrot.lane.b32.xlu1 %v1438_v51, %s4156_s26 }
0x14e6   :  { %v1441_v53 = vpop.permute.xlu1 %1440 }
0x14e7   :  { %3826 = vmatmul.mubr.msk.f32.vlgmr.msra.gmra.mxu1 %vm143_vm3, %v1441_v53 }
0x14e8   :  { %1633 = vmatpush1.msra.mxu1 %v4263_v29  ;;  %1680 = vmatprep.mubr.f32.mxu1 %v4152_v1  ;;  %v4650_v29 = vsel %vm143_vm3, %v1334_v4, %v1438_v51  ;;  %v4714_v51 = vld [vmem:[%s5196_s1 + $0xf8] sm:$0xff] }
0x14e9   :  { %1634 = vmatprep.subr.mxu1 %v4268_v30 }
0x14ea   :  { %1635 = vmatpush1.msra.mxu1 %v4274_v31 }
0x14eb   :  { %1636 = vmatprep.subr.mxu1 %v4280_v32 }
0x14ec   :  { %1637 = vmatpush1.msra.mxu1 %v4287_v33 }
0x14ed   :  { %1638 = vmatprep.subr.mxu1 %v4293_v34 }
0x14ee   :  { %1639 = vmatpush1.msra.mxu1 %v4299_v35 }
0x14ef   :  { %1640 = vmatprep.subr.mxu1 %v4305_v36 }
0x14f0   :  { %1641 = vmatpush1.msra.mxu1 %v4311_v37 }
0x14f1   :  { %1642 = vmatprep.subr.mxu1 %v4317_v38 }
0x14f2   :  { %1643 = vmatpush1.msra.mxu1 %v4323_v39 }
0x14f3   :  { %1644 = vmatprep.subr.mxu1 %v4329_v40 }
0x14f4   :  { %1645 = vmatpush1.msra.mxu1 %v4335_v41 }
0x14f5   :  { %1646 = vmatprep.subr.mxu1 %v4341_v42 }
0x14f6   :  { %1647 = vmatpush1.msra.mxu1 %v4347_v43 }
0x14f7   :  { %3566 = vmatmul.mubr.msk.f32.vlgmr.msra.gmra.mxu1 %vm463_vm5, %v4650_v29  ;;  %3857 = vmatprep.subr.mxu1 %v4152_v1 }
0x14f8   :  { %3858 = vmatpush3.msra.mxu1 %v4362_v55  ;;  %3861 = vmatprep.mubr.msk.f32.mxu1 %vm4153_vm0, %v4152_v1 }
0x14f9   :  { %3859 = vmatprep.subr.mxu1 %v4152_v1 }
0x14fa   :  { %3860 = vmatpush3.msra.mxu1 %v4365_v56 }
0x14fb   :  { %3864 = vmatprep.subr.mxu1 %v4152_v1 }
0x15a7   :  { %v1510_v30 = vpop.f32.mrf.mxu1 }
0x15a8   :  { %v1511_v31 = vadd.f32 %v1510_v30, %v4492_v9 }
0x15a9   :  { %v3827_v32 = vpop.f32.mrf.mxu1 }
0x15aa   :  { %v4662_v33 = vmax.f32 %v1511_v31, 0.0 }
0x15ac   :  { %v1515_v34 = vsel %vm61_vm1, %v4662_v33, -inf }
0x15ad   :  { %1516 = vmax.xlane.f32.xlu0 %v1515_v34 }
0x15b7   :  { %v1682_v8 = vpop.f32.mrf.mxu1 }
0x15b8   :  { %v1683_v54 = vadd.f32 %v1682_v8, %v4370_v57 }
0x15b9   :  { %v1684_v0 = vpop.f32.mrf.mxu1 }
0x15ba   :  { %v1685_v2 = vadd.f32 %v1684_v0, %v4360_v52 }
0x1636   :  { %v1517_v35 = vpop.xlane.xlu0 %1516 }
0x1637   :  { %vm1518_vm12 = vcmp.eq.f32.partialorder %v4662_v33, %v1517_v35 }
0x1638   :  { %v1519_v36 = vsel %vm1518_vm12, %v4500_v19, 16  ;;  %vm3501_vm12 = vcmask 31744  }
0x1639   :  { %v1520_v37 = vsel %vm61_vm1, %v1519_v36, 2147483647 }
0x163a   :  { %v1522_v38 = vshra.s32 %v1520_v37, 16  ;;  %v1521_v40 = vand.u32 65535, %v1520_v37 }
0x163c   :  { %v1524_v39 = vcvt.s32.f32 %v1522_v38  ;;  %v1523_v42 = vcvt.s32.f32 %v1521_v40 }
0x163e   :  { %1525 = vmin.xlane.f32.xlu1 %v1524_v39 }
0x16c7   :  { %v1526_v41 = vpop.xlane.xlu1 %1525 }
0x16c8   :  { %vm1527_vm13 = vcmp.eq.f32.partialorder %v1524_v39, %v1526_v41  ;;  %v1532_v3 = vcvt.f32.s32 %v1526_v41 }
0x16c9   :  { %v1528_v43 = vsel %vm1527_vm13, %v1523_v42, inf }
0x16ca   :  { %1529 = vmin.xlane.f32.xlu0 %v1528_v43  ;;  %v1533_v5 = vshll.u32 %v1532_v3, 16  ;;  %v4740_v3 = vld [vmem:[%s5196_s1 + $0xe0] sm:$0xff] }
0x16e0   :  { %1695 = vrot.lane.b32.xlu0 %v1683_v54, %s4154_s0 }
0x16e4   :  { %1711 = vrot.lane.b32.xlu0 %v4650_v29, %s4155_s25 }
0x16e8   :  { %1792 = vrot.lane.b32.xlu0 %v1683_v54, %s4155_s25 }
0x16ec   :  { %1805 = vrot.lane.b32.xlu0 %v1685_v2, %s4156_s26 }
0x1753   :  { %v1530_v4 = vpop.xlane.xlu0 %1529 }
0x1754   :  { %v1531_v6 = vcvt.f32.s32 %v1530_v4  ;;  %v4746_v4 = vld [vmem:[%s5196_s1 + $0xd8] sm:$0xff] }
0x1756   :  { %v1534_v7 = vadd.s32 %v1533_v5, %v1531_v6  ;;  %v4752_v5 = vld [vmem:[%s5196_s1 + $0xd0] sm:$0xff]  ;;  %v4758_v6 = vld [vmem:[%s5196_s1 + $0xc8] sm:$0xff] }
0x1757   :  { %v1696_v25 = vpop.permute.xlu0 %1695 }
0x1758   :  { %vm1535_vm2 = vcmp.eq.s32.totalorder %v4500_v19, %v1534_v7  ;;  %v4679_v14 = vsel %vm3497_vm15, %v3496_v10, %v1534_v7  ;;  %v4764_v7 = vld [vmem:[%s5196_s1 + $0xc0] sm:$0xff]  ;;  %v4770_v10 = vld [vmem:[%s5196_s1 + $0xb8] sm:$0xff] }
0x1759   :  { %v3564_v18 = vsel %vm1535_vm2, 1.0, %v4152_v1  ;;  %vm3503_vm2 = vcmask 39936  }
0x175a   :  { %3833 = vmatmul.mubr.msk.f32.vlgmr.msra.gmra.mxu0 %vm61_vm1, %v3564_v18  ;;  %v4776_v18 = vld [vmem:[%s5196_s1 + $0xb0] sm:$0xff] }
0x175b   :  { %3836 = vmatpush3.msra.mxu0 %v4387_v11  ;;  %3843 = vmatprep.mubr.msk.f32.mxu0 %vm4153_vm0, %v4152_v1  ;;  %v1712_v46 = vpop.permute.xlu0 %1711 }
0x175c   :  { %3837 = vmatprep.subr.mxu0 %v4152_v1 }
0x175d   :  { %3838 = vmatpush3.msra.mxu0 %v4392_v12 }
0x175e   :  { %3839 = vmatprep.subr.mxu0 %v4152_v1 }
0x175f   :  { %3840 = vmatpush3.msra.mxu0 %v4399_v13  ;;  %v1793_v30 = vpop.permute.xlu0 %1792 }
0x1760   :  { %3841 = vmatprep.subr.mxu0 %v4152_v1 }
0x1761   :  { %3842 = vmatpush3.msra.mxu0 %v4406_v15 }
0x1762   :  { %3846 = vmatprep.subr.mxu0 %v4152_v1 }
0x1763   :  { %v1806_v37 = vpop.permute.xlu0 %1805 }
0x181a   :  { %v1607_v58 = vpop.f32.mrf.mxu0 }
0x181b   :  { %v1608_v11 = vadd.f32 %v1607_v58, %v4377_v61  ;;  %v4782_v58 = vld [vmem:[%s5196_s1 + $0xa8] sm:$0xff] }
0x181c   :  { %v3834_v16 = vpop.f32.mrf.mxu0 }
0x181d   :  { %v1687_v20 = vadd.f32 %v1683_v54, %v1608_v11  ;;  %v4794_v16 = vld [vmem:[%s5196_s1 + $0x98] sm:$0xff] }
0x181f   :  { %v3567_v21 = vmul.f32 -1.442695, %v1687_v20  ;;  %v4800_v20 = vld [vmem:[%s5196_s1 + $0x90] sm:$0xff] }
0x1821   :  { %4022 = vpow2.f32 %v3567_v21  ;;  %v4806_v21 = vld [vmem:[%s5196_s1 + $0x88] sm:$0xff] }
0x182e   :  { %v4023_v23 = vpop.eup %4022 }
0x182f   :  { %v1691_v24 = vadd.f32 1.0, %v4023_v23  ;;  %v4812_v23 = vld [vmem:[%s5196_s1 + $0x80] sm:$0xff] }
0x1831   :  { %4024 = vrcp.f32 %v1691_v24 }
0x183e   :  { %v4025_v12 = vpop.eup %4024 }
0x183f   :  { %v1698_v26 = vmul.f32 %v4025_v12, %v1696_v25  ;;  %v1705_v27 = vsub.f32 1.0, %v4025_v12  ;;  %v1714_v44 = vmul.f32 %v4025_v12, %v1712_v46 }
0x1841   :  { %1700 = vrot.lane.b32.xlu1 %v1698_v26, %s4154_s0 }
0x18b3   :  { %v1701_v13 = vpop.permute.xlu1 %1700 }
0x18b4   :  { %v1703_v28 = vadd.f32 %v1701_v13, %v1608_v11  ;;  %v4788_v11 = vld [vmem:[%s5196_s1 + $0xa0] sm:$0xff] }
0x18b6   :  { %4026 = vtanh.f32 %v1703_v28 }
0x18c3   :  { %v4027_v15 = vpop.eup %4026 }
0x18c4   :  { %1707 = vrot.lane.b32.xlu1 %v4027_v15, %s4156_s26 }
0x1936   :  { %v1708_v47 = vpop.permute.xlu1 %1707 }
0x1937   :  { %v1710_v48 = vmul.f32 %v1708_v47, %v1705_v27 }
0x1939   :  { %v1715_v49 = vadd.f32 %v1714_v44, %v1710_v48 }
0x193b   :  { %1717 = vrot.lane.b32.xlu1 %v1715_v49, %s4156_s26 }
0x193f   :  { %1794 = vrot.lane.b32.xlu1 %v1685_v2, %s4155_s25  ;;  %v4727_v2 = vld [vmem:[%s5196_s1 + $0xf0] sm:$0xff] }
0x19ad   :  { %v4698_v50 = vpop.permute.xlu1 %1717 }
0x19ae   :  { %3844 = vmatmul.mubr.msk.f32.vlgmr.msra.gmra.mxu0 %vm143_vm3, %v4698_v50 }
0x19af   :  { %3847 = vmatpush3.msra.mxu0 %v4432_v59  ;;  %3854 = vmatprep.mubr.msk.f32.mxu0 %vm4153_vm0, %v4152_v1 }
0x19b0   :  { %3848 = vmatprep.subr.mxu0 %v4152_v1 }
0x19b1   :  { %3849 = vmatpush3.msra.mxu0 %v4437_v60  ;;  %v1795_v59 = vpop.permute.xlu1 %1794 }
0x19b2   :  { %3850 = vmatprep.subr.mxu0 %v4152_v1  ;;  %v1796_v31 = vsel %vm143_vm3, %v1793_v30, %v1795_v59 }
0x19b3   :  { %3851 = vmatpush3.msra.mxu0 %v4444_v62 }
0x19b4   :  { %3852 = vmatprep.subr.mxu0 %v4152_v1 }
0x19b5   :  { %3853 = vmatpush3.msra.mxu0 %v4451_v63 }
0x19b6   :  { %2016 = vmatprep.subr.mxu0 %v4714_v51 }
0x1a6e   :  { %v1787_v53 = vpop.f32.mrf.mxu0 }
0x1a6f   :  { %v1788_v60 = vadd.f32 %v1787_v53, %v4424_v22 }
0x1a70   :  { %v3845_v32 = vpop.f32.mrf.mxu0 }
0x1a71   :  { %v1798_v62 = vadd.f32 %v1796_v31, %v1788_v60 }
0x1a73   :  { %v3569_v34 = vmul.f32 -1.442695, %v1798_v62 }
0x1a75   :  { %4028 = vpow2.f32 %v3569_v34 }
0x1a82   :  { %v4029_v35 = vpop.eup %4028 }
0x1a83   :  { %v1802_v63 = vadd.f32 1.0, %v4029_v35 }
0x1a85   :  { %4030 = vrcp.f32 %v1802_v63 }
0x1a92   :  { %v4031_v36 = vpop.eup %4030 }
0x1a93   :  { %v1808_v38 = vmul.f32 %v4031_v36, %v1806_v37  ;;  %v1815_v22 = vsub.f32 1.0, %v4031_v36  ;;  %v1821_v43 = vmul.f32 %v4031_v36, %v4650_v29  ;;  %v4734_v29 = vld [vmem:[%s5196_s1 + $0xe8] sm:$0xff]  ;;  %v4852_v37 = vld [vmem:[%s5196_s1 + $0x130] sm:$0xff] }
0x1a95   :  { %1810 = vrot.lane.b32.xlu1 %v1808_v38, %s4154_s0  ;;  %v4868_v38 = vld [vmem:[%s5196_s1 + $0x110] sm:$0xff] }
0x1b07   :  { %v1811_v39 = vpop.permute.xlu1 %1810 }
0x1b08   :  { %v1813_v40 = vadd.f32 %v1811_v39, %v1788_v60  ;;  %v4875_v39 = vld [vmem:[%s5196_s1 + $0x100] sm:$0xff] }
0x1b0a   :  { %4032 = vtanh.f32 %v1813_v40 }
0x1b17   :  { %v4033_v41 = vpop.eup %4032 }
0x1b18   :  { %1817 = vrot.lane.b32.xlu0 %v4033_v41, %s4156_s26 }
0x1b8a   :  { %v1818_v42 = vpop.permute.xlu0 %1817 }
0x1b8b   :  { %v1820_v8 = vmul.f32 %v1818_v42, %v1815_v22 }
0x1b8d   :  { %v1822_v54 = vadd.f32 %v1821_v43, %v1820_v8 }
0x1b8f   :  { %1824 = vrot.lane.b32.xlu1 %v1822_v54, %s4156_s26  ;;  %v4817_v24 = vsel %vm143_vm3, %v4698_v50, %v1822_v54 }
0x1c01   :  { %v1825_v0 = vpop.permute.xlu1 %1824 }
0x1c02   :  { %3855 = vmatmul.mubr.msk.f32.vlgmr.msra.gmra.mxu0 %vm143_vm3, %v1825_v0 }
0x1c03   :  { %2017 = vmatpush1.msra.mxu0 %v4727_v2  ;;  %2064 = vmatprep.mubr.f32.mxu0 %v4152_v1 }
0x1c04   :  { %2018 = vmatprep.subr.mxu0 %v4734_v29 }
0x1c05   :  { %2019 = vmatpush1.msra.mxu0 %v4740_v3 }
0x1c06   :  { %2020 = vmatprep.subr.mxu0 %v4746_v4 }
0x1c07   :  { %2021 = vmatpush1.msra.mxu0 %v4752_v5 }
0x1c08   :  { %2022 = vmatprep.subr.mxu0 %v4758_v6 }
0x1c09   :  { %2023 = vmatpush1.msra.mxu0 %v4764_v7 }
0x1c0a   :  { %2024 = vmatprep.subr.mxu0 %v4770_v10 }
0x1c0b   :  { %2025 = vmatpush1.msra.mxu0 %v4776_v18 }
0x1c0c   :  { %2026 = vmatprep.subr.mxu0 %v4782_v58 }
0x1c0d   :  { %2027 = vmatpush1.msra.mxu0 %v4788_v11 }
0x1c0e   :  { %2028 = vmatprep.subr.mxu0 %v4794_v16 }
0x1c0f   :  { %2029 = vmatpush1.msra.mxu0 %v4800_v20 }
0x1c10   :  { %2030 = vmatprep.subr.mxu0 %v4806_v21 }
0x1c11   :  { %2031 = vmatpush1.msra.mxu0 %v4812_v23 }
0x1c12   :  { %3573 = vmatmul.mubr.msk.f32.vlgmr.msra.gmra.mxu0 %vm463_vm5, %v4817_v24  ;;  %3886 = vmatprep.subr.mxu0 %v4152_v1 }
0x1c13   :  { %3887 = vmatpush3.msra.mxu0 %v4362_v55  ;;  %3890 = vmatprep.mubr.msk.f32.mxu0 %vm4153_vm0, %v4152_v1 }
0x1c14   :  { %3888 = vmatprep.subr.mxu0 %v4152_v1 }
0x1c15   :  { %3889 = vmatpush3.msra.mxu0 %v4365_v56 }
0x1c16   :  { %3893 = vmatprep.subr.mxu0 %v4152_v1 }
0x1cc2   :  { %v1894_v12 = vpop.f32.mrf.mxu0 }
0x1cc3   :  { %v1895_v25 = vadd.f32 %v1894_v12, %v4492_v9 }
0x1cc4   :  { %v3856_v26 = vpop.f32.mrf.mxu0 }
0x1cc5   :  { %v4829_v13 = vmax.f32 %v1895_v25, 0.0 }
0x1cc7   :  { %v1899_v28 = vsel %vm61_vm1, %v4829_v13, -inf }
0x1cc8   :  { %1900 = vmax.xlane.f32.xlu0 %v1899_v28 }
0x1cd2   :  { %v2066_v59 = vpop.f32.mrf.mxu0 }
0x1cd3   :  { %v2067_v53 = vadd.f32 %v2066_v59, %v4370_v57  ;;  %v4897_v59 = vld [vmem:[%s5196_s1 + $0x160] sm:$0xff] }
0x1cd4   :  { %v2068_v30 = vpop.f32.mrf.mxu0 }
0x1cd5   :  { %v2069_v60 = vadd.f32 %v2068_v30, %v4360_v52  ;;  %v4911_v30 = vld [vmem:[%s5196_s1 + $0x140] sm:$0xff] }
0x1d51   :  { %v1901_v15 = vpop.xlane.xlu0 %1900 }
0x1d52   :  { %vm1902_vm6 = vcmp.eq.f32.partialorder %v4829_v13, %v1901_v15 }
0x1d53   :  { %v1903_v27 = vsel %vm1902_vm6, %v4500_v19, 16 }
0x1d54   :  { %v1904_v46 = vsel %vm61_vm1, %v1903_v27, 2147483647 }
0x1d55   :  { %v1906_v47 = vshra.s32 %v1904_v46, 16  ;;  %v1905_v48 = vand.u32 65535, %v1904_v46 }
0x1d57   :  { %v1908_v44 = vcvt.s32.f32 %v1906_v47  ;;  %v1907_v9 = vcvt.s32.f32 %v1905_v48 }
0x1d59   :  { %1909 = vmin.xlane.f32.xlu1 %v1908_v44 }
0x1de2   :  { %v1910_v49 = vpop.xlane.xlu1 %1909 }
0x1de3   :  { %vm1911_vm7 = vcmp.eq.f32.partialorder %v1908_v44, %v1910_v49  ;;  %v1916_v31 = vcvt.f32.s32 %v1910_v49 }
0x1de4   :  { %v1912_v50 = vsel %vm1911_vm7, %v1907_v9, inf }
0x1de5   :  { %1913 = vmin.xlane.f32.xlu0 %v1912_v50  ;;  %v1917_v62 = vshll.u32 %v1916_v31, 16  ;;  %v4888_v50 = vld [vmem:[%s5196_s1 + $0x170] sm:$0xff] }
0x1dfb   :  { %2079 = vrot.lane.b32.xlu0 %v2067_v53, %s4154_s0 }
0x1dff   :  { %2095 = vrot.lane.b32.xlu0 %v4817_v24, %s4155_s25 }
0x1e03   :  { %2176 = vrot.lane.b32.xlu0 %v2067_v53, %s4155_s25 }
0x1e07   :  { %2189 = vrot.lane.b32.xlu0 %v2069_v60, %s4156_s26 }
0x1e6e   :  { %v1914_v32 = vpop.xlane.xlu0 %1913 }
0x1e6f   :  { %v1915_v34 = vcvt.f32.s32 %v1914_v32 }
0x1e71   :  { %v1918_v35 = vadd.s32 %v1917_v62, %v1915_v34  ;;  %v4918_v62 = vld [vmem:[%s5197_s2 + $0x4] ss:$0 sm:$0xff] }
0x1e72   :  { %v2080_v12 = vpop.permute.xlu0 %2079 }
0x1e73   :  { %vm1919_vm9 = vcmp.eq.s32.totalorder %v4500_v19, %v1918_v35  ;;  %v4845_v63 = vsel %vm3499_vm8, %v4679_v14, %v1918_v35  ;;  %v4861_v14 = vld [vmem:[%s5196_s1 + $0x120] sm:$0xff] }
0x1e74   :  { %v3571_v36 = vsel %vm1919_vm9, 1.0, %v4152_v1  ;;  %vm3505_vm9 = vcmask 48128  }
0x1e75   :  { %3862 = vmatmul.mubr.msk.f32.vlgmr.msra.gmra.mxu1 %vm61_vm1, %v3571_v36 }
0x1e76   :  { %3865 = vmatpush3.msra.mxu1 %v4852_v37  ;;  %3872 = vmatprep.mubr.msk.f32.mxu1 %vm4153_vm0, %v4152_v1  ;;  %v2096_v46 = vpop.permute.xlu0 %2095 }
0x1e77   :  { %3866 = vmatprep.subr.mxu1 %v4152_v1 }
0x1e78   :  { %3867 = vmatpush3.msra.mxu1 %v4861_v14 }
0x1e79   :  { %3868 = vmatprep.subr.mxu1 %v4152_v1 }
0x1e7a   :  { %3869 = vmatpush3.msra.mxu1 %v4868_v38  ;;  %v2177_v32 = vpop.permute.xlu0 %2176 }
0x1e7b   :  { %3870 = vmatprep.subr.mxu1 %v4152_v1 }
0x1e7c   :  { %3871 = vmatpush3.msra.mxu1 %v4875_v39 }
0x1e7d   :  { %3875 = vmatprep.subr.mxu1 %v4152_v1 }
0x1f35   :  { %v1991_v40 = vpop.f32.mrf.mxu1 }
0x1f36   :  { %v1992_v41 = vadd.f32 %v1991_v40, %v4377_v61 }
0x1f37   :  { %v3863_v22 = vpop.f32.mrf.mxu1 }
0x1f38   :  { %v2071_v42 = vadd.f32 %v2067_v53, %v1992_v41  ;;  %v4904_v53 = vld [vmem:[%s5196_s1 + $0x150] sm:$0xff] }
0x1f3a   :  { %v3574_v43 = vmul.f32 -1.442695, %v2071_v42 }
0x1f3c   :  { %4034 = vpow2.f32 %v3574_v43 }
0x1f49   :  { %v4035_v8 = vpop.eup %4034 }
0x1f4a   :  { %v2075_v54 = vadd.f32 1.0, %v4035_v8  ;;  %v2190_v8 = vpop.permute.xlu0 %2189 }
0x1f4c   :  { %4036 = vrcp.f32 %v2075_v54 }
0x1f59   :  { %v4037_v0 = vpop.eup %4036 }
0x1f5a   :  { %v2082_v25 = vmul.f32 %v4037_v0, %v2080_v12  ;;  %v2089_v27 = vsub.f32 1.0, %v4037_v0  ;;  %v2098_v44 = vmul.f32 %v4037_v0, %v2096_v46 }
0x1f5c   :  { %2084 = vrot.lane.b32.xlu1 %v2082_v25, %s4154_s0 }
0x1fce   :  { %v2085_v26 = vpop.permute.xlu1 %2084 }
0x1fcf   :  { %v2087_v28 = vadd.f32 %v2085_v26, %v1992_v41 }
0x1fd1   :  { %4038 = vtanh.f32 %v2087_v28 }
0x1fde   :  { %v4039_v15 = vpop.eup %4038 }
0x1fdf   :  { %2091 = vrot.lane.b32.xlu1 %v4039_v15, %s4156_s26 }
0x2051   :  { %v2092_v47 = vpop.permute.xlu1 %2091 }
0x2052   :  { %v2094_v48 = vmul.f32 %v2092_v47, %v2089_v27 }
0x2054   :  { %v2099_v49 = vadd.f32 %v2098_v44, %v2094_v48  ;;  %v4958_v48 = vld [vmem:[%s5197_s2 + $0x5] ss:$0 sm:$0xff]  ;;  %s4157_s2 = smov 16  }
0x2056   :  { %2101 = vrot.lane.b32.xlu1 %v2099_v49, %s4156_s26 }
0x205a   :  { %2178 = vrot.lane.b32.xlu1 %v2069_v60, %s4155_s25 }
0x20c8   :  { %v2102_v9 = vpop.permute.xlu1 %2101 }
0x20c9   :  { %3873 = vmatmul.mubr.msk.f32.vlgmr.msra.gmra.mxu1 %vm143_vm3, %v2102_v9 }
0x20ca   :  { %3876 = vmatpush3.msra.mxu1 %v4888_v50  ;;  %3883 = vmatprep.mubr.msk.f32.mxu1 %vm4153_vm0, %v4152_v1 }
0x20cb   :  { %3877 = vmatprep.subr.mxu1 %v4152_v1 }
0x20cc   :  { %3878 = vmatpush3.msra.mxu1 %v4897_v59  ;;  %v2179_v60 = vpop.permute.xlu1 %2178 }
0x20cd   :  { %3879 = vmatprep.subr.mxu1 %v4152_v1  ;;  %v2180_v35 = vsel %vm143_vm3, %v2177_v32, %v2179_v60 }
0x20ce   :  { %3880 = vmatpush3.msra.mxu1 %v4904_v53 }
0x20cf   :  { %3881 = vmatprep.subr.mxu1 %v4152_v1 }
0x20d0   :  { %3882 = vmatpush3.msra.mxu1 %v4911_v30 }
0x20d1   :  { %2400 = vmatprep.subr.mxu1 %v4714_v51 }
0x2189   :  { %v2171_v31 = vpop.f32.mrf.mxu1 }
0x218a   :  { %v2172_v34 = vadd.f32 %v4918_v62, %v2171_v31 }
0x218b   :  { %v3874_v36 = vpop.f32.mrf.mxu1 }
0x218c   :  { %v2182_v40 = vadd.f32 %v2180_v35, %v2172_v34 }
0x218e   :  { %v3576_v41 = vmul.f32 -1.442695, %v2182_v40 }
0x2190   :  { %4040 = vpow2.f32 %v3576_v41 }
0x219d   :  { %v4041_v22 = vpop.eup %4040 }
0x219e   :  { %v2186_v42 = vadd.f32 1.0, %v4041_v22 }
0x21a0   :  { %4042 = vrcp.f32 %v2186_v42 }
0x21ad   :  { %v4043_v43 = vpop.eup %4042 }
0x21ae   :  { %v2192_v54 = vmul.f32 %v4043_v43, %v2190_v8  ;;  %v2199_v26 = vsub.f32 1.0, %v4043_v43  ;;  %v2205_v15 = vmul.f32 %v4043_v43, %v4817_v24 }
0x21b0   :  { %2194 = vrot.lane.b32.xlu1 %v2192_v54, %s4154_s0 }
0x2222   :  { %v2195_v0 = vpop.permute.xlu1 %2194 }
0x2223   :  { %v2197_v12 = vadd.f32 %v2195_v0, %v2172_v34 }
0x2225   :  { %4044 = vtanh.f32 %v2197_v12 }
0x2232   :  { %v4045_v25 = vpop.eup %4044 }
0x2233   :  { %2201 = vrot.lane.b32.xlu0 %v4045_v25, %s4156_s26 }
0x22a5   :  { %v2202_v28 = vpop.permute.xlu0 %2201 }
0x22a6   :  { %v2204_v27 = vmul.f32 %v2202_v28, %v2199_v26 }
0x22a8   :  { %v2206_v46 = vadd.f32 %v2205_v15, %v2204_v27 }
0x22aa   :  { %2208 = vrot.lane.b32.xlu1 %v2206_v46, %s4156_s26  ;;  %v4944_v24 = vsel %vm143_vm3, %v2102_v9, %v2206_v46 }
0x231c   :  { %v2209_v47 = vpop.permute.xlu1 %2208 }
0x231d   :  { %3884 = vmatmul.mubr.msk.f32.vlgmr.msra.gmra.mxu1 %vm143_vm3, %v2209_v47 }
0x231e   :  { %2401 = vmatpush1.msra.mxu1 %v4727_v2  ;;  %2448 = vmatprep.mubr.f32.mxu1 %v4152_v1 }
0x231f   :  { %2402 = vmatprep.subr.mxu1 %v4734_v29 }
0x2320   :  { %2403 = vmatpush1.msra.mxu1 %v4740_v3 }
0x2321   :  { %2404 = vmatprep.subr.mxu1 %v4746_v4 }
0x2322   :  { %2405 = vmatpush1.msra.mxu1 %v4752_v5 }
0x2323   :  { %2406 = vmatprep.subr.mxu1 %v4758_v6 }
0x2324   :  { %2407 = vmatpush1.msra.mxu1 %v4764_v7 }
0x2325   :  { %2408 = vmatprep.subr.mxu1 %v4770_v10 }
0x2326   :  { %2409 = vmatpush1.msra.mxu1 %v4776_v18 }
0x2327   :  { %2410 = vmatprep.subr.mxu1 %v4782_v58 }
0x2328   :  { %2411 = vmatpush1.msra.mxu1 %v4788_v11 }
0x2329   :  { %2412 = vmatprep.subr.mxu1 %v4794_v16 }
0x232a   :  { %2413 = vmatpush1.msra.mxu1 %v4800_v20 }
0x232b   :  { %2414 = vmatprep.subr.mxu1 %v4806_v21 }
0x232c   :  { %2415 = vmatpush1.msra.mxu1 %v4812_v23 }
0x232d   :  { %3580 = vmatmul.mubr.msk.f32.vlgmr.msra.gmra.mxu1 %vm463_vm5, %v4944_v24  ;;  %3915 = vmatprep.subr.mxu1 %v4152_v1 }
0x232e   :  { %3916 = vmatpush3.msra.mxu1 %v4362_v55  ;;  %3919 = vmatprep.mubr.msk.f32.mxu1 %vm4153_vm0, %v4152_v1 }
0x232f   :  { %3917 = vmatprep.subr.mxu1 %v4152_v1 }
0x2330   :  { %3918 = vmatpush3.msra.mxu1 %v4365_v56 }
0x2331   :  { %3922 = vmatprep.subr.mxu1 %v4152_v1 }
0x23dd   :  { %v2278_v44 = vpop.f32.mrf.mxu1 }
0x23de   :  { %v2279_v49 = vadd.f32 %v4958_v48, %v2278_v44 }
0x23df   :  { %v3885_v9 = vpop.f32.mrf.mxu1 }
0x23e0   :  { %v4961_v60 = vmax.f32 %v2279_v49, 0.0 }
0x23e2   :  { %v2283_v31 = vsel %vm61_vm1, %v4961_v60, -inf }
0x23e3   :  { %2284 = vmax.xlane.f32.xlu0 %v2283_v31 }
0x23ed   :  { %v2450_v8 = vpop.f32.mrf.mxu1 }
0x23ee   :  { %v2451_v54 = vadd.f32 %v2450_v8, %v4370_v57 }
0x23ef   :  { %v2452_v0 = vpop.f32.mrf.mxu1 }
0x23f0   :  { %v2453_v12 = vadd.f32 %v2452_v0, %v4360_v52 }
0x246c   :  { %v2285_v32 = vpop.xlane.xlu0 %2284 }
0x246d   :  { %vm2286_vm10 = vcmp.eq.f32.partialorder %v4961_v60, %v2285_v32 }
0x246e   :  { %v2287_v34 = vsel %vm2286_vm10, %v4500_v19, 16 }
0x246f   :  { %v2288_v35 = vsel %vm61_vm1, %v2287_v34, 2147483647 }
0x2470   :  { %v2290_v36 = vshra.s32 %v2288_v35, 16  ;;  %v2289_v41 = vand.u32 65535, %v2288_v35 }
0x2472   :  { %v2292_v40 = vcvt.s32.f32 %v2290_v36  ;;  %v2291_v42 = vcvt.s32.f32 %v2289_v41 }
0x2474   :  { %2293 = vmin.xlane.f32.xlu1 %v2292_v40 }
0x24fd   :  { %v2294_v22 = vpop.xlane.xlu1 %2293 }
0x24fe   :  { %vm2295_vm11 = vcmp.eq.f32.partialorder %v2292_v40, %v2294_v22  ;;  %v2300_v25 = vcvt.f32.s32 %v2294_v22 }
0x24ff   :  { %v2296_v43 = vsel %vm2295_vm11, %v2291_v42, inf }
0x2500   :  { %2297 = vmin.xlane.f32.xlu0 %v2296_v43  ;;  %v2301_v28 = vshll.u32 %v2300_v25, 16 }
0x2516   :  { %2463 = vrot.lane.b32.xlu0 %v2451_v54, %s4154_s0 }
0x251a   :  { %2479 = vrot.lane.b32.xlu0 %v4944_v24, %s4155_s25 }
0x251e   :  { %2560 = vrot.lane.b32.xlu0 %v2451_v54, %s4155_s25 }
0x2522   :  { %2573 = vrot.lane.b32.xlu0 %v2453_v12, %s4156_s26 }
0x2589   :  { %v2298_v26 = vpop.xlane.xlu0 %2297 }
0x258a   :  { %v2299_v15 = vcvt.f32.s32 %v2298_v26 }
0x258c   :  { %v2302_v27 = vadd.s32 %v2301_v28, %v2299_v15 }
0x258d   :  { %v2464_v36 = vpop.permute.xlu0 %2463 }
0x258e   :  { %vm2303_vm13 = vcmp.eq.s32.totalorder %v4500_v19, %v2302_v27  ;;  %v4977_v46 = vsel %vm3501_vm12, %v4845_v63, %v2302_v27  ;;  %vm3485_vm12 = vcmask 392192  }
0x258f   :  { %v3578_v47 = vsel %vm2303_vm13, 1.0, %v4152_v1  ;;  %vm3488_vm13 = vcmask 654336  }
0x2590   :  { %3891 = vmatmul.mubr.msk.f32.vlgmr.msra.gmra.mxu0 %vm61_vm1, %v3578_v47 }
0x2591   :  { %3894 = vmatpush3.msra.mxu0 %v4852_v37  ;;  %3901 = vmatprep.mubr.msk.f32.mxu0 %vm4153_vm0, %v4152_v1  ;;  %v2480_v8 = vpop.permute.xlu0 %2479 }
0x2592   :  { %3895 = vmatprep.subr.mxu0 %v4152_v1 }
0x2593   :  { %3896 = vmatpush3.msra.mxu0 %v4861_v14 }
0x2594   :  { %3897 = vmatprep.subr.mxu0 %v4152_v1 }
0x2595   :  { %3898 = vmatpush3.msra.mxu0 %v4868_v38  ;;  %v2561_v27 = vpop.permute.xlu0 %2560 }
0x2596   :  { %3899 = vmatprep.subr.mxu0 %v4152_v1 }
0x2597   :  { %3900 = vmatpush3.msra.mxu0 %v4875_v39 }
0x2598   :  { %3904 = vmatprep.subr.mxu0 %v4152_v1 }
0x2650   :  { %v2375_v63 = vpop.f32.mrf.mxu0 }
0x2651   :  { %v2376_v44 = vadd.f32 %v2375_v63, %v4377_v61 }
0x2652   :  { %v3892_v49 = vpop.f32.mrf.mxu0 }
0x2653   :  { %v2455_v9 = vadd.f32 %v2451_v54, %v2376_v44 }
0x2655   :  { %v3581_v31 = vmul.f32 -1.442695, %v2455_v9 }
0x2657   :  { %4046 = vpow2.f32 %v3581_v31 }
0x2664   :  { %v4047_v32 = vpop.eup %4046 }
0x2665   :  { %v2459_v34 = vadd.f32 1.0, %v4047_v32 }
0x2667   :  { %4048 = vrcp.f32 %v2459_v34 }
0x2674   :  { %v4049_v35 = vpop.eup %4048 }
0x2675   :  { %v2466_v40 = vmul.f32 %v4049_v35, %v2464_v36  ;;  %v2473_v43 = vsub.f32 1.0, %v4049_v35  ;;  %v2482_v54 = vmul.f32 %v4049_v35, %v2480_v8  ;;  %v2574_v35 = vpop.permute.xlu0 %2573 }
0x2677   :  { %2468 = vrot.lane.b32.xlu1 %v2466_v40, %s4154_s0 }
0x26e9   :  { %v2469_v41 = vpop.permute.xlu1 %2468 }
0x26ea   :  { %v2471_v22 = vadd.f32 %v2469_v41, %v2376_v44 }
0x26ec   :  { %4050 = vtanh.f32 %v2471_v22 }
0x26f9   :  { %v4051_v42 = vpop.eup %4050 }
0x26fa   :  { %2475 = vrot.lane.b32.xlu1 %v4051_v42, %s4156_s26 }
0x276c   :  { %v2476_v0 = vpop.permute.xlu1 %2475 }
0x276d   :  { %v2478_v25 = vmul.f32 %v2476_v0, %v2473_v43 }
0x276f   :  { %v2483_v26 = vadd.f32 %v2482_v54, %v2478_v25 }
0x2771   :  { %2485 = vrot.lane.b32.xlu1 %v2483_v26, %s4156_s26 }
0x2775   :  { %2562 = vrot.lane.b32.xlu1 %v2453_v12, %s4155_s25 }
0x27e3   :  { %v2486_v28 = vpop.permute.xlu1 %2485 }
0x27e4   :  { %3902 = vmatmul.mubr.msk.f32.vlgmr.msra.gmra.mxu0 %vm143_vm3, %v2486_v28 }
0x27e5   :  { %3905 = vmatpush3.msra.mxu0 %v4888_v50  ;;  %3912 = vmatprep.mubr.msk.f32.mxu0 %vm4153_vm0, %v4152_v1 }
0x27e6   :  { %3906 = vmatprep.subr.mxu0 %v4152_v1 }
0x27e7   :  { %3907 = vmatpush3.msra.mxu0 %v4897_v59  ;;  %v2563_v12 = vpop.permute.xlu1 %2562 }
0x27e8   :  { %3908 = vmatprep.subr.mxu0 %v4152_v1  ;;  %v2564_v63 = vsel %vm143_vm3, %v2561_v27, %v2563_v12 }
0x27e9   :  { %3909 = vmatpush3.msra.mxu0 %v4904_v53 }
0x27ea   :  { %3910 = vmatprep.subr.mxu0 %v4152_v1 }
0x27eb   :  { %3911 = vmatpush3.msra.mxu0 %v4911_v30 }
0x27ec   :  { %2784 = vmatprep.subr.mxu0 %v4714_v51 }
0x28a4   :  { %v2555_v15 = vpop.f32.mrf.mxu0 }
0x28a5   :  { %v2556_v47 = vadd.f32 %v4918_v62, %v2555_v15 }
0x28a6   :  { %v3903_v44 = vpop.f32.mrf.mxu0 }
0x28a7   :  { %v2566_v49 = vadd.f32 %v2564_v63, %v2556_v47 }
0x28a9   :  { %v3583_v9 = vmul.f32 -1.442695, %v2566_v49 }
0x28ab   :  { %4052 = vpow2.f32 %v3583_v9 }
0x28b8   :  { %v4053_v31 = vpop.eup %4052 }
0x28b9   :  { %v2570_v32 = vadd.f32 1.0, %v4053_v31 }
0x28bb   :  { %4054 = vrcp.f32 %v2570_v32 }
0x28c8   :  { %v4055_v34 = vpop.eup %4054 }
0x28c9   :  { %v2576_v36 = vmul.f32 %v4055_v34, %v2574_v35  ;;  %v2583_v42 = vsub.f32 1.0, %v4055_v34  ;;  %v2589_v8 = vmul.f32 %v4055_v34, %v4944_v24 }
0x28cb   :  { %2578 = vrot.lane.b32.xlu1 %v2576_v36, %s4154_s0 }
0x293d   :  { %v2579_v40 = vpop.permute.xlu1 %2578 }
0x293e   :  { %v2581_v41 = vadd.f32 %v2579_v40, %v2556_v47 }
0x2940   :  { %4056 = vtanh.f32 %v2581_v41 }
0x294d   :  { %v4057_v22 = vpop.eup %4056 }
0x294e   :  { %2585 = vrot.lane.b32.xlu0 %v4057_v22, %s4156_s26 }
0x29c0   :  { %v2586_v43 = vpop.permute.xlu0 %2585 }
0x29c1   :  { %v2588_v0 = vmul.f32 %v2586_v43, %v2583_v42 }
0x29c3   :  { %v2590_v54 = vadd.f32 %v2589_v8, %v2588_v0 }
0x29c5   :  { %2592 = vrot.lane.b32.xlu1 %v2590_v54, %s4156_s26  ;;  %v5031_v24 = vsel %vm143_vm3, %v2486_v28, %v2590_v54 }
0x2a37   :  { %v2593_v25 = vpop.permute.xlu1 %2592 }
0x2a38   :  { %3913 = vmatmul.mubr.msk.f32.vlgmr.msra.gmra.mxu0 %vm143_vm3, %v2593_v25 }
0x2a39   :  { %2785 = vmatpush1.msra.mxu0 %v4727_v2  ;;  %2832 = vmatprep.mubr.f32.mxu0 %v4152_v1 }
0x2a3a   :  { %2786 = vmatprep.subr.mxu0 %v4734_v29 }
0x2a3b   :  { %2787 = vmatpush1.msra.mxu0 %v4740_v3 }
0x2a3c   :  { %2788 = vmatprep.subr.mxu0 %v4746_v4 }
0x2a3d   :  { %2789 = vmatpush1.msra.mxu0 %v4752_v5 }
0x2a3e   :  { %2790 = vmatprep.subr.mxu0 %v4758_v6 }
0x2a3f   :  { %2791 = vmatpush1.msra.mxu0 %v4764_v7 }
0x2a40   :  { %2792 = vmatprep.subr.mxu0 %v4770_v10 }
0x2a41   :  { %2793 = vmatpush1.msra.mxu0 %v4776_v18 }
0x2a42   :  { %2794 = vmatprep.subr.mxu0 %v4782_v58 }
0x2a43   :  { %2795 = vmatpush1.msra.mxu0 %v4788_v11 }
0x2a44   :  { %2796 = vmatprep.subr.mxu0 %v4794_v16 }
0x2a45   :  { %2797 = vmatpush1.msra.mxu0 %v4800_v20 }
0x2a46   :  { %2798 = vmatprep.subr.mxu0 %v4806_v21 }
0x2a47   :  { %2799 = vmatpush1.msra.mxu0 %v4812_v23 }
0x2a48   :  { %3587 = vmatmul.mubr.msk.f32.vlgmr.msra.gmra.mxu0 %vm463_vm5, %v5031_v24  ;;  %3944 = vmatprep.subr.mxu0 %v4152_v1 }
0x2a49   :  { %3945 = vmatpush3.msra.mxu0 %v4362_v55  ;;  %3948 = vmatprep.mubr.msk.f32.mxu0 %vm4153_vm0, %v4152_v1 }
0x2a4a   :  { %3946 = vmatprep.subr.mxu0 %v4152_v1 }
0x2a4b   :  { %3947 = vmatpush3.msra.mxu0 %v4365_v56 }
0x2a4c   :  { %3951 = vmatprep.subr.mxu0 %v4152_v1 }
0x2af8   :  { %v2662_v26 = vpop.f32.mrf.mxu0 }
0x2af9   :  { %v2663_v28 = vadd.f32 %v4958_v48, %v2662_v26 }
0x2afa   :  { %v3914_v12 = vpop.f32.mrf.mxu0 }
0x2afb   :  { %v5043_v15 = vmax.f32 %v2663_v28, 0.0 }
0x2afd   :  { %v2667_v27 = vsel %vm61_vm1, %v5043_v15, -inf }
0x2afe   :  { %2668 = vmax.xlane.f32.xlu0 %v2667_v27 }
0x2b08   :  { %v2834_v34 = vpop.f32.mrf.mxu0 }
0x2b09   :  { %v2835_v35 = vadd.f32 %v2834_v34, %v4370_v57 }
0x2b0a   :  { %v2836_v36 = vpop.f32.mrf.mxu0 }
0x2b0b   :  { %v2837_v40 = vadd.f32 %v2836_v36, %v4360_v52 }
0x2b87   :  { %v2669_v55 = vpop.xlane.xlu0 %2668 }
0x2b88   :  { %vm2670_vm14 = vcmp.eq.f32.partialorder %v5043_v15, %v2669_v55 }
0x2b89   :  { %v2671_v47 = vsel %vm2670_vm14, %v4500_v19, 16  ;;  %vm3490_vm14 = vcmask 785408  }
0x2b8a   :  { %v2672_v63 = vsel %vm61_vm1, %v2671_v47, 2147483647 }
0x2b8b   :  { %v2674_v56 = vshra.s32 %v2672_v63, 16  ;;  %v2673_v49 = vand.u32 65535, %v2672_v63 }
0x2b8d   :  { %v2676_v44 = vcvt.s32.f32 %v2674_v56  ;;  %v2675_v31 = vcvt.s32.f32 %v2673_v49 }
0x2b8f   :  { %2677 = vmin.xlane.f32.xlu1 %v2676_v44 }
0x2c18   :  { %v2678_v9 = vpop.xlane.xlu1 %2677 }
0x2c19   :  { %vm2679_vm15 = vcmp.eq.f32.partialorder %v2676_v44, %v2678_v9  ;;  %v2684_v41 = vcvt.f32.s32 %v2678_v9 }
0x2c1a   :  { %v2680_v32 = vsel %vm2679_vm15, %v2675_v31, inf  ;;  %vm3507_vm15 = vcmask 56320  }
0x2c1b   :  { %2681 = vmin.xlane.f32.xlu0 %v2680_v32  ;;  %v2685_v42 = vshll.u32 %v2684_v41, 16 }
0x2c31   :  { %2847 = vrot.lane.b32.xlu0 %v2835_v35, %s4154_s0 }
0x2c35   :  { %2863 = vrot.lane.b32.xlu0 %v5031_v24, %s4155_s25 }
0x2c39   :  { %2944 = vrot.lane.b32.xlu0 %v2835_v35, %s4155_s25 }
0x2c3d   :  { %2957 = vrot.lane.b32.xlu0 %v2837_v40, %s4156_s26 }
0x2ca4   :  { %v2682_v22 = vpop.xlane.xlu0 %2681 }
0x2ca5   :  { %v2683_v43 = vcvt.f32.s32 %v2682_v22 }
0x2ca7   :  { %v2686_v8 = vadd.s32 %v2685_v42, %v2683_v43 }
0x2ca8   :  { %v2848_v63 = vpop.permute.xlu0 %2847 }
0x2ca9   :  { %vm2687_vm6 = vcmp.eq.s32.totalorder %v4500_v19, %v2686_v8  ;;  %v5059_v0 = vsel %vm3503_vm2, %v4977_v46, %v2686_v8  ;;  %vm3492_vm2 = vcmask 916480  }
0x2caa   :  { %v3585_v54 = vsel %vm2687_vm6, 1.0, %v4152_v1 }
0x2cab   :  { %3920 = vmatmul.mubr.msk.f32.vlgmr.msra.gmra.mxu1 %vm61_vm1, %v3585_v54 }
0x2cac   :  { %3923 = vmatpush3.msra.mxu1 %v4852_v37  ;;  %3930 = vmatprep.mubr.msk.f32.mxu1 %vm4153_vm0, %v4152_v1  ;;  %v2864_v32 = vpop.permute.xlu0 %2863 }
0x2cad   :  { %3924 = vmatprep.subr.mxu1 %v4152_v1 }
0x2cae   :  { %3925 = vmatpush3.msra.mxu1 %v4861_v14 }
0x2caf   :  { %3926 = vmatprep.subr.mxu1 %v4152_v1 }
0x2cb0   :  { %3927 = vmatpush3.msra.mxu1 %v4868_v38  ;;  %v2945_v43 = vpop.permute.xlu0 %2944 }
0x2cb1   :  { %3928 = vmatprep.subr.mxu1 %v4152_v1 }
0x2cb2   :  { %3929 = vmatpush3.msra.mxu1 %v4875_v39 }
0x2cb3   :  { %3933 = vmatprep.subr.mxu1 %v4152_v1 }
0x2d6b   :  { %v2759_v46 = vpop.f32.mrf.mxu1 }
0x2d6c   :  { %v2760_v25 = vadd.f32 %v2759_v46, %v4377_v61 }
0x2d6d   :  { %v3921_v26 = vpop.f32.mrf.mxu1 }
0x2d6e   :  { %v2839_v28 = vadd.f32 %v2835_v35, %v2760_v25 }
0x2d70   :  { %v3588_v12 = vmul.f32 -1.442695, %v2839_v28 }
0x2d72   :  { %4058 = vpow2.f32 %v3588_v12 }
0x2d7f   :  { %v4059_v27 = vpop.eup %4058 }
0x2d80   :  { %v2843_v55 = vadd.f32 1.0, %v4059_v27 }
0x2d82   :  { %4060 = vrcp.f32 %v2843_v55  ;;  %v2958_v55 = vpop.permute.xlu0 %2957 }
0x2d8f   :  { %v4061_v47 = vpop.eup %4060 }
0x2d90   :  { %v2850_v56 = vmul.f32 %v4061_v47, %v2848_v63  ;;  %v2857_v31 = vsub.f32 1.0, %v4061_v47  ;;  %v2866_v35 = vmul.f32 %v4061_v47, %v2864_v32 }
0x2d92   :  { %2852 = vrot.lane.b32.xlu1 %v2850_v56, %s4154_s0 }
0x2e04   :  { %v2853_v44 = vpop.permute.xlu1 %2852 }
0x2e05   :  { %v2855_v49 = vadd.f32 %v2853_v44, %v2760_v25 }
0x2e07   :  { %4062 = vtanh.f32 %v2855_v49 }
0x2e14   :  { %v4063_v9 = vpop.eup %4062 }
0x2e15   :  { %2859 = vrot.lane.b32.xlu1 %v4063_v9, %s4156_s26 }
0x2e87   :  { %v2860_v34 = vpop.permute.xlu1 %2859 }
0x2e88   :  { %v2862_v36 = vmul.f32 %v2860_v34, %v2857_v31 }
0x2e8a   :  { %v2867_v41 = vadd.f32 %v2866_v35, %v2862_v36 }
0x2e8c   :  { %2869 = vrot.lane.b32.xlu1 %v2867_v41, %s4156_s26 }
0x2e90   :  { %2946 = vrot.lane.b32.xlu1 %v2837_v40, %s4155_s25 }
0x2efe   :  { %v2870_v22 = vpop.permute.xlu1 %2869 }
0x2eff   :  { %3931 = vmatmul.mubr.msk.f32.vlgmr.msra.gmra.mxu1 %vm143_vm3, %v2870_v22 }
0x2f00   :  { %3934 = vmatpush3.msra.mxu1 %v4888_v50  ;;  %3941 = vmatprep.mubr.msk.f32.mxu1 %vm4153_vm0, %v4152_v1 }
0x2f01   :  { %3935 = vmatprep.subr.mxu1 %v4152_v1 }
0x2f02   :  { %3936 = vmatpush3.msra.mxu1 %v4897_v59  ;;  %v2947_v40 = vpop.permute.xlu1 %2946 }
0x2f03   :  { %3937 = vmatprep.subr.mxu1 %v4152_v1  ;;  %v2948_v54 = vsel %vm143_vm3, %v2945_v43, %v2947_v40 }
0x2f04   :  { %3938 = vmatpush3.msra.mxu1 %v4904_v53 }
0x2f05   :  { %3939 = vmatprep.subr.mxu1 %v4152_v1 }
0x2f06   :  { %3940 = vmatpush3.msra.mxu1 %v4911_v30 }
0x2f07   :  { %3168 = vmatprep.subr.mxu1 %v4714_v51 }
0x2fbf   :  { %v2939_v42 = vpop.f32.mrf.mxu1 }
0x2fc0   :  { %v2940_v8 = vadd.f32 %v4918_v62, %v2939_v42 }
0x2fc1   :  { %v3932_v46 = vpop.f32.mrf.mxu1 }
0x2fc2   :  { %v2950_v25 = vadd.f32 %v2948_v54, %v2940_v8 }
0x2fc4   :  { %v3590_v26 = vmul.f32 -1.442695, %v2950_v25 }
0x2fc6   :  { %4064 = vpow2.f32 %v3590_v26 }
0x2fd3   :  { %v4065_v28 = vpop.eup %4064 }
0x2fd4   :  { %v2954_v12 = vadd.f32 1.0, %v4065_v28 }
0x2fd6   :  { %4066 = vrcp.f32 %v2954_v12 }
0x2fe3   :  { %v4067_v27 = vpop.eup %4066 }
0x2fe4   :  { %v2960_v47 = vmul.f32 %v4067_v27, %v2958_v55  ;;  %v2967_v44 = vsub.f32 1.0, %v4067_v27  ;;  %v2973_v9 = vmul.f32 %v4067_v27, %v5031_v24 }
0x2fe6   :  { %2962 = vrot.lane.b32.xlu1 %v2960_v47, %s4154_s0 }
0x3058   :  { %v2963_v51 = vpop.permute.xlu1 %2962 }
0x3059   :  { %v2965_v63 = vadd.f32 %v2963_v51, %v2940_v8 }
0x305b   :  { %4068 = vtanh.f32 %v2965_v63 }
0x3068   :  { %v4069_v56 = vpop.eup %4068 }
0x3069   :  { %2969 = vrot.lane.b32.xlu0 %v4069_v56, %s4156_s26 }
0x30db   :  { %v2970_v49 = vpop.permute.xlu0 %2969 }
0x30dc   :  { %v2972_v31 = vmul.f32 %v2970_v49, %v2967_v44 }
0x30de   :  { %v2974_v32 = vadd.f32 %v2973_v9, %v2972_v31 }
0x30e0   :  { %2976 = vrot.lane.b32.xlu1 %v2974_v32, %s4156_s26 }
0x3152   :  { %v2977_v34 = vpop.permute.xlu1 %2976 }
0x3153   :  { %3942 = vmatmul.mubr.msk.f32.vlgmr.msra.gmra.mxu1 %vm143_vm3, %v2977_v34 }
0x3154   :  { %3169 = vmatpush1.msra.mxu1 %v4727_v2  ;;  %3216 = vmatprep.mubr.f32.mxu1 %v4152_v1  ;;  %v5113_v2 = vsel %vm143_vm3, %v2870_v22, %v2974_v32 }
0x3155   :  { %3170 = vmatprep.subr.mxu1 %v4734_v29 }
0x3156   :  { %3171 = vmatpush1.msra.mxu1 %v4740_v3 }
0x3157   :  { %3172 = vmatprep.subr.mxu1 %v4746_v4 }
0x3158   :  { %3173 = vmatpush1.msra.mxu1 %v4752_v5 }
0x3159   :  { %3174 = vmatprep.subr.mxu1 %v4758_v6 }
0x315a   :  { %3175 = vmatpush1.msra.mxu1 %v4764_v7 }
0x315b   :  { %3176 = vmatprep.subr.mxu1 %v4770_v10 }
0x315c   :  { %3177 = vmatpush1.msra.mxu1 %v4776_v18 }
0x315d   :  { %3178 = vmatprep.subr.mxu1 %v4782_v58 }
0x315e   :  { %3179 = vmatpush1.msra.mxu1 %v4788_v11 }
0x315f   :  { %3180 = vmatprep.subr.mxu1 %v4794_v16 }
0x3160   :  { %3181 = vmatpush1.msra.mxu1 %v4800_v20 }
0x3161   :  { %3182 = vmatprep.subr.mxu1 %v4806_v21 }
0x3162   :  { %3183 = vmatpush1.msra.mxu1 %v4812_v23 }
0x3163   :  { %3594 = vmatmul.mubr.msk.f32.vlgmr.msra.gmra.mxu1 %vm463_vm5, %v5113_v2 }
0x3213   :  { %v3046_v29 = vpop.f32.mrf.mxu1 }
0x3214   :  { %v3047_v3 = vadd.f32 %v4958_v48, %v3046_v29 }
0x3215   :  { %v3943_v4 = vpop.f32.mrf.mxu1 }
0x3216   :  { %v5118_v5 = vmax.f32 %v3047_v3, 0.0 }
0x3218   :  { %v3051_v6 = vsel %vm61_vm1, %v5118_v5, -inf }
0x3219   :  { %3052 = vmax.xlane.f32.xlu0 %v3051_v6 }
0x3223   :  { %v3218_v24 = vpop.f32.mrf.mxu1 }
0x3224   :  { %v3219_v35 = vadd.f32 %v3218_v24, %v4370_v57 }
0x3225   :  { %v3220_v36 = vpop.f32.mrf.mxu1 }
0x3226   :  { %v3221_v41 = vadd.f32 %v3220_v36, %v4360_v52 }
0x32a2   :  { %v3053_v7 = vpop.xlane.xlu0 %3052 }
0x32a3   :  { %vm3054_vm7 = vcmp.eq.f32.partialorder %v5118_v5, %v3053_v7 }
0x32a4   :  { %v3055_v10 = vsel %vm3054_vm7, %v4500_v19, 16 }
0x32a5   :  { %v3056_v18 = vsel %vm61_vm1, %v3055_v10, 2147483647 }
0x32a6   :  { %v3058_v58 = vshra.s32 %v3056_v18, 16  ;;  %v3057_v16 = vand.u32 65535, %v3056_v18 }
0x32a8   :  { %v3060_v11 = vcvt.s32.f32 %v3058_v58  ;;  %v3059_v21 = vcvt.s32.f32 %v3057_v16 }
0x32aa   :  { %3061 = vmin.xlane.f32.xlu1 %v3060_v11 }
0x3333   :  { %v3062_v20 = vpop.xlane.xlu1 %3061 }
0x3334   :  { %vm3063_vm8 = vcmp.eq.f32.partialorder %v3060_v11, %v3062_v20  ;;  %v3068_v22 = vcvt.f32.s32 %v3062_v20 }
0x3335   :  { %v3064_v23 = vsel %vm3063_vm8, %v3059_v21, inf }
0x3336   :  { %3065 = vmin.xlane.f32.xlu0 %v3064_v23  ;;  %v3069_v42 = vshll.u32 %v3068_v22, 16 }
0x334c   :  { %3231 = vrot.lane.b32.xlu0 %v3219_v35, %s4154_s0 }
0x3350   :  { %3247 = vrot.lane.b32.xlu0 %v5113_v2, %s4155_s25 }
0x3354   :  { %3328 = vrot.lane.b32.xlu0 %v3219_v35, %s4155_s25 }
0x3358   :  { %3341 = vrot.lane.b32.xlu0 %v3221_v41, %s4156_s26 }
0x33bf   :  { %v3066_v40 = vpop.xlane.xlu0 %3065 }
0x33c0   :  { %v3067_v43 = vcvt.f32.s32 %v3066_v40 }
0x33c2   :  { %v3070_v8 = vadd.s32 %v3069_v42, %v3067_v43 }
0x33c3   :  { %v3232_v12 = vpop.permute.xlu0 %3231 }
0x33c4   :  { %vm3071_vm10 = vcmp.eq.s32.totalorder %v4500_v19, %v3070_v8  ;;  %v5134_v57 = vsel %vm3505_vm9, %v5059_v0, %v3070_v8 }
0x33c5   :  { %v3592_v54 = vsel %vm3071_vm10, 1.0, %v4152_v1 }
0x33c6   :  { %3949 = vmatmul.mubr.msk.f32.vlgmr.msra.gmra.mxu0 %vm61_vm1, %v3592_v54 }
0x33c7   :  { %3952 = vmatpush3.msra.mxu0 %v4852_v37  ;;  %3959 = vmatprep.mubr.msk.f32.mxu0 %vm4153_vm0, %v4152_v1 }
0x33c8   :  { %3953 = vmatprep.subr.mxu0 %v4152_v1 }
0x33c9   :  { %3954 = vmatpush3.msra.mxu0 %v4861_v14 }
0x33ca   :  { %3955 = vmatprep.subr.mxu0 %v4152_v1 }
0x33cb   :  { %3956 = vmatpush3.msra.mxu0 %v4868_v38 }
0x33cc   :  { %3957 = vmatprep.subr.mxu0 %v4152_v1 }
0x33cd   :  { %3958 = vmatpush3.msra.mxu0 %v4875_v39 }
0x33ce   :  { %3962 = vmatprep.subr.mxu0 %v4152_v1 }
0x3486   :  { %v3143_v52 = vpop.f32.mrf.mxu0 }
0x3487   :  { %v3144_v37 = vadd.f32 %v3143_v52, %v4377_v61  ;;  %v3248_v61 = vpop.permute.xlu0 %3247 }
0x3488   :  { %v3950_v0 = vpop.f32.mrf.mxu0 }
0x3489   :  { %v3223_v46 = vadd.f32 %v3219_v35, %v3144_v37 }
0x348b   :  { %v3595_v25 = vmul.f32 -1.442695, %v3223_v46  ;;  %v3329_v32 = vpop.permute.xlu0 %3328 }
0x348d   :  { %4070 = vpow2.f32 %v3595_v25 }
0x349a   :  { %v4071_v26 = vpop.eup %4070 }
0x349b   :  { %v3227_v28 = vadd.f32 1.0, %v4071_v26 }
0x349d   :  { %4072 = vrcp.f32 %v3227_v28 }
0x34aa   :  { %v4073_v14 = vpop.eup %4072 }
0x34ab   :  { %v3234_v27 = vmul.f32 %v4073_v14, %v3232_v12  ;;  %v3241_v47 = vsub.f32 1.0, %v4073_v14  ;;  %v3250_v63 = vmul.f32 %v4073_v14, %v3248_v61 }
0x34ad   :  { %3236 = vrot.lane.b32.xlu1 %v3234_v27, %s4154_s0 }
0x351f   :  { %v3237_v38 = vpop.permute.xlu1 %3236 }
0x3520   :  { %v3239_v55 = vadd.f32 %v3237_v38, %v3144_v37 }
0x3522   :  { %4074 = vtanh.f32 %v3239_v55 }
0x352f   :  { %v4075_v39 = vpop.eup %4074 }
0x3530   :  { %3243 = vrot.lane.b32.xlu1 %v4075_v39, %s4156_s26 }
0x35a2   :  { %v3244_v51 = vpop.permute.xlu1 %3243 }
0x35a3   :  { %v3246_v56 = vmul.f32 %v3244_v51, %v3241_v47 }
0x35a5   :  { %v3251_v44 = vadd.f32 %v3250_v63, %v3246_v56 }
0x35a7   :  { %3253 = vrot.lane.b32.xlu1 %v3251_v44, %s4156_s26 }
0x35ab   :  { %3330 = vrot.lane.b32.xlu1 %v3221_v41, %s4155_s25 }
0x3619   :  { %v3254_v49 = vpop.permute.xlu1 %3253 }
0x361a   :  { %3960 = vmatmul.mubr.msk.f32.vlgmr.msra.gmra.mxu0 %vm143_vm3, %v3254_v49 }
0x361b   :  { %3963 = vmatpush3.msra.mxu0 %v4888_v50  ;;  %3970 = vmatprep.mubr.msk.f32.mxu0 %vm4153_vm0, %v4152_v1 }
0x361c   :  { %3964 = vmatprep.subr.mxu0 %v4152_v1 }
0x361d   :  { %3965 = vmatpush3.msra.mxu0 %v4897_v59  ;;  %v3331_v9 = vpop.permute.xlu1 %3330 }
0x361e   :  { %3966 = vmatprep.subr.mxu0 %v4152_v1  ;;  %v3332_v34 = vsel %vm143_vm3, %v3329_v32, %v3331_v9 }
0x361f   :  { %3967 = vmatpush3.msra.mxu0 %v4904_v53  ;;  %v3342_v53 = vpop.permute.xlu0 %3341 }
0x3620   :  { %3968 = vmatprep.subr.mxu0 %v4152_v1 }
0x3621   :  { %3969 = vmatpush3.msra.mxu0 %v4911_v30 }
0x36da   :  { %v3323_v31 = vpop.f32.mrf.mxu0 }
0x36db   :  { %v3324_v50 = vadd.f32 %v4918_v62, %v3323_v31 }
0x36dc   :  { %v3961_v29 = vpop.f32.mrf.mxu0 }
0x36dd   :  { %v3334_v3 = vadd.f32 %v3332_v34, %v3324_v50 }
0x36df   :  { %v3597_v4 = vmul.f32 -1.442695, %v3334_v3 }
0x36e1   :  { %4076 = vpow2.f32 %v3597_v4 }
0x36ee   :  { %v4077_v59 = vpop.eup %4076 }
0x36ef   :  { %v3338_v6 = vadd.f32 1.0, %v4077_v59 }
0x36f1   :  { %4078 = vrcp.f32 %v3338_v6 }
0x36fe   :  { %v4079_v7 = vpop.eup %4078 }
0x36ff   :  { %v3344_v10 = vmul.f32 %v4079_v7, %v3342_v53  ;;  %v3351_v62 = vsub.f32 1.0, %v4079_v7  ;;  %v3357_v11 = vmul.f32 %v4079_v7, %v5113_v2 }
0x3701   :  { %3346 = vrot.lane.b32.xlu1 %v3344_v10, %s4154_s0 }
0x3773   :  { %v3347_v1 = vpop.permute.xlu1 %3346 }
0x3774   :  { %v3349_v30 = vadd.f32 %v3347_v1, %v3324_v50 }
0x3776   :  { %4080 = vtanh.f32 %v3349_v30 }
0x3783   :  { %v4081_v18 = vpop.eup %4080 }
0x3784   :  { %3353 = vrot.lane.b32.xlu0 %v4081_v18, %s4156_s26 }
0x37f6   :  { %v3354_v58 = vpop.permute.xlu0 %3353 }
0x37f7   :  { %v3356_v16 = vmul.f32 %v3354_v58, %v3351_v62 }
0x37f9   :  { %v3358_v20 = vadd.f32 %v3357_v11, %v3356_v16 }
0x37fb   :  { %3360 = vrot.lane.b32.xlu1 %v3358_v20, %s4156_s26 }
0x386d   :  { %v3361_v21 = vpop.permute.xlu1 %3360 }
0x386e   :  { %3971 = vmatmul.mubr.msk.f32.vlgmr.msra.gmra.mxu0 %vm143_vm3, %v3361_v21 }
0x392e   :  { %v3430_v23 = vpop.f32.mrf.mxu0 }
0x392f   :  { %v3431_v24 = vadd.f32 %v4958_v48, %v3430_v23 }
0x3930   :  { %v3972_v35 = vpop.f32.mrf.mxu0 }
0x3931   :  { %v3434_v36 = vmax.f32 %v3431_v24, 0.0 }
0x3933   :  { %v3435_v41 = vsel %vm61_vm1, %v3434_v36, -inf }
0x3934   :  { %3436 = vmax.xlane.f32.xlu0 %v3435_v41 }
0x394a   :  { %3456 = vrot.lane.b32.xlu0 %v4580_v45, %s4157_s2 }
0x394e   :  { %3468 = vrot.lane.b32.xlu0 %v4961_v60, %s4154_s0  ;;  %s4161_s0 = smov [#allocation4]  }
0x39bd   :  { %v3437_v2 = vpop.xlane.xlu0 %3436 }
0x39be   :  { %vm3438_vm0 = vcmp.eq.f32.partialorder %v3434_v36, %v3437_v2 }
0x39bf   :  { %v3439_v22 = vsel %vm3438_vm0, %v4500_v19, 16 }
0x39c0   :  { %v3440_v40 = vsel %vm61_vm1, %v3439_v22, 2147483647 }
0x39c1   :  { %v3442_v42 = vshra.s32 %v3440_v40, 16  ;;  %v3441_v45 = vand.u32 65535, %v3440_v40  ;;  %v3457_v54 = vpop.permute.xlu0 %3456 }
0x39c3   :  { %v3444_v43 = vcvt.s32.f32 %v3442_v42  ;;  %v3443_v60 = vcvt.s32.f32 %v3441_v45 }
0x39c5   :  { %3445 = vmin.xlane.f32.xlu1 %v3444_v43  ;;  %v3469_v52 = vpop.permute.xlu0 %3468 }
0x39d6   :  { %3460 = vrot.lane.b32.xlu1 %v4662_v33, %s4155_s25  ;;  %s3526_s25 = sshll.u32 %s4161_s0, 4  ;;  %s3527_s25 = int_to_ptr.vmem [resolvable:$true] %s3526_s25 }
0x39d7   :  { %s4108_s30 = scalar_lea.vmem %s3527_s25, 128  ;;  %p4113_p1 = scmp.lt.s32.totalorder %s3527_s25, %s3527_s25 }
0x39d8   :  { %p4109_p0 = scmp.ne.s32.totalorder %s3527_s25, %s4108_s30  ;;  %p4114_p2 = scmp.lt.s32.totalorder %s4108_s30, %s4108_s30 }
0x39da   :  { %3464 = vrot.lane.b32.xlu1 %v4829_v13, %s4158_s24  ;;  %v3483_v13 = vsel %vm61_vm1, %v4495_v17, %v3457_v54  ;;  %p4115_p3 = por %p4114_p2, %p4113_p1 }
0x39dc   :  { %p4116_p4 = pnand %p4115_p3, %p4109_p0 }
0x39de   :  { %3472 = vrot.lane.b32.xlu1 %v5043_v15, %s4159_s27 }
0x39e2   :  { %3480 = vrot.lane.b32.xlu1 %v3434_v36, %s4160_s28 }
0x3a4e   :  { %v3446_v48 = vpop.xlane.xlu1 %3445 }
0x3a4f   :  { %vm3447_vm11 = vcmp.eq.f32.partialorder %v3444_v43, %v3446_v48  ;;  %v3452_v37 = vcvt.f32.s32 %v3446_v48 }
0x3a50   :  { %v3448_v19 = vsel %vm3447_vm11, %v3443_v60, inf }
0x3a51   :  { %3449 = vmin.xlane.f32.xlu0 %v3448_v19  ;;  %v3453_v26 = vshll.u32 %v3452_v37, 16 }
0x3a52   :  { %v3461_v8 = vpop.permute.xlu1 %3460 }
0x3a53   :  { %v3484_v15 = vsel %vm143_vm3, %v3483_v13, %v3461_v8 }
0x3a56   :  { %v3465_v33 = vpop.permute.xlu1 %3464 }
0x3a57   :  { %v3486_v46 = vsel %vm3485_vm12, %v3484_v15, %v3465_v33 }
0x3a5a   :  { %v3473_v0 = vpop.permute.xlu1 %3472 }
0x3a5e   :  { %v3481_v27 = vpop.permute.xlu1 %3480 }
0x3a67   :  { %3476 = vrot.lane.b32.xlu0 %v5118_v5, %s4156_s26  ;;  %s4162_s26 = smov [#allocation2]   ;;  %v3487_v5 = vsel %vm463_vm5, %v3486_v46, %v3469_v52 }
0x3a68   :  { %s3516_s29 = sshll.u32 %s4162_s26, 4  ;;  %v3489_v12 = vsel %vm3488_vm13, %v3487_v5, %v3473_v0  ;;  %s3517_s29 = int_to_ptr.vmem [resolvable:$true] %s3516_s29 }
0x3ada   :  { %v3450_v25 = vpop.xlane.xlu0 %3449 }
0x3adb   :  { %v3451_v28 = vcvt.f32.s32 %v3450_v25 }
0x3add   :  { %v3454_v14 = vadd.s32 %v3453_v26, %v3451_v28 }
0x3ade   :  { %v3477_v17 = vpop.permute.xlu0 %3476 }
0x3adf   :  { %v3491_v38 = vsel %vm3490_vm14, %v3489_v12, %v3477_v17  ;;  %v3508_v55 = vsel %vm3507_vm15, %v5134_v57, %v3454_v14 }
0x3ae0   :  { %v3493_v39 = vsel %vm3492_vm2, %v3491_v38, %v3481_v27  ;;  %3509 = vst.msk [vmem:[#allocation4] sm:$0xff] %vm217_vm4, %v3508_v55 }
0x3ae1   :  { %3494 = vst [vmem:[#allocation2] sm:$0xff] %v3493_v39 }
0x3ae2   :  { %4119 = shalt.err (!%p4116_p4)
}
0x3ae3   :  { %3529 = dma.vmem_to_hbm [thread:$0]  %s3527_s25, 128, %s5199_s4, [#allocation5]  }
0x3ae4   :  { %s4128_s7 = scalar_lea.vmem %s3517_s29, 128  ;;  %p4133_p6 = scmp.lt.s32.totalorder %s3517_s29, %s3517_s29 }
0x3ae5   :  { %p4129_p5 = scmp.ne.s32.totalorder %s3517_s29, %s4128_s7  ;;  %p4134_p7 = scmp.lt.s32.totalorder %s4128_s7, %s4128_s7 }
0x3ae7   :  { %p4135_p8 = por %p4134_p7, %p4133_p6 }
0x3ae9   :  { %p4136_p9 = pnand %p4135_p8, %p4129_p5 }
0x3aeb   :  { %4139 = shalt.err (!%p4136_p9)
}
0x3aec   :  { %3519 = dma.vmem_to_hbm [thread:$0]  %s3517_s29, 128, %s5198_s3, [#allocation3]  }
0x3aed   :  { %4148 = dma.done.wait [#allocation3], 128  }
0x3aee   :  { %4149 = vsyncadd [#allocation3], 4294967168 }
0x3aef   :  { %4150 = dma.done.wait [#allocation5], 128  }
0x3af0   :  { %4151 = vsyncadd [#allocation5], 4294967168 }
0x3af1   :  { %3536 = vsyncpa [#allocation3], 1 }
0x3af2   :  { %3537 = vsyncpa [#allocation5], 1 }

</bundles_post_ra>
